<compile_context>
chip_gen: v5e
topology: v5e:2x2
jax: 0.10.0
libtpu: 0.0.40
codegen_flags: <defaults>
</compile_context>

<pallas_src>
import functools

import jax
import jax.numpy as jnp
from jax import lax
from jax.experimental import pallas as pl
from jax.experimental.pallas import tpu as pltpu


def _round_up(v, m):
    return (v + m - 1) // m * m


# ----------------------------------------------------------------------------
# Pallas kernels: fused matmul + bias + activation
# ----------------------------------------------------------------------------
def _epilogue(y, b, act):
    y = y + b                                  # (tm, tn) + (1, tn)
    if act == "leaky_relu":
        return jnp.where(y > 0, y, jnp.float32(0.2) * y)
    if act == "sigmoid":
        # Exact sigmoid (heads are tiny; avoids the approx-reciprocal range
        # issue flagged in the correctness review).
        return 1.0 / (1.0 + jnp.exp(-y))
    return y


def _mm_bias_act_direct_kernel(x_ref, w_ref, b_ref, o_ref, *, act):
    """Single-K-block fast path: no accumulator scratch, no zero-init."""
    y = jnp.dot(x_ref[...], w_ref[...], preferred_element_type=jnp.float32)
    o_ref[...] = _epilogue(y, b_ref[...], act).astype(o_ref.dtype)


def _mm_bias_act_acc_kernel(x_ref, w_ref, b_ref, o_ref, acc_ref, *, act):
    """K-tiled path: f32 VMEM accumulator, epilogue at the last K step."""
    k = pl.program_id(2)

    @pl.when(k == 0)
    def _():
        acc_ref[...] = jnp.zeros_like(acc_ref)

    acc_ref[...] += jnp.dot(x_ref[...], w_ref[...],
                            preferred_element_type=jnp.float32)

    @pl.when(k == pl.num_programs(2) - 1)
    def _():
        o_ref[...] = _epilogue(acc_ref[...], b_ref[...], act).astype(o_ref.dtype)


def matmul_bias_act(x, w, b, act, out_dtype=jnp.float32, n_valid=None):
    """act(x:(M,K) @ w:(K,N) + b:(N,)) via a tiled Pallas kernel.

    MXU inputs are bf16, accumulation is f32.  M is zero-padded to the tile
    size (padded rows sliced off afterwards); K/N are only padded when they
    are not already block-aligned (never for the body layers thanks to the
    padded-channel flow).  `n_valid` optionally slices the column dimension
    of the result (used for the heads); body layers keep padded channels.
    """
    M, K = x.shape
    K2, N = w.shape
    assert K == K2 and b.shape == (N,)

    # Tile selection: 128-multiples, capped so the double-buffered footprint
    # stays ~7 MiB -> fits v7x's 64 MiB VMEM and is generous for v5e/v6e.
    tm = min(256, _round_up(M, 16))        # bf16 packs [16,128] per vreg
    tn = min(512, _round_up(N, 128))
    if K <= 2048:
        tk = K                             # full-K block (legal even if K<128)
    elif K % 2048 == 0:
        tk = 2048
    elif K % 1024 == 0:
        tk = 1024
    else:
        tk = 2048                          # generic fallback (zero-pads K)
    Mp = _round_up(M, tm)
    Kp = _round_up(K, tk)
    Np = _round_up(N, tn)

    xb = x.astype(jnp.bfloat16)            # no-op if already bf16
    wb = w.astype(jnp.bfloat16)
    if (Mp, Kp) != (M, K):
        xb = jnp.pad(xb, ((0, Mp - M), (0, Kp - K)))
    if (Kp, Np) != (K, N):
        wb = jnp.pad(wb, ((0, Kp - K), (0, Np - N)))
    bp = b.astype(jnp.float32)
    if Np != N:
        bp = jnp.pad(bp, (0, Np - N))
    bp = bp.reshape(1, Np)

    out_bytes = Mp * Np * jnp.dtype(out_dtype).itemsize
    cost = pl.CostEstimate(
        flops=2 * Mp * Np * Kp,
        transcendentals=Mp * Np if act == "sigmoid" else 0,
        bytes_accessed=(Mp * Kp + Kp * Np) * 2 + Np * 4 + out_bytes,
    )

    def cparams(sem):
        return pltpu.CompilerParams(dimension_semantics=sem,
                                    vmem_limit_bytes=48 * 1024 * 1024)

    if Kp == tk:
        out = pl.pallas_call(
            functools.partial(_mm_bias_act_direct_kernel, act=act),
            out_shape=jax.ShapeDtypeStruct((Mp, Np), out_dtype),
            grid_spec=pltpu.PrefetchScalarGridSpec(
                num_scalar_prefetch=0,
                grid=(Mp // tm, Np // tn),
                in_specs=[
                    pl.BlockSpec((tm, Kp), lambda i, j: (i, 0)),
                    pl.BlockSpec((Kp, tn), lambda i, j: (0, j)),
                    pl.BlockSpec((1, tn), lambda i, j: (0, j)),
                ],
                out_specs=pl.BlockSpec((tm, tn), lambda i, j: (i, j)),
            ),
            compiler_params=cparams(("parallel", "parallel")),
            cost_estimate=cost,
        )(xb, wb, bp)
    else:
        out = pl.pallas_call(
            functools.partial(_mm_bias_act_acc_kernel, act=act),
            out_shape=jax.ShapeDtypeStruct((Mp, Np), out_dtype),
            grid_spec=pltpu.PrefetchScalarGridSpec(
                num_scalar_prefetch=0,
                grid=(Mp // tm, Np // tn, Kp // tk),
                in_specs=[
                    pl.BlockSpec((tm, tk), lambda i, j, k: (i, k)),
                    pl.BlockSpec((tk, tn), lambda i, j, k: (k, j)),
                    pl.BlockSpec((1, tn), lambda i, j, k: (0, j)),
                ],
                out_specs=pl.BlockSpec((tm, tn), lambda i, j, k: (i, j)),
                scratch_shapes=[pltpu.VMEM((tm, tn), jnp.float32)],
            ),
            compiler_params=cparams(("parallel", "parallel", "arbitrary")),
            cost_estimate=cost,
        )(xb, wb, bp)

    if Mp != M:
        out = out[:M]
    if n_valid is not None and n_valid != out.shape[1]:
        out = out[:, :n_valid]
    return out


# ----------------------------------------------------------------------------
# Glue: NHWC im2col -> (N*Ho*Wo, kh*kw*C) patch matrix (dtype-preserving)
# ----------------------------------------------------------------------------
def im2col_nhwc(x, kh, kw, stride, pad):
    N, H, W, C = x.shape
    xp = jnp.pad(x, ((0, 0), (pad, pad), (pad, pad), (0, 0)))
    Ho = (H + 2 * pad - kh) // stride + 1
    Wo = (W + 2 * pad - kw) // stride + 1
    patches = []
    for i in range(kh):
        for j in range(kw):
            patches.append(
                xp[:, i:i + Ho * stride:stride, j:j + Wo * stride:stride, :])
    p = jnp.stack(patches, axis=3)                 # (N, Ho, Wo, kh*kw, C)
    return p.reshape(N * Ho * Wo, kh * kw * C), Ho, Wo


# ----------------------------------------------------------------------------
# Parameters: raw (PyTorch layout) + prepared (bf16 matmul matrices)
# ----------------------------------------------------------------------------
def build_params(key, input_size, image_channels, num_classes):
    """Mirror FlexibleDiscriminator.__init__ (weights in (Cout,Cin,kh,kw))."""
    body = []
    current_size = input_size
    input_channels = 32
    cin = image_channels
    first = True
    while current_size > 7:
        cout = input_channels * 2
        key, kw_, kb_ = jax.random.split(key, 3)
        fan_in = cin * 16
        w = jax.random.normal(kw_, (cout, cin, 4, 4), jnp.float32) / jnp.sqrt(fan_in)
        b = 0.01 * jax.random.normal(kb_, (cout,), jnp.float32)
        bn = None
        if not first:
            key, kg, kbt, kmu, kvv = jax.random.split(key, 5)
            bn = {"gamma": 1.0 + 0.1 * jax.random.normal(kg, (cout,), jnp.float32),
                  "beta": 0.05 * jax.random.normal(kbt, (cout,), jnp.float32),
                  "mean": 0.1 * jax.random.normal(kmu, (cout,), jnp.float32),
                  "var": jnp.exp(0.1 * jax.random.normal(kvv, (cout,), jnp.float32))}
        body.append({"w": w, "b": b, "bn": bn})
        cin = cout
        input_channels *= 2
        current_size //= 2
        first = False

    key, k1, k2, k3, k4 = jax.random.split(key, 5)
    fan_in = cin * 16
    w_rf = jax.random.normal(k1, (1, cin, 4, 4), jnp.float32) / jnp.sqrt(fan_in)
    b_rf = 0.01 * jax.random.normal(k2, (1,), jnp.float32)
    w_jig = jax.random.normal(k3, (num_classes, cin, 4, 4), jnp.float32) / jnp.sqrt(fan_in)
    b_jig = 0.01 * jax.random.normal(k4, (num_classes,), jnp.float32)
    return {"body": body, "w_rf": w_rf, "b_rf": b_rf,
            "w_jig": w_jig, "b_jig": b_jig, "num_classes": num_classes}


def fold_bn(w, b, gamma, beta, mean, var, eps=1e-5):
    """Eval-mode BatchNorm2d fold into the preceding Conv2d."""
    scale = gamma / jnp.sqrt(var + eps)
    return w * scale[:, None, None, None], (b - mean) * scale + beta


def prepare_params(raw, image_channels):
    """Fold BN, convert weights to (16*Cin_p, Cout_p) bf16 matmul matrices with
    channels padded to multiples of 128 so padded activations flow end-to-end."""
    body = []
    cin_p = image_channels                      # first layer input is unpadded
    for layer in raw["body"]:
        w, b = layer["w"], layer["b"]
        if layer["bn"] is not None:
            w, b = fold_bn(w, b, **layer["bn"])
        cout, cin, kh, kw = w.shape
        if cin_p != cin:                        # match padded incoming channels
            w = jnp.pad(w, ((0, 0), (0, cin_p - cin), (0, 0), (0, 0)))
        cout_p = _round_up(cout, 128)
        w_mat = jnp.transpose(w, (2, 3, 1, 0)).reshape(kh * kw * cin_p, cout)
        if cout_p != cout:
            w_mat = jnp.pad(w_mat, ((0, 0), (0, cout_p - cout)))
            b = jnp.pad(b, (0, cout_p - cout))
        body.append({"w_mat": w_mat.astype(jnp.bfloat16),
                     "b": b.astype(jnp.float32),
                     "cout_p": cout_p})
        cin_p = cout_p

    def head_mat(w):
        cout, cin, kh, kw = w.shape
        if cin_p != cin:
            w = jnp.pad(w, ((0, 0), (0, cin_p - cin), (0, 0), (0, 0)))
        return jnp.transpose(w, (2, 3, 1, 0)).reshape(kh * kw * cin_p, cout)

    w_heads = jnp.concatenate([head_mat(raw["w_rf"]), head_mat(raw["w_jig"])],
                              axis=1)
    b_heads = jnp.concatenate([raw["b_rf"], raw["b_jig"]])
    return {"body": body,
            "w_heads": w_heads.astype(jnp.bfloat16),
            "b_heads": b_heads.astype(jnp.float32),
            "num_classes": raw["num_classes"]}


# ----------------------------------------------------------------------------
# Forward pass (input NCHW like PyTorch; internally NHWC bf16)
# ----------------------------------------------------------------------------
def flexible_discriminator_forward(prepared, x_nchw):
    # NCHW -> NHWC once, cast to bf16 once (patch matrices are then bf16).
    h = jnp.transpose(x_nchw, (0, 2, 3, 1)).astype(jnp.bfloat16)
    for layer in prepared["body"]:
        nb = h.shape[0]
        patches, ho, wo = im2col_nhwc(h, 4, 4, stride=2, pad=1)
        y = matmul_bias_act(patches, layer["w_mat"], layer["b"],
                            act="leaky_relu", out_dtype=jnp.bfloat16)
        h = y.reshape(nb, ho, wo, layer["cout_p"])   # padded channels flow on

    nb, hs, ws, c = h.shape
    nc = prepared["num_classes"]
    if hs == 4 and ws == 4:
        # 4x4 "valid" conv on a 4x4 map == flatten (identical (kh,kw,c) order).
        patches, ho, wo = h.reshape(nb, 16 * c), 1, 1
    else:
        patches, ho, wo = im2col_nhwc(h, 4, 4, stride=1, pad=0)
    out = matmul_bias_act(patches, prepared["w_heads"], prepared["b_heads"],
                          act="sigmoid", out_dtype=jnp.float32,
                          n_valid=1 + nc)
    out = out.reshape(nb, ho, wo, 1 + nc)
    rf = jnp.transpose(out[..., :1], (0, 3, 1, 2))                   # (B,1,ho,wo)
    jig = jnp.transpose(out[..., 1:], (0, 3, 1, 2)).reshape(nb, -1)  # (B, nc*ho*wo)
    return rf, jig


# ----------------------------------------------------------------------------
# Pure-JAX f32 reference (matches the PyTorch module in eval mode)
# ----------------------------------------------------------------------------
def reference_forward(raw, x_nchw, eps=1e-5):
    hp = lax.Precision.HIGHEST

    def conv(h, w, b, stride, pad):
        y = lax.conv_general_dilated(
            h, w, window_strides=(stride, stride),
            padding=((pad, pad), (pad, pad)),
            dimension_numbers=("NCHW", "OIHW", "NCHW"), precision=hp)
        return y + b[None, :, None, None]

    h = x_nchw
    for layer in raw["body"]:
        h = conv(h, layer["w"], layer["b"], 2, 1)
        if layer["bn"] is not None:
            bn = layer["bn"]
            h = (h - bn["mean"][None, :, None, None]) * (
                bn["gamma"][None, :, None, None]
                / jnp.sqrt(bn["var"][None, :, None, None] + eps)
            ) + bn["beta"][None, :, None, None]
        h = jnp.where(h > 0, h, 0.2 * h)
    rf = jax.nn.sigmoid(conv(h, raw["w_rf"], raw["b_rf"], 1, 0))
    jig = jax.nn.sigmoid(conv(h, raw["w_jig"], raw["b_jig"], 1, 0))
    return rf, jig.reshape(x_nchw.shape[0], -1)


# ----------------------------------------------------------------------------
if __name__ == "__main__":
    key = jax.random.PRNGKey(0)
    key, kx, kp, ka, kb = jax.random.split(key, 5)

    # --- sanity-check the K-accumulating kernel path (K > 2048) -------------
    a = jax.random.normal(ka, (64, 4096), jnp.float32)
    bm = jax.random.normal(kb, (4096, 256), jnp.float32) / 64.0
    y = matmul_bias_act(a, bm, jnp.zeros((256,), jnp.float32), act="none")
    y_ref = jnp.dot(a, bm, precision=lax.Precision.HIGHEST)
    jax.block_until_ready(y)
    assert bool(jnp.allclose(y, y_ref, atol=5e-2)), \
        float(jnp.max(jnp.abs(y - y_ref)))

    # --- FlexibleDiscriminator forward at small shapes -----------------------
    input_size = 16            # model loop: 16 -> 8 -> 4  (two body conv blocks)
    image_channels = 3
    num_classes = 30
    batch = 2

    raw = build_params(kp, input_size, image_channels, num_classes)
    prepared = prepare_params(raw, image_channels)
    x = jax.random.normal(kx, (batch, image_channels, input_size, input_size),
                          jnp.float32)

    fwd = jax.jit(functools.partial(flexible_discriminator_forward, prepared))
    rf, jig = fwd(x)
    jax.block_until_ready((rf, jig))

    assert rf.shape == (batch, 1, 1, 1), rf.shape
    assert jig.shape == (batch, num_classes), jig.shape
    assert bool(jnp.all((rf >= 0) & (rf <= 1)))
    assert bool(jnp.all((jig >= 0) & (jig <= 1)))

    # Compare against the f32 reference (bf16 MXU path -> loose tolerance).
    rf_ref, jig_ref = reference_forward(raw, x)
    assert bool(jnp.allclose(rf, rf_ref, atol=5e-2)), \
        float(jnp.max(jnp.abs(rf - rf_ref)))
    assert bool(jnp.allclose(jig, jig_ref, atol=5e-2)), \
        float(jnp.max(jnp.abs(jig - jig_ref)))

    print("KERNEL_OK")
</pallas_src>

<mosaic_0001>
module attributes {stable_mosaic.version = 11 : i64} {
  func.func @_mm_bias_act_acc_kernel(%arg0: i32, %arg1: i32, %arg2: i32, %arg3: memref<64x2048xbf16, #tpu.memory_space<vmem>>, %arg4: memref<2048x256xbf16, #tpu.memory_space<vmem>>, %arg5: memref<1x256xf32, #tpu.memory_space<vmem>>, %arg6: memref<64x256xf32, #tpu.memory_space<vmem>>, %arg7: memref<64x256xf32, #tpu.memory_space<vmem>>) attributes {dimension_semantics = [#tpu.dimension_semantics<parallel>, #tpu.dimension_semantics<parallel>, #tpu.dimension_semantics<arbitrary>], iteration_bounds = array<i64: 1, 1, 2>, scalar_prefetch = 0 : i64, scratch_operands = 1 : i64, tpu.core_type = #tpu.core_type<tc>, window_params = [{transform_indices = @transform_0, window_bounds = array<i64: 64, 2048>}, {transform_indices = @transform_1, window_bounds = array<i64: 2048, 256>}, {transform_indices = @transform_2, window_bounds = array<i64: 1, 256>}, {transform_indices = @transform_3, window_bounds = array<i64: 64, 256>}]} {
    %c0_i32 = arith.constant 0 : i32
    %0 = arith.cmpi eq, %arg2, %c0_i32 : i32
    %1 = arith.extui %0 : i1 to i32
    %c0_i32_0 = arith.constant 0 : i32
    %2 = arith.cmpi ne, %1, %c0_i32_0 : i32
    scf.if %2 {
      %cst_9 = arith.constant 0.000000e+00 : f32
      %12 = vector.broadcast %cst_9 : f32 to vector<64x256xf32>
      %c0_10 = arith.constant 0 : index
      %c0_11 = arith.constant 0 : index
      %13 = vector.load %arg7[%c0_10, %c0_11] : memref<64x256xf32, #tpu.memory_space<vmem>>, vector<64x256xf32>
      tpu.vector_store %arg7[%c0_10, %c0_11], %12 {strides = array<i32>} : memref<64x256xf32, #tpu.memory_space<vmem>>, vector<64x256xf32>,
    } else {
    }
    %c0 = arith.constant 0 : index
    %c0_1 = arith.constant 0 : index
    %3 = vector.load %arg7[%c0, %c0_1] : memref<64x256xf32, #tpu.memory_space<vmem>>, vector<64x256xf32>
    %c0_2 = arith.constant 0 : index
    %c0_3 = arith.constant 0 : index
    %4 = vector.load %arg3[%c0_2, %c0_3] : memref<64x2048xbf16, #tpu.memory_space<vmem>>, vector<64x2048xbf16>
    %c0_4 = arith.constant 0 : index
    %c0_5 = arith.constant 0 : index
    %5 = vector.load %arg4[%c0_4, %c0_5] : memref<2048x256xbf16, #tpu.memory_space<vmem>>, vector<2048x256xbf16>
    %cst = arith.constant dense<0.000000e+00> : vector<64x256xf32>
    %6 = tpu.matmul %4, %5, %cst {dimension_numbers = #tpu.dot_dimension_numbers<[1], [0], [0], [1], [0, 0, 1, 1], [], []>} : vector<64x2048xbf16>, vector<2048x256xbf16>, vector<64x256xf32> -> vector<64x256xf32>
    %7 = arith.addf %3, %6 : vector<64x256xf32>
    %c0_6 = arith.constant 0 : index
    %c0_7 = arith.constant 0 : index
    %8 = vector.load %arg7[%c0_6, %c0_7] : memref<64x256xf32, #tpu.memory_space<vmem>>, vector<64x256xf32>
    tpu.vector_store %arg7[%c0_6, %c0_7], %7 {strides = array<i32>} : memref<64x256xf32, #tpu.memory_space<vmem>>, vector<64x256xf32>,
    %c1_i32 = arith.constant 1 : i32
    %9 = arith.cmpi eq, %arg2, %c1_i32 : i32
    %10 = arith.extui %9 : i1 to i32
    %c0_i32_8 = arith.constant 0 : i32
    %11 = arith.cmpi ne, %10, %c0_i32_8 : i32
    scf.if %11 {
      %c0_9 = arith.constant 0 : index
      %c0_10 = arith.constant 0 : index
      %12 = vector.load %arg7[%c0_9, %c0_10] : memref<64x256xf32, #tpu.memory_space<vmem>>, vector<64x256xf32>
      %c0_11 = arith.constant 0 : index
      %c0_12 = arith.constant 0 : index
      %13 = vector.load %arg5[%c0_11, %c0_12] : memref<1x256xf32, #tpu.memory_space<vmem>>, vector<1x256xf32>
      %14 = vector.broadcast %13 : vector<1x256xf32> to vector<64x256xf32>
      %15 = arith.addf %12, %14 : vector<64x256xf32>
      %c0_13 = arith.constant 0 : index
      %c0_14 = arith.constant 0 : index
      %16 = vector.load %arg6[%c0_13, %c0_14] : memref<64x256xf32, #tpu.memory_space<vmem>>, vector<64x256xf32>
      tpu.vector_store %arg6[%c0_13, %c0_14], %15 {strides = array<i32>} : memref<64x256xf32, #tpu.memory_space<vmem>>, vector<64x256xf32>,
    } else {
    }
    return
  }
  func.func @transform_0(%arg0: i32, %arg1: i32, %arg2: i32) -> (i32, i32) {
    %c0_i32 = arith.constant 0 : i32
    return %arg0, %arg2 : i32, i32
  }
  func.func @transform_1(%arg0: i32, %arg1: i32, %arg2: i32) -> (i32, i32) {
    %c0_i32 = arith.constant 0 : i32
    return %arg2, %arg1 : i32, i32
  }
  func.func @transform_2(%arg0: i32, %arg1: i32, %arg2: i32) -> (i32, i32) {
    %c0_i32 = arith.constant 0 : i32
    %c0_i32_0 = arith.constant 0 : i32
    return %c0_i32, %arg1 : i32, i32
  }
  func.func @transform_3(%arg0: i32, %arg1: i32, %arg2: i32) -> (i32, i32) {
    %c0_i32 = arith.constant 0 : i32
    return %arg0, %arg1 : i32, i32
  }
}

</mosaic_0001>

<bundles_post_ra>
// kernel: tpu_custom_call.1
= control target key start
LH: loop header
LB: loop body
LE: loop exit
PB: predicated region body
PF: predicated region fallthrough
CT: control target
= control target key end

     0   :  { %s6573_s0 = inlined_call_operand.hbm [shape: bf16[64,4096], index: 0, kind: input, shape index: {}]   ;;  %s6574_s1 = inlined_call_operand.hbm [shape: bf16[4096,256], index: 1, kind: input, shape index: {}]   ;;  %s6575_s2 = inlined_call_operand.hbm [shape: f32[1,256], index: 2, kind: input, shape index: {}]   ;;  %s6576_s3 = inlined_call_operand.hbm [shape: f32[64,256], index: 3, kind: output, shape index: {}]  }
   0x1   :  { %6613 = sst [smem:[#allocation50_spill]] %s6573_s0 }
   0x2   :  { %6614 = sst [smem:[#allocation51_spill]] %s6575_s2 }
   0x3   :  { %8 = vsyncpa [#allocation4], 0 }
   0x4   :  { %10 = vsyncpa [#allocation4 + $0x1], 0 }
   0x5   :  { %11 = vsyncpa [#allocation7], 0 }
   0x6   :  { %13 = vsyncpa [#allocation7 + $0x1], 0 }
   0x7   :  { %14 = vsyncpa [#allocation5], 0  ;;  %s5305_s12 = smov 0   ;;  %s5307_s13 = smov 0  }
   0x8   :  { %s5309_s14 = smov 0   ;;  %s5311_s15 = smov 0  }
   0x9   :  { %s5313_s16 = smov 0   ;;  %s5315_s17 = smov 0  }
   0xa LB: > { %s5334_s18 = sadd.s32 4294967295, %s5273_s17   ;;  %s48_s19 = sadd.s32 1, %s5261_s14  ;;  %s5273_s17 = sphi %s5315_s17, %s20_s17   ;;  %s5269_s16 = sphi %s5313_s16, %s6697_s16   ;;  %s5265_s15 = sphi %s5311_s15, %s6696_s15   ;;  %s5261_s14 = sphi %s5309_s14, %s6695_s14   ;;  %s5257_s13 = sphi %s5307_s13, %s6694_s13   ;;  %s5253_s12 = sphi %s5305_s12, %s6693_s12  }
   0xb   : > { %p55_p0 = scmp.ne.s32.totalorder %s5261_s14, %s5257_s13  ;;  %p56_p1 = scmp.eq.s32.totalorder %s5273_s17, 0 }
   0xc   : > { %p61_p2 = scmp.ne.s32.totalorder %s5257_s13, %s5253_s12  ;;  %p62_p3 = scmp.eq.s32.totalorder %s5334_s18, 0 }
   0xd   : > { %p5342_p4 = por %p56_p1, %p55_p0  ;;  %p3384_p5 = scmp.ge.s32.totalorder %s5273_s17, 1 }
   0xe   : > { %p5349_p6 = por %p62_p3, %p61_p2  ;;  %p154_p7 = scmp.lt.s32.totalorder %s5273_s17, 3 }
   0xf   : > { %s6617_s2 = sld [smem:[#allocation51_spill]]  ;;  %s5275_s26 = smov [#allocation8]  }
  0x10   : > { %p5357_p8 = pnand %p3384_p5, %p154_p7  ;;  %s170_s27 = sshll.u32 %s5275_s26, 4  ;;  %s171_s27 = int_to_ptr.vmem [resolvable:$true] %s170_s27 }
  0x11   : > { %p5031_p10 = scmp.lt.s32.totalorder %s5273_s17, 2  ;;  %s32_s29 = sadd.s32 1, %s5269_s16 }
  0x12   : > { %p5019_p9 = pneg %p5357_p8  ;;  %p33_p13 = scmp.ge.s32.totalorder %s32_s29, 2 }
  0x13   : > { %p5368_p12 = pnand %p5031_p10, %p5342_p4  ;;  %s181_s30 = sand.u32 1, %s5261_s14  }
  0x14   : > { %p5020_p11 = pnand %p5019_p9, %p62_p3  ;;  %s4684_s4 = sshll.u32 %s5269_s16, 6 }
  0x15   : > { %s168_s24 = sshll.u32 %s6617_s2, 4  ;;  %s6699_s29 = smov (%p33_p13, %s32_s29), 0  ;;  %s169_s24 = int_to_ptr.hbm [resolvable:$true] %s168_s24 }
  0x16   : > { %5022 = dma.hbm_to_vmem [thread:$0]  (!%p5020_p11), %s169_s24, 32, %s171_s27, [#allocation7]  }
  0x17   : > { %6620 = sst [smem:[#allocation14_spill]] %s6699_s29  ;;  %s3387_s5 = sshll.u32 %s181_s30, 9 }
  0x18   : > { %s44_s6 = ssub.s32 %s5269_s16, %s6699_s29  ;;  %s6621_s0 = sld [smem:[#allocation50_spill]] }
  0x19   : > { %p46_p0 = scmp.eq.s32.totalorder %s44_s6, 0  ;;  %s185_s11 = scalar_lea.vmem [#allocation3], %s3387_s5 }
  0x1a   : > { %s196_s12 = sshll.u32 %s185_s11, 4  ;;  %s206_s22 = sand.u32 1, %s5273_s17   ;;  %s197_s12 = int_to_ptr.vmem [resolvable:$true] %s196_s12 }
  0x1b   : > { %s5385_s20 = scalar_select %p46_p0, %s5261_s14, %s48_s19  }
  0x1c   : > { %s182_s23 = scalar_lea.sflag [#allocation4], %s181_s30  ;;  %s5276_s24 = smov 2048  }
  0x1d   : > { %s5277_s26 = smov 1024   ;;  %s5278_s27 = smov 64  }
  0x1e   : > { %s193_s9 = scalar_lea.hbm %s6621_s0, %s4684_s4  ;;  %s3390_s6 = sshll.u32 %s181_s30, 11 }
  0x1f   : > { %s194_s10 = sshll.u32 %s193_s9, 4  ;;  %s4686_s2 = sshll.u32 %s5269_s16, 11  ;;  %s195_s10 = int_to_ptr.hbm [resolvable:$true] %s194_s10 }
  0x20   : > { %5026 = dma.hbm_to_vmem [thread:$0]  (!%p5368_p12), %s195_s10, 8192, %s197_s12, %s182_s23, %s5276_s24, %s5277_s26, %s5278_s27  }
  0x21   : > { %s218_s5 = scalar_lea.hbm %s6574_s1, %s4686_s2  ;;  %s210_s8 = scalar_lea.vmem [#allocation6], %s3390_s6 }
  0x22   : > { %s221_s9 = sshll.u32 %s210_s8, 4  ;;  %s219_s19 = sshll.u32 %s218_s5, 4  ;;  %s222_s9 = int_to_ptr.vmem [resolvable:$true] %s221_s9  ;;  %s220_s19 = int_to_ptr.hbm [resolvable:$true] %s219_s19 }
  0x23   : > { %s207_s11 = scalar_lea.sflag [#allocation7], %s206_s22  ;;  %s5279_s0 = smov 128  }
  0x24   : > { %s5280_s29 = smov 8   ;;  %233 = sbr.rel (%p5357_p8) target bundleno = 780 (0x30c), region = 32 }
  0x25   : > { %5029 = dma.hbm_to_vmem [thread:$0]  (!%p5368_p12), %s220_s19, 32768, %s222_s9, %s207_s11, %s5279_s0, %s5279_s0, %s5280_s29  }
  0x29   : > { %s235_s30 = sand.u32 1, %s5257_s13  }
  0x2a   : > { %s3395_s10 = sshll.u32 %s235_s30, 9  ;;  %s236_s12 = scalar_lea.sflag [#allocation4], %s235_s30 }
  0x2b   : > { %s5399_s23 = scalar_lea.vmem [#allocation3], %s3395_s10 }
  0x2c   : > { %5236 = dma.done.wait (%p5349_p6), %s236_s12, 8192  }
  0x2d   : > { %5238 = vsyncadd (%p5349_p6), %s236_s12, 4294959104  ;;  %s245_s2 = sand.u32 1, %s5334_s18   ;;  %s3396_s28 = sshll.u32 %s235_s30, 11 }
  0x2e   : > { %s246_s0 = scalar_lea.sflag [#allocation7], %s245_s2  ;;  %s5406_s29 = scalar_lea.vmem [#allocation6], %s3396_s28 }
  0x2f   : > { %5240 = dma.done.wait (%p5349_p6), %s246_s0, 32768  }
  0x30   : > { %5242 = vsyncadd (%p5349_p6), %s246_s0, 4294934528 }
  0x31   : > { %5244 = dma.done.wait (%p62_p3), [#allocation7], 32  }
  0x32   : > { %5246 = vsyncadd (%p62_p3), [#allocation7], 4294967264  ;;  %p3398_p1 = scmp.ne.s32.totalorder %s5265_s15, 0 }
  0x34   : > { %288 = sbr.rel (%p3398_p1) target bundleno = 74 (0x4a), region = 48 }
  0x39   : > { %v5281_v0 = vmov 0.0  }
  0x3a   : > { %289 = vst [vmem:[#allocation2 + $0x30] sm:$0xff] %v5281_v0 }
  0x3b   : > { %290 = vst [vmem:[#allocation2] sm:$0xff] %v5281_v0 }
  0x3c   : > { %291 = vst [vmem:[#allocation2 + $0x58] sm:$0xff] %v5281_v0 }
  0x3d   : > { %292 = vst [vmem:[#allocation2 + $0x18] sm:$0xff] %v5281_v0 }
  0x3e   : > { %293 = vst [vmem:[#allocation2 + $0x50] sm:$0xff] %v5281_v0 }
  0x3f   : > { %294 = vst [vmem:[#allocation2 + $0x68] sm:$0xff] %v5281_v0 }
  0x40   : > { %295 = vst [vmem:[#allocation2 + $0x8] sm:$0xff] %v5281_v0 }
  0x41   : > { %296 = vst [vmem:[#allocation2 + $0x48] sm:$0xff] %v5281_v0 }
  0x42   : > { %297 = vst [vmem:[#allocation2 + $0x40] sm:$0xff] %v5281_v0 }
  0x43   : > { %298 = vst [vmem:[#allocation2 + $0x20] sm:$0xff] %v5281_v0 }
  0x44   : > { %299 = vst [vmem:[#allocation2 + $0x10] sm:$0xff] %v5281_v0 }
  0x45   : > { %300 = vst [vmem:[#allocation2 + $0x38] sm:$0xff] %v5281_v0 }
  0x46   : > { %301 = vst [vmem:[#allocation2 + $0x60] sm:$0xff] %v5281_v0 }
  0x47   : > { %302 = vst [vmem:[#allocation2 + $0x70] sm:$0xff] %v5281_v0 }
  0x48   : > { %303 = vst [vmem:[#allocation2 + $0x78] sm:$0xff] %v5281_v0 }
  0x49   : > { %304 = vst [vmem:[#allocation2 + $0x28] sm:$0xff] %v5281_v0 }
  0x4a PF: > { %v3713_v1 = vld [vmem:[%s5406_s29 + $0x70] sm:$0xf]  ;;  %v4766_v2 = vld [vmem:[%s5406_s29 + $0x74] sm:$0xf0]  ;;  %v3705_v12 = vld [vmem:[%s5406_s29 + $0x60] sm:$0xf] }
  0x4b   : > { %v3777_v3 = vld [vmem:[%s5406_s29 + $0xf0] sm:$0xf]  ;;  %v3714_v4 = vor.u32 %v4766_v2, %v3713_v1  ;;  %v4782_v5 = vld [vmem:[%s5406_s29 + $0xf4] sm:$0xf0]  ;;  %v4764_v14 = vld [vmem:[%s5406_s29 + $0x64] sm:$0xf0] }
  0x4c   : > { %v3841_v6 = vld [vmem:[%s5406_s29 + $0x170] sm:$0xf]  ;;  %v4798_v7 = vld [vmem:[%s5406_s29 + $0x174] sm:$0xf0]  ;;  %v3778_v8 = vor.u32 %v4782_v5, %v3777_v3  ;;  %v3769_v15 = vld [vmem:[%s5406_s29 + $0xe0] sm:$0xf]  ;;  %v3706_v17 = vor.u32 %v4764_v14, %v3705_v12 }
  0x4d   : > { %v3842_v9 = vor.u32 %v4798_v7, %v3841_v6  ;;  %v3905_v10 = vld [vmem:[%s5406_s29 + $0x1f0] sm:$0xf]  ;;  %v4814_v11 = vld [vmem:[%s5406_s29 + $0x1f4] sm:$0xf0]  ;;  %2241 = vmatpush.bf16.msra.mxu0 %v3714_v4  ;;  %v4780_v16 = vld [vmem:[%s5406_s29 + $0xe4] sm:$0xf0] }
  0x4e   : > { %v3906_v13 = vor.u32 %v4814_v11, %v3905_v10  ;;  %2270 = vmatpush.bf16.msra.mxu1 %v3778_v8  ;;  %v3770_v18 = vor.u32 %v4780_v16, %v3769_v15  ;;  %v3833_v19 = vld [vmem:[%s5406_s29 + $0x160] sm:$0xf]  ;;  %v4796_v20 = vld [vmem:[%s5406_s29 + $0x164] sm:$0xf0]  ;;  %v3697_v24 = vld [vmem:[%s5406_s29 + $0x50] sm:$0xf] }
  0x4f   : > { %2299 = vmatpush.bf16.msra.mxu2 %v3842_v9  ;;  %v3897_v21 = vld [vmem:[%s5406_s29 + $0x1e0] sm:$0xf]  ;;  %v3834_v22 = vor.u32 %v4796_v20, %v3833_v19  ;;  %v4812_v23 = vld [vmem:[%s5406_s29 + $0x1e4] sm:$0xf0]  ;;  %v4762_v25 = vld [vmem:[%s5406_s29 + $0x54] sm:$0xf0] }
  0x50   : > { %2328 = vmatpush.bf16.msra.mxu3 %v3906_v13  ;;  %v3898_v26 = vor.u32 %v4812_v23, %v3897_v21  ;;  %v3761_v27 = vld [vmem:[%s5406_s29 + $0xd0] sm:$0xf]  ;;  %v4778_v28 = vld [vmem:[%s5406_s29 + $0xd4] sm:$0xf0]  ;;  %v3698_v30 = vor.u32 %v4762_v25, %v3697_v24  ;;  %v3689_v36 = vld [vmem:[%s5406_s29 + $0x40] sm:$0xf] }
  0x51   : > { %v3825_v29 = vld [vmem:[%s5406_s29 + $0x150] sm:$0xf]  ;;  %2242 = vmatpush.bf16.msra.mxu0 %v3706_v17  ;;  %v4794_v31 = vld [vmem:[%s5406_s29 + $0x154] sm:$0xf0]  ;;  %v3762_v34 = vor.u32 %v4778_v28, %v3761_v27  ;;  %v4760_v37 = vld [vmem:[%s5406_s29 + $0x44] sm:$0xf0] }
  0x52   : > { %v3889_v32 = vld [vmem:[%s5406_s29 + $0x1d0] sm:$0xf]  ;;  %v4810_v33 = vld [vmem:[%s5406_s29 + $0x1d4] sm:$0xf0]  ;;  %2271 = vmatpush.bf16.msra.mxu1 %v3770_v18  ;;  %v3826_v35 = vor.u32 %v4794_v31, %v3825_v29  ;;  %v3753_v38 = vld [vmem:[%s5406_s29 + $0xc0] sm:$0xf]  ;;  %v3690_v45 = vor.u32 %v4760_v37, %v3689_v36 }
  0x53   : > { %2300 = vmatpush.bf16.msra.mxu2 %v3834_v22  ;;  %v3890_v39 = vor.u32 %v4810_v33, %v3889_v32  ;;  %v4776_v40 = vld [vmem:[%s5406_s29 + $0xc4] sm:$0xf0]  ;;  %v3817_v41 = vld [vmem:[%s5406_s29 + $0x140] sm:$0xf]  ;;  %v3681_v48 = vld [vmem:[%s5406_s29 + $0x30] sm:$0xf] }
  0x54   : > { %2329 = vmatpush.bf16.msra.mxu3 %v3898_v26  ;;  %v4792_v42 = vld [vmem:[%s5406_s29 + $0x144] sm:$0xf0]  ;;  %v3881_v43 = vld [vmem:[%s5406_s29 + $0x1c0] sm:$0xf]  ;;  %v3754_v46 = vor.u32 %v4776_v40, %v3753_v38  ;;  %v4758_v49 = vld [vmem:[%s5406_s29 + $0x34] sm:$0xf0] }
  0x55   : > { %v4808_v44 = vld [vmem:[%s5406_s29 + $0x1c4] sm:$0xf0]  ;;  %2243 = vmatpush.bf16.msra.mxu0 %v3698_v30  ;;  %v3818_v47 = vor.u32 %v4792_v42, %v3817_v41  ;;  %v3745_v50 = vld [vmem:[%s5406_s29 + $0xb0] sm:$0xf]  ;;  %v4774_v52 = vld [vmem:[%s5406_s29 + $0xb4] sm:$0xf0]  ;;  %v3682_v57 = vor.u32 %v4758_v49, %v3681_v48 }
  0x56   : > { %2272 = vmatpush.bf16.msra.mxu1 %v3762_v34  ;;  %v3882_v51 = vor.u32 %v4808_v44, %v3881_v43  ;;  %v3809_v53 = vld [vmem:[%s5406_s29 + $0x130] sm:$0xf]  ;;  %v4790_v54 = vld [vmem:[%s5406_s29 + $0x134] sm:$0xf0]  ;;  %v3746_v58 = vor.u32 %v4774_v52, %v3745_v50  ;;  %v3673_v60 = vld [vmem:[%s5406_s29 + $0x20] sm:$0xf] }
  0x57   : > { %2301 = vmatpush.bf16.msra.mxu2 %v3826_v35  ;;  %v3873_v55 = vld [vmem:[%s5406_s29 + $0x1b0] sm:$0xf]  ;;  %v4806_v56 = vld [vmem:[%s5406_s29 + $0x1b4] sm:$0xf0]  ;;  %v3810_v59 = vor.u32 %v4790_v54, %v3809_v53  ;;  %v4756_v61 = vld [vmem:[%s5406_s29 + $0x24] sm:$0xf0] }
  0x58   : > { %2330 = vmatpush.bf16.msra.mxu3 %v3890_v39  ;;  %v3737_v62 = vld [vmem:[%s5406_s29 + $0xa0] sm:$0xf]  ;;  %v3874_v63 = vor.u32 %v4806_v56, %v3873_v55  ;;  %v4772_v0 = vld [vmem:[%s5406_s29 + $0xa4] sm:$0xf0]  ;;  %v3674_v5 = vor.u32 %v4756_v61, %v3673_v60  ;;  %v3665_v8 = vld [vmem:[%s5406_s29 + $0x10] sm:$0xf] }
  0x59   : > { %2244 = vmatpush.bf16.msra.mxu0 %v3690_v45  ;;  %v3801_v1 = vld [vmem:[%s5406_s29 + $0x120] sm:$0xf]  ;;  %v4788_v2 = vld [vmem:[%s5406_s29 + $0x124] sm:$0xf0]  ;;  %v3738_v6 = vor.u32 %v4772_v0, %v3737_v62  ;;  %v4754_v9 = vld [vmem:[%s5406_s29 + $0x14] sm:$0xf0] }
  0x5a   : > { %2273 = vmatpush.bf16.msra.mxu1 %v3754_v46  ;;  %v3865_v3 = vld [vmem:[%s5406_s29 + $0x1a0] sm:$0xf]  ;;  %v4804_v4 = vld [vmem:[%s5406_s29 + $0x1a4] sm:$0xf0]  ;;  %v3802_v7 = vor.u32 %v4788_v2, %v3801_v1  ;;  %v3729_v10 = vld [vmem:[%s5406_s29 + $0x90] sm:$0xf]  ;;  %v3666_v18 = vor.u32 %v4754_v9, %v3665_v8 }
  0x5b   : > { %2302 = vmatpush.bf16.msra.mxu2 %v3818_v47  ;;  %v3866_v11 = vor.u32 %v4804_v4, %v3865_v3  ;;  %v4770_v12 = vld [vmem:[%s5406_s29 + $0x94] sm:$0xf0]  ;;  %v3793_v13 = vld [vmem:[%s5406_s29 + $0x110] sm:$0xf]  ;;  %v3657_v17 = vld [vmem:[%s5406_s29] sm:$0xf] }
  0x5c   : > { %2331 = vmatpush.bf16.msra.mxu3 %v3882_v51  ;;  %v4786_v14 = vld [vmem:[%s5406_s29 + $0x114] sm:$0xf0]  ;;  %v3857_v15 = vld [vmem:[%s5406_s29 + $0x190] sm:$0xf]  ;;  %v4752_v19 = vld [vmem:[%s5406_s29 + $0x4] sm:$0xf0]  ;;  %v3730_v22 = vor.u32 %v4770_v12, %v3729_v10 }
  0x5d   : > { %2245 = vmatpush.bf16.msra.mxu0 %v3682_v57  ;;  %v4802_v16 = vld [vmem:[%s5406_s29 + $0x194] sm:$0xf0]  ;;  %v3721_v20 = vld [vmem:[%s5406_s29 + $0x80] sm:$0xf]  ;;  %v4768_v21 = vld [vmem:[%s5406_s29 + $0x84] sm:$0xf0]  ;;  %v3794_v23 = vor.u32 %v4786_v14, %v3793_v13  ;;  %v3658_v35 = vor.u32 %v4752_v19, %v3657_v17 }
  0x5e   : > { %2274 = vmatpush.bf16.msra.mxu1 %v3746_v58  ;;  %v3785_v24 = vld [vmem:[%s5406_s29 + $0x100] sm:$0xf]  ;;  %v4784_v25 = vld [vmem:[%s5406_s29 + $0x104] sm:$0xf0]  ;;  %v3858_v27 = vor.u32 %v4802_v16, %v3857_v15  ;;  %v4687_v31 = vld [vmem:[%s5399_s23 + $0x4] sm:$0xf]  ;;  %v3722_v39 = vor.u32 %v4768_v21, %v3721_v20 }
  0x5f   : > { %2303 = vmatpush.bf16.msra.mxu2 %v3810_v59  ;;  %v3849_v26 = vld [vmem:[%s5406_s29 + $0x180] sm:$0xf]  ;;  %v4800_v28 = vld [vmem:[%s5406_s29 + $0x184] sm:$0xf0]  ;;  %v3403_v32 = vld [vmem:[%s5399_s23 + $0x40] sm:$0xf0]  ;;  %v3786_v40 = vor.u32 %v4784_v25, %v3785_v24 }
  0x60   : > { %2332 = vmatpush.bf16.msra.mxu3 %v3874_v63  ;;  %v3401_v29 = vld [vmem:[%s5399_s23] sm:$0xf]  ;;  %v4097_v33 = vld [vmem:[%s5406_s29 + $0x370] sm:$0xf]  ;;  %v4862_v34 = vld [vmem:[%s5406_s29 + $0x374] sm:$0xf0]  ;;  %v3850_v44 = vor.u32 %v4800_v28, %v3849_v26  ;;  %v5501_v54 = vor.u32 %v4687_v31, %v3403_v32 }
  0x61   : > { %2246 = vmatpush.bf16.msra.mxu0 %v3674_v5  ;;  %v4695_v30 = vld [vmem:[%s5399_s23 + $0x3c] sm:$0xf0]  ;;  %v3409_v36 = vld [vmem:[%s5399_s23 + $0x8] sm:$0xf]  ;;  %v4161_v37 = vld [vmem:[%s5406_s29 + $0x3f0] sm:$0xf]  ;;  %v4098_v45 = vor.u32 %v4862_v34, %v4097_v33 }
  0x62   : > { %2275 = vmatpush.bf16.msra.mxu1 %v3738_v6  ;;  %v4878_v38 = vld [vmem:[%s5406_s29 + $0x3f4] sm:$0xf0]  ;;  %v4696_v41 = vld [vmem:[%s5399_s23 + $0x44] sm:$0xf0]  ;;  %v4688_v42 = vld [vmem:[%s5399_s23 + $0xc] sm:$0xf]  ;;  %v5496_v49 = vor.u32 %v4695_v30, %v3401_v29 }
  0x63   : > { %2304 = vmatpush.bf16.msra.mxu2 %v3802_v7  ;;  %v3411_v43 = vld [vmem:[%s5399_s23 + $0x48] sm:$0xf0]  ;;  %v3969_v46 = vld [vmem:[%s5406_s29 + $0x270] sm:$0xf]  ;;  %v4830_v47 = vld [vmem:[%s5406_s29 + $0x274] sm:$0xf0]  ;;  %v4162_v50 = vor.u32 %v4878_v38, %v4161_v37  ;;  %v5503_v55 = vor.u32 %v4696_v41, %v3409_v36 }
  0x64   : > { %2333 = vmatpush.bf16.msra.mxu3 %v3866_v11  ;;  %v4033_v48 = vld [vmem:[%s5406_s29 + $0x2f0] sm:$0xf]  ;;  %v4846_v51 = vld [vmem:[%s5406_s29 + $0x2f4] sm:$0xf0]  ;;  %v4089_v52 = vld [vmem:[%s5406_s29 + $0x360] sm:$0xf]  ;;  %v5507_v58 = vor.u32 %v4688_v42, %v3411_v43  ;;  %v3970_v59 = vor.u32 %v4830_v47, %v3969_v46 }
  0x65   : > { %2247 = vmatpush.bf16.msra.mxu0 %v3666_v18  ;;  %v4860_v53 = vld [vmem:[%s5406_s29 + $0x364] sm:$0xf0]  ;;  %v4153_v56 = vld [vmem:[%s5406_s29 + $0x3e0] sm:$0xf]  ;;  %v4034_v60 = vor.u32 %v4846_v51, %v4033_v48  ;;  %v4081_v3 = vld [vmem:[%s5406_s29 + $0x350] sm:$0xf] }
  0x66   : > { %2276 = vmatpush.bf16.msra.mxu1 %v3730_v22  ;;  %v4876_v57 = vld [vmem:[%s5406_s29 + $0x3e4] sm:$0xf0]  ;;  %v4090_v61 = vor.u32 %v4860_v53, %v4089_v52  ;;  %v3961_v62 = vld [vmem:[%s5406_s29 + $0x260] sm:$0xf]  ;;  %v4858_v4 = vld [vmem:[%s5406_s29 + $0x354] sm:$0xf0] }
  0x67   : > { %2305 = vmatpush.bf16.msra.mxu2 %v3794_v23  ;;  %v4828_v63 = vld [vmem:[%s5406_s29 + $0x264] sm:$0xf0]  ;;  %v4025_v0 = vld [vmem:[%s5406_s29 + $0x2e0] sm:$0xf]  ;;  %v4154_v1 = vor.u32 %v4876_v57, %v4153_v56  ;;  %v4145_v5 = vld [vmem:[%s5406_s29 + $0x3d0] sm:$0xf]  ;;  %v4082_v9 = vor.u32 %v4858_v4, %v4081_v3 }
  0x68   : > { %2334 = vmatpush.bf16.msra.mxu3 %v3858_v27  ;;  %v4844_v2 = vld [vmem:[%s5406_s29 + $0x2e4] sm:$0xf0]  ;;  %v4874_v6 = vld [vmem:[%s5406_s29 + $0x3d4] sm:$0xf0]  ;;  %v3962_v7 = vor.u32 %v4828_v63, %v3961_v62  ;;  %v3953_v10 = vld [vmem:[%s5406_s29 + $0x250] sm:$0xf] }
  0x69   : > { %2248 = vmatpush.bf16.msra.mxu0 %v3658_v35  ;;  %v4026_v8 = vor.u32 %v4844_v2, %v4025_v0  ;;  %v4826_v11 = vld [vmem:[%s5406_s29 + $0x254] sm:$0xf0]  ;;  %v4017_v12 = vld [vmem:[%s5406_s29 + $0x2d0] sm:$0xf]  ;;  %v4146_v13 = vor.u32 %v4874_v6, %v4145_v5  ;;  %v4073_v15 = vld [vmem:[%s5406_s29 + $0x340] sm:$0xf] }
  0x6a   : > { %2277 = vmatpush.bf16.msra.mxu1 %v3722_v39  ;;  %v4842_v14 = vld [vmem:[%s5406_s29 + $0x2d4] sm:$0xf0]  ;;  %v4856_v16 = vld [vmem:[%s5406_s29 + $0x344] sm:$0xf0]  ;;  %v4137_v17 = vld [vmem:[%s5406_s29 + $0x3c0] sm:$0xf]  ;;  %v3954_v19 = vor.u32 %v4826_v11, %v3953_v10 }
  0x6b   : > { %2306 = vmatpush.bf16.msra.mxu2 %v3786_v40  ;;  %v4872_v18 = vld [vmem:[%s5406_s29 + $0x3c4] sm:$0xf0]  ;;  %v3465_v20 = vld [vmem:[%s5399_s23 + $0x80] sm:$0xf]  ;;  %v4018_v22 = vor.u32 %v4842_v14, %v4017_v12  ;;  %v4074_v23 = vor.u32 %v4856_v16, %v4073_v15  ;;  %v4703_v27 = vld [vmem:[%s5399_s23 + $0x84] sm:$0xf] }
  0x6c   : > { %2335 = vmatpush.bf16.msra.mxu3 %v3850_v44  ;;  %2249 = vmatmul.bf16.vlgmr.msra.gmra.mxu0 %v5496_v49  ;;  %v4711_v21 = vld [vmem:[%s5399_s23 + $0xbc] sm:$0xf0]  ;;  %v4824_v25 = vld [vmem:[%s5406_s29 + $0x244] sm:$0xf0]  ;;  %v3467_v28 = vld [vmem:[%s5399_s23 + $0xc0] sm:$0xf0]  ;;  %v4138_v29 = vor.u32 %v4872_v18, %v4137_v17 }
  0x6d   : > { %2278 = vmatmul.bf16.vlgmr.msra.gmra.mxu1 %v5501_v54  ;;  %2357 = vmatpush.bf16.msrb.mxu0 %v3970_v59  ;;  %v3945_v24 = vld [vmem:[%s5406_s29 + $0x240] sm:$0xf]  ;;  %v4840_v30 = vld [vmem:[%s5406_s29 + $0x2c4] sm:$0xf0]  ;;  %v4065_v31 = vld [vmem:[%s5406_s29 + $0x330] sm:$0xf]  ;;  %v5553_v51 = vor.u32 %v4703_v27, %v3467_v28 }
  0x6e   : > { %2307 = vmatmul.bf16.vlgmr.msra.gmra.mxu2 %v5503_v55  ;;  %2386 = vmatpush.bf16.msrb.mxu1 %v4034_v60  ;;  %v4009_v26 = vld [vmem:[%s5406_s29 + $0x2c0] sm:$0xf]  ;;  %v4854_v32 = vld [vmem:[%s5406_s29 + $0x334] sm:$0xf0]  ;;  %v3473_v33 = vld [vmem:[%s5399_s23 + $0x88] sm:$0xf]  ;;  %v3946_v39 = vor.u32 %v4824_v25, %v3945_v24 }
  0x6f   : > { %2415 = vmatpush.bf16.msrb.mxu2 %v4098_v45  ;;  %2336 = vmatmul.bf16.vlgmr.msra.gmra.mxu3 %v5507_v58  ;;  %v4129_v34 = vld [vmem:[%s5406_s29 + $0x3b0] sm:$0xf]  ;;  %v4870_v35 = vld [vmem:[%s5406_s29 + $0x3b4] sm:$0xf0]  ;;  %v4712_v36 = vld [vmem:[%s5399_s23 + $0xc4] sm:$0xf0]  ;;  %v4010_v40 = vor.u32 %v4840_v30, %v4009_v26  ;;  %v4066_v41 = vor.u32 %v4854_v32, %v4065_v31  ;;  %v5548_v45 = vor.u32 %v4711_v21, %v3465_v20 }
  0x70   : > { %2444 = vmatpush.bf16.msrb.mxu3 %v4162_v50  ;;  %v4704_v37 = vld [vmem:[%s5399_s23 + $0x8c] sm:$0xf]  ;;  %v3937_v42 = vld [vmem:[%s5406_s29 + $0x230] sm:$0xf]  ;;  %v4822_v43 = vld [vmem:[%s5406_s29 + $0x234] sm:$0xf0]  ;;  %v4130_v46 = vor.u32 %v4870_v35, %v4129_v34  ;;  %v5555_v52 = vor.u32 %v4712_v36, %v3473_v33 }
  0x71   : > { %2358 = vmatpush.bf16.msrb.mxu0 %v3962_v7  ;;  %v3475_v38 = vld [vmem:[%s5399_s23 + $0xc8] sm:$0xf0]  ;;  %v4001_v44 = vld [vmem:[%s5406_s29 + $0x2b0] sm:$0xf]  ;;  %v4838_v47 = vld [vmem:[%s5406_s29 + $0x2b4] sm:$0xf0]  ;;  %v3938_v59 = vor.u32 %v4822_v43, %v3937_v42 }
  0x72   : > { %2387 = vmatpush.bf16.msrb.mxu1 %v4026_v8  ;;  %v4057_v48 = vld [vmem:[%s5406_s29 + $0x320] sm:$0xf]  ;;  %v4852_v50 = vld [vmem:[%s5406_s29 + $0x324] sm:$0xf0]  ;;  %v5559_v57 = vor.u32 %v4704_v37, %v3475_v38  ;;  %v4002_v60 = vor.u32 %v4838_v47, %v4001_v44  ;;  %v4049_v4 = vld [vmem:[%s5406_s29 + $0x310] sm:$0xf] }
  0x73   : > { %2416 = vmatpush.bf16.msrb.mxu2 %v4090_v61  ;;  %v4121_v53 = vld [vmem:[%s5406_s29 + $0x3a0] sm:$0xf]  ;;  %v4868_v56 = vld [vmem:[%s5406_s29 + $0x3a4] sm:$0xf0]  ;;  %v4058_v61 = vor.u32 %v4852_v50, %v4057_v48  ;;  %v4850_v5 = vld [vmem:[%s5406_s29 + $0x314] sm:$0xf0] }
  0x74   : > { %2445 = vmatpush.bf16.msrb.mxu3 %v4154_v1  ;;  %v3929_v62 = vld [vmem:[%s5406_s29 + $0x220] sm:$0xf]  ;;  %v4820_v63 = vld [vmem:[%s5406_s29 + $0x224] sm:$0xf0]  ;;  %v4122_v0 = vor.u32 %v4868_v56, %v4121_v53  ;;  %v3921_v6 = vld [vmem:[%s5406_s29 + $0x210] sm:$0xf]  ;;  %v4050_v8 = vor.u32 %v4850_v5, %v4049_v4 }
  0x75   : > { %2359 = vmatpush.bf16.msrb.mxu0 %v3954_v19  ;;  %v3993_v1 = vld [vmem:[%s5406_s29 + $0x2a0] sm:$0xf]  ;;  %v4836_v2 = vld [vmem:[%s5406_s29 + $0x2a4] sm:$0xf0]  ;;  %v3930_v3 = vor.u32 %v4820_v63, %v3929_v62  ;;  %v4113_v10 = vld [vmem:[%s5406_s29 + $0x390] sm:$0xf] }
  0x76   : > { %2388 = vmatpush.bf16.msrb.mxu1 %v4018_v22  ;;  %v3994_v7 = vor.u32 %v4836_v2, %v3993_v1  ;;  %v4866_v11 = vld [vmem:[%s5406_s29 + $0x394] sm:$0xf0]  ;;  %v4041_v15 = vld [vmem:[%s5406_s29 + $0x300] sm:$0xf]  ;;  %v4848_v16 = vld [vmem:[%s5406_s29 + $0x304] sm:$0xf0] }
  0x77   : > { %2417 = vmatpush.bf16.msrb.mxu2 %v4082_v9  ;;  %v4818_v9 = vld [vmem:[%s5406_s29 + $0x214] sm:$0xf0]  ;;  %v4114_v12 = vor.u32 %v4866_v11, %v4113_v10  ;;  %v4105_v18 = vld [vmem:[%s5406_s29 + $0x380] sm:$0xf]  ;;  %v4864_v19 = vld [vmem:[%s5406_s29 + $0x384] sm:$0xf0]  ;;  %v4042_v21 = vor.u32 %v4848_v16, %v4041_v15 }
  0x78   : > { %2446 = vmatpush.bf16.msrb.mxu3 %v4146_v13  ;;  %v3985_v13 = vld [vmem:[%s5406_s29 + $0x290] sm:$0xf]  ;;  %v4834_v14 = vld [vmem:[%s5406_s29 + $0x294] sm:$0xf0]  ;;  %v3922_v17 = vor.u32 %v4818_v9, %v3921_v6  ;;  %v3913_v22 = vld [vmem:[%s5406_s29 + $0x200] sm:$0xf]  ;;  %v4106_v24 = vor.u32 %v4864_v19, %v4105_v18 }
  0x79   : > { %2360 = vmatpush.bf16.msrb.mxu0 %v3946_v39  ;;  %v3986_v20 = vor.u32 %v4834_v14, %v3985_v13  ;;  %v3977_v25 = vld [vmem:[%s5406_s29 + $0x280] sm:$0xf]  ;;  %v4832_v26 = vld [vmem:[%s5406_s29 + $0x284] sm:$0xf0]  ;;  %v3531_v30 = vld [vmem:[%s5399_s23 + $0x140] sm:$0xf0] }
  0x7a   : > { %2389 = vmatpush.bf16.msrb.mxu1 %v4010_v40  ;;  %v3529_v27 = vld [vmem:[%s5399_s23 + $0x100] sm:$0xf]  ;;  %v3537_v31 = vld [vmem:[%s5399_s23 + $0x108] sm:$0xf]  ;;  %v4720_v34 = vld [vmem:[%s5399_s23 + $0x10c] sm:$0xf]  ;;  %v3978_v36 = vor.u32 %v4832_v26, %v3977_v25 }
  0x7b   : > { %2418 = vmatpush.bf16.msrb.mxu2 %v4074_v23  ;;  %v4816_v23 = vld [vmem:[%s5406_s29 + $0x204] sm:$0xf0]  ;;  %v4727_v28 = vld [vmem:[%s5399_s23 + $0x13c] sm:$0xf0]  ;;  %v3539_v35 = vld [vmem:[%s5399_s23 + $0x148] sm:$0xf0] }
  0x7c   : > { %2447 = vmatpush.bf16.msrb.mxu3 %v4138_v29  ;;  %2254 = vmatmul.bf16.gmra.mxu0 %v5548_v45  ;;  %v4719_v29 = vld [vmem:[%s5399_s23 + $0x104] sm:$0xf]  ;;  %v4728_v32 = vld [vmem:[%s5399_s23 + $0x144] sm:$0xf0]  ;;  %v3914_v33 = vor.u32 %v4816_v23, %v3913_v22  ;;  %v5593_v37 = vor.u32 %v4727_v28, %v3529_v27  ;;  %v5599_v40 = vor.u32 %v4720_v34, %v3539_v35  ;;  %v4926_v42 = vld [vmem:[%s5406_s29 + $0x574] sm:$0xf0] }
  0x7d   : > { %2283 = vmatmul.bf16.gmra.mxu1 %v5553_v51  ;;  %2361 = vmatpush.bf16.msrb.mxu0 %v3938_v59  ;;  %v5595_v38 = vor.u32 %v4719_v29, %v3531_v30  ;;  %v5597_v39 = vor.u32 %v4728_v32, %v3537_v31  ;;  %v4225_v43 = vld [vmem:[%s5406_s29 + $0x470] sm:$0xf]  ;;  %v4942_v48 = vld [vmem:[%s5406_s29 + $0x5f4] sm:$0xf0]  ;;  %v4924_v62 = vld [vmem:[%s5406_s29 + $0x564] sm:$0xf0] }
  0x7e   : > { %2312 = vmatmul.bf16.gmra.mxu2 %v5555_v52  ;;  %2390 = vmatpush.bf16.msrb.mxu1 %v4002_v60  ;;  %v4417_v47 = vld [vmem:[%s5406_s29 + $0x5f0] sm:$0xf]  ;;  %v4910_v59 = vld [vmem:[%s5406_s29 + $0x4f4] sm:$0xf0]  ;;  %v4345_v60 = vld [vmem:[%s5406_s29 + $0x560] sm:$0xf] }
  0x7f   : > { %2419 = vmatpush.bf16.msrb.mxu2 %v4066_v41  ;;  %2341 = vmatmul.bf16.gmra.mxu3 %v5559_v57  ;;  %v4353_v41 = vld [vmem:[%s5406_s29 + $0x570] sm:$0xf]  ;;  %v4418_v53 = vor.u32 %v4942_v48, %v4417_v47  ;;  %v4217_v63 = vld [vmem:[%s5406_s29 + $0x460] sm:$0xf]  ;;  %v4346_v1 = vor.u32 %v4924_v62, %v4345_v60  ;;  %v4940_v4 = vld [vmem:[%s5406_s29 + $0x5e4] sm:$0xf0] }
  0x80   : > { %2448 = vmatpush.bf16.msrb.mxu3 %v4130_v46  ;;  %v4354_v44 = vor.u32 %v4926_v42, %v4353_v41  ;;  %v4894_v46 = vld [vmem:[%s5406_s29 + $0x474] sm:$0xf0]  ;;  %v4289_v56 = vld [vmem:[%s5406_s29 + $0x4f0] sm:$0xf]  ;;  %v4281_v5 = vld [vmem:[%s5406_s29 + $0x4e0] sm:$0xf] }
  0x81   : > { %2362 = vmatpush.bf16.msrb.mxu0 %v3930_v3  ;;  %v4226_v50 = vor.u32 %v4894_v46, %v4225_v43  ;;  %v4409_v3 = vld [vmem:[%s5406_s29 + $0x5e0] sm:$0xf]  ;;  %v4735_v11 = vld [vmem:[%s5399_s23 + $0x184] sm:$0xf]  ;;  %v3601_v13 = vld [vmem:[%s5399_s23 + $0x188] sm:$0xf] }
  0x82   : > { %2391 = vmatpush.bf16.msrb.mxu1 %v3994_v7  ;;  %v4410_v6 = vor.u32 %v4940_v4, %v4409_v3  ;;  %v4908_v7 = vld [vmem:[%s5406_s29 + $0x4e4] sm:$0xf0]  ;;  %v3593_v9 = vld [vmem:[%s5399_s23 + $0x180] sm:$0xf]  ;;  %v4736_v15 = vld [vmem:[%s5399_s23 + $0x18c] sm:$0xf] }
  0x83   : > { %2420 = vmatpush.bf16.msrb.mxu2 %v4058_v61  ;;  %v4290_v61 = vor.u32 %v4910_v59, %v4289_v56  ;;  %v4743_v10 = vld [vmem:[%s5399_s23 + $0x1bc] sm:$0xf0]  ;;  %v4744_v14 = vld [vmem:[%s5399_s23 + $0x1c4] sm:$0xf0]  ;;  %v3603_v16 = vld [vmem:[%s5399_s23 + $0x1c8] sm:$0xf0] }
  0x84   : > { %2449 = vmatpush.bf16.msrb.mxu3 %v4122_v0  ;;  %v4892_v0 = vld [vmem:[%s5406_s29 + $0x464] sm:$0xf0]  ;;  %v5633_v19 = vor.u32 %v4744_v14, %v3601_v13  ;;  %v4922_v22 = vld [vmem:[%s5406_s29 + $0x554] sm:$0xf0]  ;;  %v4209_v23 = vld [vmem:[%s5406_s29 + $0x450] sm:$0xf] }
  0x85   : > { %2363 = vmatpush.bf16.msrb.mxu0 %v3922_v17  ;;  %v4218_v2 = vor.u32 %v4892_v0, %v4217_v63  ;;  %v5629_v17 = vor.u32 %v4743_v10, %v3593_v9  ;;  %v4890_v25 = vld [vmem:[%s5406_s29 + $0x454] sm:$0xf0]  ;;  %v4401_v26 = vld [vmem:[%s5406_s29 + $0x5d0] sm:$0xf]  ;;  %v4329_v32 = vld [vmem:[%s5406_s29 + $0x540] sm:$0xf] }
  0x86   : > { %2392 = vmatpush.bf16.msrb.mxu1 %v3986_v20  ;;  %v5635_v20 = vor.u32 %v4736_v15, %v3603_v16  ;;  %v4938_v27 = vld [vmem:[%s5406_s29 + $0x5d4] sm:$0xf0]  ;;  %v4210_v28 = vor.u32 %v4890_v25, %v4209_v23  ;;  %v4273_v30 = vld [vmem:[%s5406_s29 + $0x4d0] sm:$0xf]  ;;  %v4920_v34 = vld [vmem:[%s5406_s29 + $0x544] sm:$0xf0] }
  0x87   : > { %2421 = vmatpush.bf16.msrb.mxu2 %v4050_v8  ;;  %v4282_v8 = vor.u32 %v4908_v7, %v4281_v5  ;;  %v4402_v29 = vor.u32 %v4938_v27, %v4401_v26  ;;  %v4906_v31 = vld [vmem:[%s5406_s29 + $0x4d4] sm:$0xf0]  ;;  %v4201_v35 = vld [vmem:[%s5406_s29 + $0x440] sm:$0xf]  ;;  %v4330_v41 = vor.u32 %v4920_v34, %v4329_v32  ;;  %v4904_v48 = vld [vmem:[%s5406_s29 + $0x4c4] sm:$0xf0] }
  0x88   : > { %2450 = vmatpush.bf16.msrb.mxu3 %v4114_v12  ;;  %v3595_v12 = vld [vmem:[%s5399_s23 + $0x1c0] sm:$0xf0]  ;;  %v4393_v43 = vld [vmem:[%s5406_s29 + $0x5c0] sm:$0xf]  ;;  %v4697_v56 = vld [vmem:[%s5399_s23 + $0x4c] sm:$0xf0] }
  0x89   : > { %2364 = vmatpush.bf16.msrb.mxu0 %v3914_v33  ;;  %v5631_v18 = vor.u32 %v4735_v11, %v3595_v12  ;;  %v4274_v33 = vor.u32 %v4906_v31, %v4273_v30  ;;  %v4265_v46 = vld [vmem:[%s5406_s29 + $0x4c0] sm:$0xf]  ;;  %v4689_v59 = vld [vmem:[%s5399_s23 + $0x14] sm:$0xf]  ;;  %v4698_v62 = vld [vmem:[%s5399_s23 + $0x54] sm:$0xf0] }
  0x8a   : > { %2393 = vmatpush.bf16.msrb.mxu1 %v3978_v36  ;;  %v4888_v36 = vld [vmem:[%s5406_s29 + $0x444] sm:$0xf0]  ;;  %v3419_v60 = vld [vmem:[%s5399_s23 + $0x50] sm:$0xf0]  ;;  %v4690_v63 = vld [vmem:[%s5399_s23 + $0x1c] sm:$0xf] }
  0x8b   : > { %2422 = vmatpush.bf16.msrb.mxu2 %v4042_v21  ;;  %v4337_v21 = vld [vmem:[%s5406_s29 + $0x550] sm:$0xf]  ;;  %v4202_v42 = vor.u32 %v4888_v36, %v4201_v35  ;;  %v3427_v0 = vld [vmem:[%s5399_s23 + $0x58] sm:$0xf0]  ;;  %v4886_v9 = vld [vmem:[%s5406_s29 + $0x434] sm:$0xf0] }
  0x8c   : > { %2451 = vmatpush.bf16.msrb.mxu3 %v4106_v24  ;;  %2259 = vmatmul.bf16.gmra.mxu0 %v5593_v37  ;;  %v4338_v24 = vor.u32 %v4922_v22, %v4337_v21  ;;  %v5671_v4 = vor.u32 %v4690_v63, %v3427_v0  ;;  %v4321_v5 = vld [vmem:[%s5406_s29 + $0x530] sm:$0xf]  ;;  %v4934_v11 = vld [vmem:[%s5406_s29 + $0x5b4] sm:$0xf0]  ;;  %v4313_v16 = vld [vmem:[%s5406_s29 + $0x520] sm:$0xf] }
  0x8d   : > { %2288 = vmatmul.bf16.gmra.mxu1 %v5595_v38  ;;  %2473 = vmatpush.bf16.msra.mxu0 %v4226_v50  ;;  %v4266_v50 = vor.u32 %v4904_v48, %v4265_v46  ;;  %v4193_v7 = vld [vmem:[%s5406_s29 + $0x430] sm:$0xf]  ;;  %v4902_v15 = vld [vmem:[%s5406_s29 + $0x4b4] sm:$0xf0]  ;;  %v4916_v22 = vld [vmem:[%s5406_s29 + $0x524] sm:$0xf0] }
  0x8e   : > { %2317 = vmatmul.bf16.gmra.mxu2 %v5597_v39  ;;  %2502 = vmatpush.bf16.msra.mxu1 %v4290_v61  ;;  %v3425_v61 = vld [vmem:[%s5399_s23 + $0x18] sm:$0xf]  ;;  %v4385_v10 = vld [vmem:[%s5406_s29 + $0x5b0] sm:$0xf]  ;;  %v4194_v12 = vor.u32 %v4886_v9, %v4193_v7  ;;  %v4185_v23 = vld [vmem:[%s5406_s29 + $0x420] sm:$0xf]  ;;  %v4314_v25 = vor.u32 %v4916_v22, %v4313_v16 }
  0x8f   : > { %2346 = vmatmul.bf16.gmra.mxu3 %v5599_v40  ;;  %2531 = vmatpush.bf16.msra.mxu2 %v4354_v44  ;;  %v4936_v44 = vld [vmem:[%s5406_s29 + $0x5c4] sm:$0xf0]  ;;  %v5669_v3 = vor.u32 %v4698_v62, %v3425_v61  ;;  %v4386_v13 = vor.u32 %v4934_v11, %v4385_v10  ;;  %v4257_v14 = vld [vmem:[%s5406_s29 + $0x4b0] sm:$0xf]  ;;  %v4377_v27 = vld [vmem:[%s5406_s29 + $0x5a0] sm:$0xf] }
  0x90   : > { %2560 = vmatpush.bf16.msra.mxu3 %v4418_v53  ;;  %v4394_v47 = vor.u32 %v4936_v44, %v4393_v43  ;;  %v3417_v53 = vld [vmem:[%s5399_s23 + $0x10] sm:$0xf]  ;;  %v4258_v21 = vor.u32 %v4902_v15, %v4257_v14  ;;  %v4900_v31 = vld [vmem:[%s5406_s29 + $0x4a4] sm:$0xf0]  ;;  %v4705_v35 = vld [vmem:[%s5399_s23 + $0x94] sm:$0xf] }
  0x91   : > { %2474 = vmatpush.bf16.msra.mxu0 %v4218_v2  ;;  %v5667_v2 = vor.u32 %v4689_v59, %v3419_v60  ;;  %v4713_v34 = vld [vmem:[%s5399_s23 + $0xcc] sm:$0xf0]  ;;  %v3483_v36 = vld [vmem:[%s5399_s23 + $0xd0] sm:$0xf0]  ;;  %v4706_v43 = vld [vmem:[%s5399_s23 + $0x9c] sm:$0xf] }
  0x92   : > { %2503 = vmatpush.bf16.msra.mxu1 %v4282_v8  ;;  %v3491_v44 = vld [vmem:[%s5399_s23 + $0xd8] sm:$0xf0]  ;;  %v4177_v59 = vld [vmem:[%s5406_s29 + $0x410] sm:$0xf]  ;;  %v4882_v61 = vld [vmem:[%s5406_s29 + $0x414] sm:$0xf0] }
  0x93   : > { %2532 = vmatpush.bf16.msra.mxu2 %v4346_v1  ;;  %v5665_v1 = vor.u32 %v4697_v56, %v3417_v53  ;;  %v4305_v53 = vld [vmem:[%s5406_s29 + $0x510] sm:$0xf]  ;;  %v4914_v56 = vld [vmem:[%s5406_s29 + $0x514] sm:$0xf0]  ;;  %v4178_v0 = vor.u32 %v4882_v61, %v4177_v59  ;;  %v4912_v10 = vld [vmem:[%s5406_s29 + $0x504] sm:$0xf0] }
  0x94   : > { %2561 = vmatpush.bf16.msra.mxu3 %v4410_v6  ;;  %v4918_v6 = vld [vmem:[%s5406_s29 + $0x534] sm:$0xf0]  ;;  %v4306_v60 = vor.u32 %v4914_v56, %v4305_v53  ;;  %v4369_v62 = vld [vmem:[%s5406_s29 + $0x590] sm:$0xf]  ;;  %v4169_v11 = vld [vmem:[%s5406_s29 + $0x400] sm:$0xf] }
  0x95   : > { %2475 = vmatpush.bf16.msra.mxu0 %v4210_v28  ;;  %v4322_v8 = vor.u32 %v4918_v6, %v4321_v5  ;;  %v4932_v28 = vld [vmem:[%s5406_s29 + $0x5a4] sm:$0xf0]  ;;  %v4930_v63 = vld [vmem:[%s5406_s29 + $0x594] sm:$0xf0]  ;;  %v4241_v6 = vld [vmem:[%s5406_s29 + $0x490] sm:$0xf] }
  0x96   : > { %2504 = vmatpush.bf16.msra.mxu1 %v4274_v33  ;;  %v4378_v30 = vor.u32 %v4932_v28, %v4377_v27  ;;  %v3481_v33 = vld [vmem:[%s5399_s23 + $0x90] sm:$0xf]  ;;  %v4370_v5 = vor.u32 %v4930_v63, %v4369_v62  ;;  %v4898_v7 = vld [vmem:[%s5406_s29 + $0x494] sm:$0xf0]  ;;  %v4361_v15 = vld [vmem:[%s5406_s29 + $0x580] sm:$0xf] }
  0x97   : > { %2533 = vmatpush.bf16.msra.mxu2 %v4338_v24  ;;  %v4884_v24 = vld [vmem:[%s5406_s29 + $0x424] sm:$0xf0]  ;;  %v5701_v46 = vor.u32 %v4713_v34, %v3481_v33  ;;  %v4242_v9 = vor.u32 %v4898_v7, %v4241_v6  ;;  %v4721_v27 = vld [vmem:[%s5399_s23 + $0x114] sm:$0xf]  ;;  %v4958_v53 = vld [vmem:[%s5406_s29 + $0x674] sm:$0xf0] }
  0x98   : > { %2562 = vmatpush.bf16.msra.mxu3 %v4402_v29  ;;  %v4186_v26 = vor.u32 %v4884_v24, %v4185_v23  ;;  %v4249_v29 = vld [vmem:[%s5406_s29 + $0x4a0] sm:$0xf]  ;;  %v4928_v16 = vld [vmem:[%s5406_s29 + $0x584] sm:$0xf0]  ;;  %v3547_v28 = vld [vmem:[%s5399_s23 + $0x150] sm:$0xf0] }
  0x99   : > { %2476 = vmatpush.bf16.msra.mxu0 %v4202_v42  ;;  %v4250_v32 = vor.u32 %v4900_v31, %v4249_v29  ;;  %v4714_v42 = vld [vmem:[%s5399_s23 + $0xd4] sm:$0xf0]  ;;  %v4362_v22 = vor.u32 %v4928_v16, %v4361_v15  ;;  %v4896_v23 = vld [vmem:[%s5406_s29 + $0x484] sm:$0xf0]  ;;  %v4722_v31 = vld [vmem:[%s5399_s23 + $0x11c] sm:$0xf]  ;;  %v5739_v34 = vor.u32 %v4721_v27, %v3547_v28 }
  0x9a   : > { %2505 = vmatpush.bf16.msra.mxu1 %v4266_v50  ;;  %v5707_v50 = vor.u32 %v4706_v43, %v3491_v44  ;;  %v3553_v29 = vld [vmem:[%s5399_s23 + $0x118] sm:$0xf]  ;;  %v4481_v43 = vld [vmem:[%s5406_s29 + $0x670] sm:$0xf]  ;;  %v4601_v6 = vld [vmem:[%s5406_s29 + $0x760] sm:$0xf] }
  0x9b   : > { %2534 = vmatpush.bf16.msra.mxu2 %v4330_v41  ;;  %v3489_v41 = vld [vmem:[%s5399_s23 + $0x98] sm:$0xf]  ;;  %v4673_v56 = vld [vmem:[%s5406_s29 + $0x7f0] sm:$0xf]  ;;  %v5004_v15 = vld [vmem:[%s5406_s29 + $0x7e4] sm:$0xf0] }
  0x9c   : > { %2264 = vmatmul.bf16.gmra.mxu0 %v5629_v17  ;;  %2563 = vmatpush.bf16.msra.mxu3 %v4394_v47  ;;  %v5703_v47 = vor.u32 %v4705_v35, %v3483_v36  ;;  %v5705_v48 = vor.u32 %v4714_v42, %v3489_v41  ;;  %v4609_v41 = vld [vmem:[%s5406_s29 + $0x770] sm:$0xf]  ;;  %v4990_v42 = vld [vmem:[%s5406_s29 + $0x774] sm:$0xf0]  ;;  %v3611_v16 = vld [vmem:[%s5399_s23 + $0x1d0] sm:$0xf0] }
  0x9d   : > { %2293 = vmatmul.bf16.gmra.mxu1 %v5631_v18  ;;  %2477 = vmatpush.bf16.msra.mxu0 %v4194_v12  ;;  %v4880_v12 = vld [vmem:[%s5406_s29 + $0x404] sm:$0xf0]  ;;  %v4610_v44 = vor.u32 %v4990_v42, %v4609_v41  ;;  %v5006_v59 = vld [vmem:[%s5406_s29 + $0x7f4] sm:$0xf0]  ;;  %v3609_v62 = vld [vmem:[%s5399_s23 + $0x190] sm:$0xf] }
  0x9e   : > { %2322 = vmatmul.bf16.gmra.mxu2 %v5633_v19  ;;  %2506 = vmatpush.bf16.msra.mxu1 %v4258_v21  ;;  %v4170_v14 = vor.u32 %v4880_v12, %v4169_v11  ;;  %v4233_v21 = vld [vmem:[%s5406_s29 + $0x480] sm:$0xf]  ;;  %v4674_v61 = vor.u32 %v5006_v59, %v4673_v56  ;;  %v4745_v63 = vld [vmem:[%s5399_s23 + $0x1cc] sm:$0xf0]  ;;  %v4737_v11 = vld [vmem:[%s5399_s23 + $0x194] sm:$0xf] }
  0x9f   : > { %2351 = vmatmul.bf16.gmra.mxu3 %v5635_v20  ;;  %2535 = vmatpush.bf16.msra.mxu2 %v4322_v8  ;;  %v4297_v8 = vld [vmem:[%s5406_s29 + $0x500] sm:$0xf]  ;;  %v4234_v24 = vor.u32 %v4896_v23, %v4233_v21  ;;  %v3617_v21 = vld [vmem:[%s5399_s23 + $0x198] sm:$0xf]  ;;  %v5773_v27 = vor.u32 %v4737_v11, %v3611_v16  ;;  %v4593_v41 = vld [vmem:[%s5406_s29 + $0x750] sm:$0xf] }
  0xa0   : > { %2564 = vmatpush.bf16.msra.mxu3 %v4386_v13  ;;  %v4298_v13 = vor.u32 %v4912_v10, %v4297_v8  ;;  %v4988_v8 = vld [vmem:[%s5406_s29 + $0x764] sm:$0xf0]  ;;  %v4986_v42 = vld [vmem:[%s5406_s29 + $0x754] sm:$0xf0]  ;;  %v4657_v56 = vld [vmem:[%s5406_s29 + $0x7d0] sm:$0xf] }
  0xa1   : > { %2478 = vmatpush.bf16.msra.mxu0 %v4186_v26  ;;  %v4729_v26 = vld [vmem:[%s5399_s23 + $0x14c] sm:$0xf0]  ;;  %v4956_v10 = vld [vmem:[%s5406_s29 + $0x664] sm:$0xf0]  ;;  %v4602_v12 = vor.u32 %v4988_v8, %v4601_v6  ;;  %6622 = vst [vmem:[#allocation15_spill] sm:$0xff] %v5773_v27  ;;  %p4679_p2 = scmp.ne.s32.totalorder %s5265_s15, 1 }
  0xa2   : > { %2507 = vmatpush.bf16.msra.mxu1 %v4250_v32  ;;  %v3555_v32 = vld [vmem:[%s5399_s23 + $0x158] sm:$0xf0]  ;;  %v4585_v6 = vld [vmem:[%s5406_s29 + $0x740] sm:$0xf]  ;;  %v4984_v8 = vld [vmem:[%s5406_s29 + $0x744] sm:$0xf0] }
  0xa3   : > { %2536 = vmatpush.bf16.msra.mxu2 %v4314_v25  ;;  %v3545_v25 = vld [vmem:[%s5399_s23 + $0x110] sm:$0xf]  ;;  %v5743_v36 = vor.u32 %v4722_v31, %v3555_v32  ;;  %v4972_v31 = vld [vmem:[%s5406_s29 + $0x6e4] sm:$0xf0]  ;;  %v4691_v11 = vld [vmem:[%s5399_s23 + $0x24] sm:$0xf] }
  0xa4   : > { %2565 = vmatpush.bf16.msra.mxu3 %v4378_v30  ;;  %v4730_v30 = vld [vmem:[%s5399_s23 + $0x154] sm:$0xf0]  ;;  %v5737_v33 = vor.u32 %v4729_v26, %v3545_v25  ;;  %v3619_v25 = vld [vmem:[%s5399_s23 + $0x1d8] sm:$0xf0]  ;;  %v5771_v26 = vor.u32 %v4745_v63, %v3609_v62  ;;  %v3433_v62 = vld [vmem:[%s5399_s23 + $0x20] sm:$0xf] }
  0xa5   : > { %2479 = vmatpush.bf16.msra.mxu0 %v4178_v0  ;;  %v5741_v35 = vor.u32 %v4730_v30, %v3553_v29  ;;  %v4545_v0 = vld [vmem:[%s5406_s29 + $0x6f0] sm:$0xf]  ;;  %v4537_v30 = vld [vmem:[%s5406_s29 + $0x6e0] sm:$0xf]  ;;  %v3435_v16 = vld [vmem:[%s5399_s23 + $0x60] sm:$0xf0] }
  0xa6   : > { %2508 = vmatpush.bf16.msra.mxu1 %v4242_v9  ;;  %v4473_v9 = vld [vmem:[%s5406_s29 + $0x660] sm:$0xf]  ;;  %v4538_v32 = vor.u32 %v4972_v31, %v4537_v30 }
  0xa7   : > { %2537 = vmatpush.bf16.msra.mxu2 %v4306_v60  ;;  %v4482_v60 = vor.u32 %v4958_v53, %v4481_v43  ;;  %v4594_v43 = vor.u32 %v4986_v42, %v4593_v41  ;;  %v4954_v53 = vld [vmem:[%s5406_s29 + $0x654] sm:$0xf0]  ;;  %v4699_v63 = vld [vmem:[%s5399_s23 + $0x5c] sm:$0xf0] }
  0xa8   : > { %2566 = vmatpush.bf16.msra.mxu3 %v4370_v5  ;;  %v4974_v5 = vld [vmem:[%s5406_s29 + $0x6f4] sm:$0xf0]  ;;  %v5807_v30 = vor.u32 %v4699_v63, %v3433_v62  ;;  %v4449_v63 = vld [vmem:[%s5406_s29 + $0x630] sm:$0xf] }
  0xa9   : > { %2480 = vmatpush.bf16.msra.mxu0 %v4170_v14  ;;  %v4546_v7 = vor.u32 %v4974_v5, %v4545_v0  ;;  %v4665_v14 = vld [vmem:[%s5406_s29 + $0x7e0] sm:$0xf]  ;;  %v4529_v0 = vld [vmem:[%s5406_s29 + $0x6d0] sm:$0xf]  ;;  %v4970_v5 = vld [vmem:[%s5406_s29 + $0x6d4] sm:$0xf0] }
  0xaa   : > { %2509 = vmatpush.bf16.msra.mxu1 %v4234_v24  ;;  %v4666_v23 = vor.u32 %v5004_v15, %v4665_v14  ;;  %v4738_v24 = vld [vmem:[%s5399_s23 + $0x19c] sm:$0xf]  ;;  %v4649_v14 = vld [vmem:[%s5406_s29 + $0x7c0] sm:$0xf]  ;;  %v5000_v15 = vld [vmem:[%s5406_s29 + $0x7c4] sm:$0xf0] }
  0xab   : > { %2538 = vmatpush.bf16.msra.mxu2 %v4298_v13  ;;  %v4474_v13 = vor.u32 %v4956_v10, %v4473_v9  ;;  %v5777_v29 = vor.u32 %v4738_v24, %v3619_v25  ;;  %v4457_v9 = vld [vmem:[%s5406_s29 + $0x640] sm:$0xf]  ;;  %v4952_v10 = vld [vmem:[%s5406_s29 + $0x644] sm:$0xf0]  ;;  %v4692_v24 = vld [vmem:[%s5399_s23 + $0x2c] sm:$0xf] }
  0xac   : > { %2365 = vmatmul.bf16.vlgmr.msrb.gmra.mxu0 %v5665_v1  ;;  %2567 = vmatpush.bf16.msra.mxu3 %v4362_v22  ;;  %v4746_v22 = vld [vmem:[%s5399_s23 + $0x1d4] sm:$0xf0]  ;;  %v3443_v25 = vld [vmem:[%s5399_s23 + $0x68] sm:$0xf0]  ;;  %6625 = vst [vmem:[#allocation18_spill] sm:$0xff] %v5807_v30 }
  0xad   : > { %2394 = vmatmul.bf16.vlgmr.msrb.gmra.mxu1 %v5667_v2  ;;  %2589 = vmatpush.bf16.msrb.mxu0 %v4482_v60  ;;  %v5775_v28 = vor.u32 %v4746_v22, %v3617_v21  ;;  %6624 = vst [vmem:[#allocation17_spill] sm:$0xff] %v5777_v29  ;;  %v5002_v60 = vld [vmem:[%s5406_s29 + $0x7d4] sm:$0xf0]  ;;  %v3441_v21 = vld [vmem:[%s5399_s23 + $0x28] sm:$0xf] }
  0xae   : > { %2423 = vmatmul.bf16.vlgmr.msrb.gmra.mxu2 %v5669_v3  ;;  %2618 = vmatpush.bf16.msrb.mxu1 %v4546_v7  ;;  %v4530_v7 = vor.u32 %v4970_v5, %v4529_v0  ;;  %v4700_v22 = vld [vmem:[%s5399_s23 + $0x64] sm:$0xf0]  ;;  %v4950_v0 = vld [vmem:[%s5406_s29 + $0x634] sm:$0xf0]  ;;  %v4641_v5 = vld [vmem:[%s5406_s29 + $0x7b0] sm:$0xf] }
  0xaf   : > { %2452 = vmatmul.bf16.vlgmr.msrb.gmra.mxu3 %v5671_v4  ;;  %2647 = vmatpush.bf16.msrb.mxu2 %v4610_v44  ;;  %6623 = vst [vmem:[#allocation16_spill] sm:$0xff] %v5775_v28  ;;  %v4465_v44 = vld [vmem:[%s5406_s29 + $0x650] sm:$0xf]  ;;  %v5811_v41 = vor.u32 %v4700_v22, %v3441_v21  ;;  %v4715_v21 = vld [vmem:[%s5399_s23 + $0xdc] sm:$0xf0] }
  0xb0   : > { %2676 = vmatpush.bf16.msrb.mxu3 %v4674_v61  ;;  %v4466_v59 = vor.u32 %v4954_v53, %v4465_v44  ;;  %v4658_v61 = vor.u32 %v5002_v60, %v4657_v56  ;;  %v4521_v53 = vld [vmem:[%s5406_s29 + $0x6c0] sm:$0xf]  ;;  %v4968_v56 = vld [vmem:[%s5406_s29 + $0x6c4] sm:$0xf0]  ;;  %v4577_v60 = vld [vmem:[%s5406_s29 + $0x730] sm:$0xf] }
  0xb1   : > { %2590 = vmatpush.bf16.msrb.mxu0 %v4474_v13  ;;  %v4458_v13 = vor.u32 %v4952_v10, %v4457_v9  ;;  %6627 = vst [vmem:[#allocation20_spill] sm:$0xff] %v5811_v41  ;;  %v4513_v22 = vld [vmem:[%s5406_s29 + $0x6b0] sm:$0xf] }
  0xb2   : > { %2619 = vmatpush.bf16.msrb.mxu1 %v4538_v32  ;;  %v5809_v32 = vor.u32 %v4691_v11, %v3435_v16  ;;  %v3497_v16 = vld [vmem:[%s5399_s23 + $0xa0] sm:$0xf] }
  0xb3   : > { %2648 = vmatpush.bf16.msrb.mxu2 %v4602_v12  ;;  %v4586_v12 = vor.u32 %v4984_v8, %v4585_v6  ;;  %v4998_v8 = vld [vmem:[%s5406_s29 + $0x7b4] sm:$0xf0] }
  0xb4   : > { %2677 = vmatpush.bf16.msrb.mxu3 %v4666_v23  ;;  %v4650_v23 = vor.u32 %v5000_v15, %v4649_v14  ;;  %6626 = vst [vmem:[#allocation19_spill] sm:$0xff] %v5809_v32 }
  0xb5   : > { %2591 = vmatpush.bf16.msrb.mxu0 %v4466_v59  ;;  %v4522_v59 = vor.u32 %v4968_v56, %v4521_v53  ;;  %v4707_v53 = vld [vmem:[%s5399_s23 + $0xa4] sm:$0xf] }
  0xb6   : > { %2620 = vmatpush.bf16.msrb.mxu1 %v4530_v7  ;;  %v4450_v7 = vor.u32 %v4950_v0, %v4449_v63  ;;  %v3505_v63 = vld [vmem:[%s5399_s23 + $0xa8] sm:$0xf] }
  0xb7   : > { %2649 = vmatpush.bf16.msrb.mxu2 %v4594_v43  ;;  %v5813_v43 = vor.u32 %v4692_v24, %v3443_v25  ;;  %v4569_v24 = vld [vmem:[%s5406_s29 + $0x720] sm:$0xf]  ;;  %v4716_v0 = vld [vmem:[%s5399_s23 + $0xe4] sm:$0xf0] }
  0xb8   : > { %2678 = vmatpush.bf16.msrb.mxu3 %v4658_v61  ;;  %v4982_v61 = vld [vmem:[%s5406_s29 + $0x734] sm:$0xf0] }
  0xb9   : > { %2592 = vmatpush.bf16.msrb.mxu0 %v4458_v13  ;;  %6628 = vst [vmem:[#allocation21_spill] sm:$0xff] %v5813_v43  ;;  %v4578_v62 = vor.u32 %v4982_v61, %v4577_v60  ;;  %v4633_v60 = vld [vmem:[%s5406_s29 + $0x7a0] sm:$0xf]  ;;  %v4996_v61 = vld [vmem:[%s5406_s29 + $0x7a4] sm:$0xf0] }
  0xba   : > { %2621 = vmatpush.bf16.msrb.mxu1 %v4522_v59 }
  0xbb   : > { %2650 = vmatpush.bf16.msrb.mxu2 %v4586_v12  ;;  %v4642_v12 = vor.u32 %v4998_v8, %v4641_v5  ;;  %v4634_v5 = vor.u32 %v4996_v61, %v4633_v60  ;;  %v4625_v60 = vld [vmem:[%s5406_s29 + $0x790] sm:$0xf] }
  0xbc   : > { %2370 = vmatmul.bf16.gmra.mxu0 %v5701_v46  ;;  %2679 = vmatpush.bf16.msrb.mxu3 %v4650_v23  ;;  %v4966_v23 = vld [vmem:[%s5406_s29 + $0x6b4] sm:$0xf0] }
  0xbd   : > { %2399 = vmatmul.bf16.gmra.mxu1 %v5703_v47  ;;  %2593 = vmatpush.bf16.msrb.mxu0 %v4450_v7  ;;  %v4514_v25 = vor.u32 %v4966_v23, %v4513_v22  ;;  %v3507_v7 = vld [vmem:[%s5399_s23 + $0xe8] sm:$0xf0]  ;;  %v5849_v22 = vor.u32 %v4716_v0, %v3505_v63  ;;  %v4994_v63 = vld [vmem:[%s5406_s29 + $0x794] sm:$0xf0] }
  0xbe   : > { %2428 = vmatmul.bf16.gmra.mxu2 %v5705_v48 }
  0xbf   : > { %2457 = vmatmul.bf16.gmra.mxu3 %v5707_v50  ;;  %2651 = vmatpush.bf16.msrb.mxu2 %v4578_v62  ;;  %v3499_v62 = vld [vmem:[%s5399_s23 + $0xe0] sm:$0xf0]  ;;  %6631 = vst [vmem:[#allocation24_spill] sm:$0xff] %v5849_v22 }
  0xc0   : > { %2680 = vmatpush.bf16.msrb.mxu3 %v4642_v12  ;;  %2622 = vmatpush.bf16.msrb.mxu1 %v4514_v25 }
  0xc4   : > { %2681 = vmatpush.bf16.msrb.mxu3 %v4634_v5 }
  0xcc   : > { %2375 = vmatmul.bf16.gmra.mxu0 %v5737_v33 }
  0xcd   : > { %2404 = vmatmul.bf16.gmra.mxu1 %v5739_v34 }
  0xce   : > { %2433 = vmatmul.bf16.gmra.mxu2 %v5741_v35 }
  0xcf   : > { %2462 = vmatmul.bf16.gmra.mxu3 %v5743_v36 }
  0xdc   : > { %2380 = vmatmul.bf16.gmra.mxu0 %v5771_v26 }
  0xdd   : > { %2409 = vmatmul.bf16.gmra.mxu1 %v5773_v27 }
  0xde   : > { %2438 = vmatmul.bf16.gmra.mxu2 %v5775_v28 }
  0xdf   : > { %2467 = vmatmul.bf16.gmra.mxu3 %v5777_v29 }
  0xe9   : > { %v2250_v31 = vpop.f32.mrf.mxu0 }
  0xea   : > { %v2279_v42 = vpop.f32.mrf.mxu1 }
  0xeb   : > { %v2280_v44 = vadd.f32 %v2279_v42, %v2250_v31  ;;  %v4980_v31 = vld [vmem:[%s5406_s29 + $0x724] sm:$0xf0]  ;;  %v4441_v42 = vld [vmem:[%s5406_s29 + $0x620] sm:$0xf] }
  0xec   : > { %2481 = vmatmul.bf16.vlgmr.msra.gmra.mxu0 %v5807_v30  ;;  %v4570_v56 = vor.u32 %v4980_v31, %v4569_v24 }
  0xed   : > { %2510 = vmatmul.bf16.vlgmr.msra.gmra.mxu1 %v5809_v32 }
  0xee   : > { %2539 = vmatmul.bf16.vlgmr.msra.gmra.mxu2 %v5811_v41 }
  0xef   : > { %2568 = vmatmul.bf16.vlgmr.msra.gmra.mxu3 %v5813_v43  ;;  %2652 = vmatpush.bf16.msrb.mxu2 %v4570_v56  ;;  %v4433_v56 = vld [vmem:[%s5406_s29 + $0x610] sm:$0xf] }
  0xf1   : > { %v2308_v6 = vpop.f32.mrf.mxu2  ;;  %v2252_v11 = vpop.f32.mrf.mxu0 }
  0xf2   : > { %v2309_v9 = vadd.f32 %v2308_v6, %v2280_v44  ;;  %v2337_v10 = vpop.f32.mrf.mxu3  ;;  %v2281_v13 = vpop.f32.mrf.mxu1  ;;  %v4948_v44 = vld [vmem:[%s5406_s29 + $0x624] sm:$0xf0]  ;;  %v4708_v6 = vld [vmem:[%s5399_s23 + $0xac] sm:$0xf] }
  0xf3   : > { %v2282_v15 = vadd.f32 %v2281_v13, %v2252_v11  ;;  %v4442_v59 = vor.u32 %v4948_v44, %v4441_v42  ;;  %v5847_v13 = vor.u32 %v4707_v53, %v3499_v62  ;;  %v5851_v24 = vor.u32 %v4708_v6, %v3507_v7  ;;  %v4561_v42 = vld [vmem:[%s5406_s29 + $0x710] sm:$0xf]  ;;  %v4978_v44 = vld [vmem:[%s5406_s29 + $0x714] sm:$0xf0] }
  0xf4   : > { %v5827_v14 = vadd.f32 %v2337_v10, %v2309_v9  ;;  %v5845_v9 = vor.u32 %v4715_v21, %v3497_v16  ;;  %v4505_v21 = vld [vmem:[%s5406_s29 + $0x6a0] sm:$0xf]  ;;  %v4562_v53 = vor.u32 %v4978_v44, %v4561_v42  ;;  %v4626_v7 = vor.u32 %v4994_v63, %v4625_v60  ;;  %v4976_v42 = vld [vmem:[%s5406_s29 + $0x704] sm:$0xf0]  ;;  %v3563_v63 = vld [vmem:[%s5399_s23 + $0x160] sm:$0xf0] }
  0xf5   : > { %2594 = vmatpush.bf16.msrb.mxu0 %v4442_v59  ;;  %6630 = vst [vmem:[#allocation23_spill] sm:$0xff] %v5847_v13  ;;  %v4946_v59 = vld [vmem:[%s5406_s29 + $0x614] sm:$0xf0]  ;;  %v4425_v44 = vld [vmem:[%s5406_s29 + $0x600] sm:$0xf] }
  0xf6   : > { %6629 = vst [vmem:[#allocation22_spill] sm:$0xff] %v5845_v9  ;;  %v4434_v62 = vor.u32 %v4946_v59, %v4433_v56  ;;  %2653 = vmatpush.bf16.msrb.mxu2 %v4562_v53  ;;  %2682 = vmatpush.bf16.msrb.mxu3 %v4626_v7  ;;  %v4944_v53 = vld [vmem:[%s5406_s29 + $0x604] sm:$0xf0]  ;;  %v4723_v56 = vld [vmem:[%s5399_s23 + $0x124] sm:$0xf] }
  0xf7   : > { %6632 = vst [vmem:[#allocation25_spill] sm:$0xff] %v5851_v24  ;;  %v4426_v60 = vor.u32 %v4944_v53, %v4425_v44  ;;  %v4724_v7 = vld [vmem:[%s5399_s23 + $0x12c] sm:$0xf] }
  0xf9   : > { %v2310_v8 = vpop.f32.mrf.mxu2  ;;  %v2255_v12 = vpop.f32.mrf.mxu0  ;;  %2595 = vmatpush.bf16.msrb.mxu0 %v4434_v62  ;;  %v4992_v62 = vld [vmem:[%s5406_s29 + $0x784] sm:$0xf0] }
  0xfa   : > { %v2311_v10 = vadd.f32 %v2310_v8, %v2282_v15  ;;  %v2339_v11 = vpop.f32.mrf.mxu3  ;;  %v2284_v23 = vpop.f32.mrf.mxu1  ;;  %v4964_v15 = vld [vmem:[%s5406_s29 + $0x6a4] sm:$0xf0] }
  0xfb   : > { %v2285_v16 = vadd.f32 %v2284_v23, %v2255_v12  ;;  %v4506_v31 = vor.u32 %v4964_v15, %v4505_v21  ;;  %v3561_v12 = vld [vmem:[%s5399_s23 + $0x120] sm:$0xf]  ;;  %v4962_v21 = vld [vmem:[%s5406_s29 + $0x694] sm:$0xf0] }
  0xfc   : > { %v5853_v25 = vadd.f32 %v2339_v11, %v2311_v10  ;;  %2486 = vmatmul.bf16.gmra.mxu0 %v5845_v9  ;;  %v4731_v23 = vld [vmem:[%s5399_s23 + $0x15c] sm:$0xf0] }
  0xfd   : > { %2515 = vmatmul.bf16.gmra.mxu1 %v5847_v13  ;;  %v4553_v15 = vld [vmem:[%s5406_s29 + $0x700] sm:$0xf]  ;;  %2596 = vmatpush.bf16.msrb.mxu0 %v4426_v60 }
  0xfe   : > { %2544 = vmatmul.bf16.gmra.mxu2 %v5849_v22  ;;  %2623 = vmatpush.bf16.msrb.mxu1 %v4506_v31  ;;  %v4554_v59 = vor.u32 %v4976_v42, %v4553_v15  ;;  %v4960_v15 = vld [vmem:[%s5406_s29 + $0x684] sm:$0xf0]  ;;  %v5889_v22 = vor.u32 %v4723_v56, %v3563_v63  ;;  %v3843_v56 = vld [vmem:[%s5406_s29 + $0x178] sm:$0xf0] }
  0xff   : > { %2573 = vmatmul.bf16.gmra.mxu3 %v5851_v24  ;;  %v4489_v24 = vld [vmem:[%s5406_s29 + $0x680] sm:$0xf]  ;;  %v3715_v63 = vld [vmem:[%s5406_s29 + $0x78] sm:$0xf0] }
 0x100   : > { %2654 = vmatpush.bf16.msrb.mxu2 %v4554_v59  ;;  %6634 = vst [vmem:[#allocation27_spill] sm:$0xff] %v5889_v22  ;;  %v4490_v59 = vor.u32 %v4960_v15, %v4489_v24 }
 0x101   : > { %v2313_v61 = vpop.f32.mrf.mxu2  ;;  %v2257_v6 = vpop.f32.mrf.mxu0 }
 0x102   : > { %v2314_v0 = vadd.f32 %v2313_v61, %v2285_v16  ;;  %v2342_v5 = vpop.f32.mrf.mxu3  ;;  %v2286_v8 = vpop.f32.mrf.mxu1  ;;  %v4497_v16 = vld [vmem:[%s5406_s29 + $0x690] sm:$0xf]  ;;  %v4617_v61 = vld [vmem:[%s5406_s29 + $0x780] sm:$0xf] }
 0x103   : > { %v2287_v11 = vadd.f32 %v2286_v8, %v2257_v6  ;;  %v4498_v31 = vor.u32 %v4962_v21, %v4497_v16  ;;  %v4618_v6 = vor.u32 %v4992_v62, %v4617_v61  ;;  %v3571_v8 = vld [vmem:[%s5399_s23 + $0x168] sm:$0xf0]  ;;  %v5885_v21 = vor.u32 %v4731_v23, %v3561_v12  ;;  %v4765_v62 = vld [vmem:[%s5406_s29 + $0x74] sm:$0xf] }
 0x104   : > { %v5867_v10 = vadd.f32 %v2342_v5, %v2314_v0  ;;  %v3569_v0 = vld [vmem:[%s5399_s23 + $0x128] sm:$0xf]  ;;  %v5893_v12 = vor.u32 %v4724_v7, %v3571_v8  ;;  %v3718_v7 = vor.u32 %v4765_v62, %v3715_v63  ;;  %v4739_v62 = vld [vmem:[%s5399_s23 + $0x1a4] sm:$0xf] }
 0x105   : > { %v4732_v5 = vld [vmem:[%s5399_s23 + $0x164] sm:$0xf0]  ;;  %2624 = vmatpush.bf16.msrb.mxu1 %v4498_v31  ;;  %6633 = vst [vmem:[#allocation26_spill] sm:$0xff] %v5885_v21  ;;  %2683 = vmatpush.bf16.msrb.mxu3 %v4618_v6  ;;  %v4795_v63 = vld [vmem:[%s5406_s29 + $0x164] sm:$0xf] }
 0x106   : > { %v5891_v31 = vor.u32 %v4732_v5, %v3569_v0  ;;  %6636 = vst [vmem:[#allocation29_spill] sm:$0xff] %v5893_v12  ;;  %v4813_v0 = vld [vmem:[%s5406_s29 + $0x1f4] sm:$0xf]  ;;  %v3907_v5 = vld [vmem:[%s5406_s29 + $0x1f8] sm:$0xf0]  ;;  %2705 = vmatpush.bf16.msra.mxu0 %v3718_v7 }
 0x107   : > { %v3910_v8 = vor.u32 %v4813_v0, %v3907_v5  ;;  %v3835_v0 = vld [vmem:[%s5406_s29 + $0x168] sm:$0xf0]  ;;  %v4763_v5 = vld [vmem:[%s5406_s29 + $0x64] sm:$0xf] }
 0x108   : > { %6635 = vst [vmem:[#allocation28_spill] sm:$0xff] %v5891_v31  ;;  %v3707_v7 = vld [vmem:[%s5406_s29 + $0x68] sm:$0xf0] }
 0x109   : > { %v2315_v16 = vpop.f32.mrf.mxu2  ;;  %v2260_v53 = vpop.f32.mrf.mxu0  ;;  %2625 = vmatpush.bf16.msrb.mxu1 %v4490_v59  ;;  %2792 = vmatpush.bf16.msra.mxu3 %v3910_v8  ;;  %v4811_v8 = vld [vmem:[%s5406_s29 + $0x1e4] sm:$0xf] }
 0x10a   : > { %v2316_v42 = vadd.f32 %v2315_v16, %v2287_v11  ;;  %v2344_v44 = vpop.f32.mrf.mxu3  ;;  %v2289_v60 = vpop.f32.mrf.mxu1  ;;  %v4797_v11 = vld [vmem:[%s5406_s29 + $0x174] sm:$0xf] }
 0x10b   : > { %v2290_v61 = vadd.f32 %v2289_v60, %v2260_v53  ;;  %v3846_v24 = vor.u32 %v4797_v11, %v3843_v56  ;;  %v3625_v60 = vld [vmem:[%s5399_s23 + $0x1a0] sm:$0xf]  ;;  %v3779_v56 = vld [vmem:[%s5406_s29 + $0xf8] sm:$0xf0] }
 0x10c   : > { %v5895_v23 = vadd.f32 %v2344_v44, %v2316_v42  ;;  %2491 = vmatmul.bf16.gmra.mxu0 %v5885_v21  ;;  %v4747_v11 = vld [vmem:[%s5399_s23 + $0x1dc] sm:$0xf0]  ;;  %v3635_v21 = vld [vmem:[%s5399_s23 + $0x1e8] sm:$0xf0] }
 0x10d   : > { %2520 = vmatmul.bf16.gmra.mxu1 %v5889_v22  ;;  %2763 = vmatpush.bf16.msra.mxu2 %v3846_v24  ;;  %v4740_v22 = vld [vmem:[%s5399_s23 + $0x1ac] sm:$0xf] }
 0x10e   : > { %2549 = vmatmul.bf16.gmra.mxu2 %v5891_v31  ;;  %v4748_v31 = vld [vmem:[%s5399_s23 + $0x1e4] sm:$0xf0] }
 0x10f   : > { %2578 = vmatmul.bf16.gmra.mxu3 %v5893_v12  ;;  %v3899_v12 = vld [vmem:[%s5406_s29 + $0x1e8] sm:$0xf0] }
 0x111   : > { %v2318_v6 = vpop.f32.mrf.mxu2  ;;  %v2262_v42 = vpop.f32.mrf.mxu0 }
 0x112   : > { %v2319_v16 = vadd.f32 %v2318_v6, %v2290_v61  ;;  %v2347_v15 = vpop.f32.mrf.mxu3  ;;  %v2291_v44 = vpop.f32.mrf.mxu1  ;;  %v4781_v61 = vld [vmem:[%s5406_s29 + $0xf4] sm:$0xf]  ;;  %v3838_v6 = vor.u32 %v4795_v63, %v3835_v0 }
 0x113   : > { %v2292_v59 = vadd.f32 %v2291_v44, %v2262_v42  ;;  %v3782_v24 = vor.u32 %v4781_v61, %v3779_v56  ;;  %v3710_v42 = vor.u32 %v4763_v5, %v3707_v7  ;;  %v3902_v44 = vor.u32 %v4811_v8, %v3899_v12  ;;  %v3699_v7 = vld [vmem:[%s5406_s29 + $0x58] sm:$0xf0]  ;;  %v4809_v8 = vld [vmem:[%s5406_s29 + $0x1d4] sm:$0xf] }
 0x114   : > { %v5907_v53 = vadd.f32 %v2347_v15, %v2319_v16  ;;  %v3627_v16 = vld [vmem:[%s5399_s23 + $0x1e0] sm:$0xf0]  ;;  %v3633_v15 = vld [vmem:[%s5399_s23 + $0x1a8] sm:$0xf]  ;;  %2764 = vmatpush.bf16.msra.mxu2 %v3838_v6  ;;  %v5925_v61 = vor.u32 %v4747_v11, %v3625_v60  ;;  %v5931_v5 = vor.u32 %v4740_v22, %v3635_v21  ;;  %v3827_v22 = vld [vmem:[%s5406_s29 + $0x158] sm:$0xf0] }
 0x115   : > { %2734 = vmatpush.bf16.msra.mxu1 %v3782_v24  ;;  %2706 = vmatpush.bf16.msra.mxu0 %v3710_v42  ;;  %v5927_v9 = vor.u32 %v4739_v62, %v3627_v16  ;;  %v5929_v24 = vor.u32 %v4748_v31, %v3633_v15  ;;  %v4779_v11 = vld [vmem:[%s5406_s29 + $0xe4] sm:$0xf]  ;;  %v4793_v31 = vld [vmem:[%s5406_s29 + $0x154] sm:$0xf]  ;;  %v3891_v42 = vld [vmem:[%s5406_s29 + $0x1d8] sm:$0xf0] }
 0x116   : > { %6637 = vst [vmem:[#allocation30_spill] sm:$0xff] %v5925_v61  ;;  %2793 = vmatpush.bf16.msra.mxu3 %v3902_v44  ;;  %v3830_v21 = vor.u32 %v4793_v31, %v3827_v22  ;;  %v4761_v62 = vld [vmem:[%s5406_s29 + $0x54] sm:$0xf]  ;;  %v3763_v22 = vld [vmem:[%s5406_s29 + $0xd8] sm:$0xf0] }
 0x117   : > { %6638 = vst [vmem:[#allocation31_spill] sm:$0xff] %v5927_v9  ;;  %v3702_v15 = vor.u32 %v4761_v62, %v3699_v7  ;;  %v4777_v31 = vld [vmem:[%s5406_s29 + $0xd4] sm:$0xf]  ;;  %v4791_v7 = vld [vmem:[%s5406_s29 + $0x144] sm:$0xf] }
 0x118   : > { %6639 = vst [vmem:[#allocation32_spill] sm:$0xff] %v5929_v24  ;;  %2765 = vmatpush.bf16.msra.mxu2 %v3830_v21  ;;  %v4693_v62 = vld [vmem:[%s5399_s23 + $0x34] sm:$0xf]  ;;  %v3766_v21 = vor.u32 %v4777_v31, %v3763_v22 }
 0x119   : > { %v2320_v13 = vpop.f32.mrf.mxu2  ;;  %v2265_v0 = vpop.f32.mrf.mxu0  ;;  %6640 = vst [vmem:[#allocation33_spill] sm:$0xff] %v5931_v5  ;;  %2707 = vmatpush.bf16.msra.mxu0 %v3702_v15 }
 0x11a   : > { %v2321_v56 = vadd.f32 %v2320_v13, %v2292_v59  ;;  %v2349_v63 = vpop.f32.mrf.mxu3  ;;  %v2294_v12 = vpop.f32.mrf.mxu1  ;;  %v3771_v13 = vld [vmem:[%s5406_s29 + $0xe8] sm:$0xf0] }
 0x11b   : > { %v2295_v60 = vadd.f32 %v2294_v12, %v2265_v0  ;;  %v3774_v59 = vor.u32 %v4779_v11, %v3771_v13  ;;  %v3894_v0 = vor.u32 %v4809_v8, %v3891_v42  ;;  %v3819_v8 = vld [vmem:[%s5406_s29 + $0x148] sm:$0xf0] }
 0x11c   : > { %v5933_v6 = vadd.f32 %v2349_v63, %v2321_v56  ;;  %2496 = vmatmul.bf16.gmra.mxu0 %v5925_v61  ;;  %v3822_v15 = vor.u32 %v4791_v7, %v3819_v8  ;;  %v3691_v42 = vld [vmem:[%s5406_s29 + $0x48] sm:$0xf0]  ;;  %v3459_v61 = vld [vmem:[%s5399_s23 + $0x78] sm:$0xf0] }
 0x11d   : > { %2525 = vmatmul.bf16.gmra.mxu1 %v5927_v9  ;;  %2794 = vmatpush.bf16.msra.mxu3 %v3894_v0  ;;  %v4694_v0 = vld [vmem:[%s5399_s23 + $0x3c] sm:$0xf] }
 0x11e   : > { %2554 = vmatmul.bf16.gmra.mxu2 %v5929_v24  ;;  %2735 = vmatpush.bf16.msra.mxu1 %v3774_v59  ;;  %v3449_v59 = vld [vmem:[%s5399_s23 + $0x30] sm:$0xf] }
 0x11f   : > { %2583 = vmatmul.bf16.gmra.mxu3 %v5931_v5  ;;  %v3451_v5 = vld [vmem:[%s5399_s23 + $0x70] sm:$0xf0]  ;;  %2766 = vmatpush.bf16.msra.mxu2 %v3822_v15  ;;  %v5972_v15 = vor.u32 %v4694_v0, %v3459_v61  ;;  %v3811_v61 = vld [vmem:[%s5406_s29 + $0x138] sm:$0xf0] }
 0x120   : > { %v5967_v41 = vor.u32 %v4693_v62, %v3451_v5  ;;  %v3683_v62 = vld [vmem:[%s5406_s29 + $0x38] sm:$0xf0] }
 0x121   : > { %v2323_v16 = vpop.f32.mrf.mxu2  ;;  %v2267_v63 = vpop.f32.mrf.mxu0  ;;  %6644 = vst [vmem:[#allocation37_spill] sm:$0xff] %v5972_v15 }
 0x122   : > { %v2324_v44 = vadd.f32 %v2323_v16, %v2295_v60  ;;  %v2352_v56 = vpop.f32.mrf.mxu3  ;;  %v2296_v12 = vpop.f32.mrf.mxu1  ;;  %v4701_v60 = vld [vmem:[%s5399_s23 + $0x6c] sm:$0xf0]  ;;  %v4759_v16 = vld [vmem:[%s5406_s29 + $0x44] sm:$0xf]  ;;  %2736 = vmatpush.bf16.msra.mxu1 %v3766_v21  ;;  %6642 = vst [vmem:[#allocation35_spill] sm:$0xff] %v5967_v41 }
 0x123   : > { %v2297_v13 = vadd.f32 %v2296_v12, %v2267_v63  ;;  %v3457_v63 = vld [vmem:[%s5399_s23 + $0x38] sm:$0xf]  ;;  %v3694_v24 = vor.u32 %v4759_v16, %v3691_v42  ;;  %v5965_v31 = vor.u32 %v4701_v60, %v3449_v59  ;;  %v4757_v60 = vld [vmem:[%s5406_s29 + $0x34] sm:$0xf] }
 0x124   : > { %v5947_v11 = vadd.f32 %v2352_v56, %v2324_v44  ;;  %v4807_v44 = vld [vmem:[%s5406_s29 + $0x1c4] sm:$0xf]  ;;  %v3883_v56 = vld [vmem:[%s5406_s29 + $0x1c8] sm:$0xf0]  ;;  %v4702_v12 = vld [vmem:[%s5399_s23 + $0x74] sm:$0xf0] }
 0x125   : > { %v3886_v9 = vor.u32 %v4807_v44, %v3883_v56  ;;  %6641 = vst [vmem:[#allocation34_spill] sm:$0xff] %v5965_v31  ;;  %2708 = vmatpush.bf16.msra.mxu0 %v3694_v24  ;;  %v5969_v21 = vor.u32 %v4702_v12, %v3457_v63  ;;  %v4805_v44 = vld [vmem:[%s5406_s29 + $0x1b4] sm:$0xf]  ;;  %v3686_v63 = vor.u32 %v4757_v60, %v3683_v62  ;;  %v3875_v12 = vld [vmem:[%s5406_s29 + $0x1b8] sm:$0xf0] }
 0x126   : > { %v4787_v60 = vld [vmem:[%s5406_s29 + $0x124] sm:$0xf]  ;;  %v3803_v62 = vld [vmem:[%s5406_s29 + $0x128] sm:$0xf0] }
 0x127   : > { %2795 = vmatpush.bf16.msra.mxu3 %v3886_v9  ;;  %6643 = vst [vmem:[#allocation36_spill] sm:$0xff] %v5969_v21  ;;  %v4775_v9 = vld [vmem:[%s5406_s29 + $0xc4] sm:$0xf] }
 0x129   : > { %v2325_v43 = vpop.f32.mrf.mxu2  ;;  %v2366_v8 = vpop.f32.mrf.mxu0  ;;  %2709 = vmatpush.bf16.msra.mxu0 %v3686_v63  ;;  %v3675_v63 = vld [vmem:[%s5406_s29 + $0x28] sm:$0xf0] }
 0x12a   : > { %v2326_v22 = vadd.f32 %v2325_v43, %v2297_v13  ;;  %v2354_v7 = vpop.f32.mrf.mxu3  ;;  %v2367_v16 = vadd.f32 %v2366_v8, %v5827_v14  ;;  %v2395_v42 = vpop.f32.mrf.mxu1  ;;  %v3755_v43 = vld [vmem:[%s5406_s29 + $0xc8] sm:$0xf0]  ;;  %v4789_v14 = vld [vmem:[%s5406_s29 + $0x134] sm:$0xf]  ;;  %v3878_v8 = vor.u32 %v4805_v44, %v3875_v12  ;;  %v4755_v44 = vld [vmem:[%s5406_s29 + $0x24] sm:$0xf] }
 0x12b   : > { %v3758_v5 = vor.u32 %v4775_v9, %v3755_v43  ;;  %v3814_v13 = vor.u32 %v4789_v14, %v3811_v61  ;;  %v3513_v43 = vld [vmem:[%s5399_s23 + $0xb0] sm:$0xf]  ;;  %v3747_v14 = vld [vmem:[%s5406_s29 + $0xb8] sm:$0xf0]  ;;  %v4803_v12 = vld [vmem:[%s5406_s29 + $0x1a4] sm:$0xf] }
 0x12c   : > { %v5974_v59 = vadd.f32 %v2354_v7, %v2326_v22  ;;  %v2396_v24 = vadd.f32 %v2395_v42, %v2367_v16  ;;  %2597 = vmatmul.bf16.vlgmr.msrb.gmra.mxu0 %v5965_v31  ;;  %2796 = vmatpush.bf16.msra.mxu3 %v3878_v8 }
 0x12d   : > { %2626 = vmatmul.bf16.vlgmr.msrb.gmra.mxu1 %v5967_v41  ;;  %2767 = vmatpush.bf16.msra.mxu2 %v3814_v13  ;;  %v4709_v13 = vld [vmem:[%s5399_s23 + $0xb4] sm:$0xf]  ;;  %v4710_v41 = vld [vmem:[%s5399_s23 + $0xbc] sm:$0xf] }
 0x12e   : > { %2655 = vmatmul.bf16.vlgmr.msrb.gmra.mxu2 %v5969_v21  ;;  %2737 = vmatpush.bf16.msra.mxu1 %v3758_v5  ;;  %v4773_v5 = vld [vmem:[%s5406_s29 + $0xb4] sm:$0xf]  ;;  %v3678_v21 = vor.u32 %v4755_v44, %v3675_v63 }
 0x12f   : > { %2684 = vmatmul.bf16.vlgmr.msrb.gmra.mxu3 %v5972_v15  ;;  %v4718_v15 = vld [vmem:[%s5399_s23 + $0xf4] sm:$0xf0] }
 0x130   : > { %2710 = vmatpush.bf16.msra.mxu0 %v3678_v21  ;;  %v4771_v21 = vld [vmem:[%s5406_s29 + $0xa4] sm:$0xf] }
 0x131   : > { %v2424_v56 = vpop.f32.mrf.mxu2  ;;  %v2368_v7 = vpop.f32.mrf.mxu0 }
 0x132   : > { %v2425_v0 = vadd.f32 %v2424_v56, %v2396_v24  ;;  %v2453_v22 = vpop.f32.mrf.mxu3  ;;  %v2369_v16 = vadd.f32 %v2368_v7, %v5853_v25  ;;  %v2397_v42 = vpop.f32.mrf.mxu1  ;;  %v4717_v24 = vld [vmem:[%s5399_s23 + $0xec] sm:$0xf0]  ;;  %v3750_v25 = vor.u32 %v4773_v5, %v3747_v14  ;;  %v3806_v56 = vor.u32 %v4787_v60, %v3803_v62  ;;  %v3521_v7 = vld [vmem:[%s5399_s23 + $0xb8] sm:$0xf] }
 0x133   : > { %v6007_v5 = vor.u32 %v4717_v24, %v3513_v43  ;;  %v3739_v24 = vld [vmem:[%s5406_s29 + $0xa8] sm:$0xf0] }
 0x134   : > { %v5989_v9 = vadd.f32 %v2453_v22, %v2425_v0  ;;  %v2398_v61 = vadd.f32 %v2397_v42, %v2369_v16  ;;  %v3867_v0 = vld [vmem:[%s5406_s29 + $0x1a8] sm:$0xf0]  ;;  %v3515_v22 = vld [vmem:[%s5399_s23 + $0xf0] sm:$0xf0]  ;;  %2738 = vmatpush.bf16.msra.mxu1 %v3750_v25  ;;  %v3523_v16 = vld [vmem:[%s5399_s23 + $0xf8] sm:$0xf0]  ;;  %2768 = vmatpush.bf16.msra.mxu2 %v3806_v56  ;;  %v6011_v25 = vor.u32 %v4718_v15, %v3521_v7 }
 0x135   : > { %v3870_v8 = vor.u32 %v4803_v12, %v3867_v0  ;;  %6645 = vst [vmem:[#allocation38_spill] sm:$0xff] %v6007_v5  ;;  %v6009_v31 = vor.u32 %v4709_v13, %v3515_v22  ;;  %v6014_v56 = vor.u32 %v4710_v41, %v3523_v16  ;;  %v3742_v13 = vor.u32 %v4771_v21, %v3739_v24  ;;  %v3795_v41 = vld [vmem:[%s5406_s29 + $0x118] sm:$0xf0]  ;;  %v4753_v12 = vld [vmem:[%s5406_s29 + $0x14] sm:$0xf] }
 0x136   : > { %6647 = vst [vmem:[#allocation40_spill] sm:$0xff] %v6011_v25  ;;  %v3667_v0 = vld [vmem:[%s5406_s29 + $0x18] sm:$0xf0]  ;;  %v4801_v22 = vld [vmem:[%s5406_s29 + $0x194] sm:$0xf] }
 0x137   : > { %2797 = vmatpush.bf16.msra.mxu3 %v3870_v8  ;;  %6646 = vst [vmem:[#allocation39_spill] sm:$0xff] %v6009_v31  ;;  %v3670_v8 = vor.u32 %v4753_v12, %v3667_v0  ;;  %v3859_v16 = vld [vmem:[%s5406_s29 + $0x198] sm:$0xf0]  ;;  %v3577_v24 = vld [vmem:[%s5399_s23 + $0x130] sm:$0xf] }
 0x138   : > { %6648 = vst [vmem:[#allocation41_spill] sm:$0xff] %v6014_v56  ;;  %2739 = vmatpush.bf16.msra.mxu1 %v3742_v13  ;;  %v4769_v13 = vld [vmem:[%s5406_s29 + $0x94] sm:$0xf]  ;;  %v4783_v12 = vld [vmem:[%s5406_s29 + $0x104] sm:$0xf] }
 0x139   : > { %v2426_v42 = vpop.f32.mrf.mxu2  ;;  %v2371_v62 = vpop.f32.mrf.mxu0  ;;  %2711 = vmatpush.bf16.msra.mxu0 %v3670_v8  ;;  %v3787_v0 = vld [vmem:[%s5406_s29 + $0x108] sm:$0xf0] }
 0x13a   : > { %v2427_v14 = vadd.f32 %v2426_v42, %v2398_v61  ;;  %v2455_v60 = vpop.f32.mrf.mxu3  ;;  %v2372_v44 = vadd.f32 %v2371_v62, %v5867_v10  ;;  %v2400_v63 = vpop.f32.mrf.mxu1  ;;  %v4785_v10 = vld [vmem:[%s5406_s29 + $0x114] sm:$0xf]  ;;  %v3862_v62 = vor.u32 %v4801_v22, %v3859_v16  ;;  %v4751_v22 = vld [vmem:[%s5406_s29 + $0x4] sm:$0xf]  ;;  %v3659_v8 = vld [vmem:[%s5406_s29 + $0x8] sm:$0xf0] }
 0x13b   : > { %v3798_v15 = vor.u32 %v4785_v10, %v3795_v41  ;;  %v3731_v10 = vld [vmem:[%s5406_s29 + $0x98] sm:$0xf0]  ;;  %v4799_v16 = vld [vmem:[%s5406_s29 + $0x184] sm:$0xf] }
 0x13c   : > { %v6016_v43 = vadd.f32 %v2455_v60, %v2427_v14  ;;  %v2401_v61 = vadd.f32 %v2400_v63, %v2372_v44  ;;  %2602 = vmatmul.bf16.gmra.mxu0 %v6007_v5  ;;  %2798 = vmatpush.bf16.msra.mxu3 %v3862_v62  ;;  %v3662_v62 = vor.u32 %v4751_v22, %v3659_v8  ;;  %v4877_v8 = vld [vmem:[%s5406_s29 + $0x3f4] sm:$0xf] }
 0x13d   : > { %2631 = vmatmul.bf16.gmra.mxu1 %v6009_v31  ;;  %2769 = vmatpush.bf16.msra.mxu2 %v3798_v15  ;;  %v4725_v15 = vld [vmem:[%s5399_s23 + $0x134] sm:$0xf] }
 0x13e   : > { %2660 = vmatmul.bf16.gmra.mxu2 %v6011_v25  ;;  %2712 = vmatpush.bf16.msra.mxu0 %v3662_v62 }
 0x13f   : > { %2689 = vmatmul.bf16.gmra.mxu3 %v6014_v56  ;;  %v4734_v56 = vld [vmem:[%s5399_s23 + $0x174] sm:$0xf0] }
 0x141   : > { %v2429_v7 = vpop.f32.mrf.mxu2  ;;  %v2373_v60 = vpop.f32.mrf.mxu0 }
 0x142   : > { %v2430_v42 = vadd.f32 %v2429_v7, %v2401_v61  ;;  %v2458_v14 = vpop.f32.mrf.mxu3  ;;  %v2374_v44 = vadd.f32 %v2373_v60, %v5895_v23  ;;  %v2402_v63 = vpop.f32.mrf.mxu1  ;;  %v4733_v61 = vld [vmem:[%s5399_s23 + $0x16c] sm:$0xf0]  ;;  %v3734_v23 = vor.u32 %v4769_v13, %v3731_v10  ;;  %v3790_v7 = vor.u32 %v4783_v12, %v3787_v0  ;;  %v3585_v60 = vld [vmem:[%s5399_s23 + $0x138] sm:$0xf]  ;;  %v4767_v10 = vld [vmem:[%s5406_s29 + $0x84] sm:$0xf] }
 0x143   : > { %v6049_v13 = vor.u32 %v4733_v61, %v3577_v24  ;;  %v3723_v12 = vld [vmem:[%s5406_s29 + $0x88] sm:$0xf0] }
 0x144   : > { %v6031_v21 = vadd.f32 %v2458_v14, %v2430_v42  ;;  %v2403_v41 = vadd.f32 %v2402_v63, %v2374_v44  ;;  %v3851_v42 = vld [vmem:[%s5406_s29 + $0x188] sm:$0xf0]  ;;  %v3579_v14 = vld [vmem:[%s5399_s23 + $0x170] sm:$0xf0]  ;;  %2740 = vmatpush.bf16.msra.mxu1 %v3734_v23  ;;  %v4726_v44 = vld [vmem:[%s5399_s23 + $0x13c] sm:$0xf]  ;;  %2770 = vmatpush.bf16.msra.mxu2 %v3790_v7  ;;  %v6055_v23 = vor.u32 %v4734_v56, %v3585_v60 }
 0x145   : > { %v3854_v25 = vor.u32 %v4799_v16, %v3851_v42  ;;  %v3587_v63 = vld [vmem:[%s5399_s23 + $0x178] sm:$0xf0]  ;;  %6649 = vst [vmem:[#allocation42_spill] sm:$0xff] %v6049_v13  ;;  %v6053_v30 = vor.u32 %v4725_v15, %v3579_v14  ;;  %v3726_v22 = vor.u32 %v4767_v10, %v3723_v12  ;;  %v4861_v56 = vld [vmem:[%s5406_s29 + $0x374] sm:$0xf] }
 0x146   : > { %6651 = vst [vmem:[#allocation44_spill] sm:$0xff] %v6055_v23  ;;  %v4829_v15 = vld [vmem:[%s5406_s29 + $0x274] sm:$0xf] }
 0x147   : > { %2799 = vmatpush.bf16.msra.mxu3 %v3854_v25  ;;  %6650 = vst [vmem:[#allocation43_spill] sm:$0xff] %v6053_v30  ;;  %v6058_v25 = vor.u32 %v4726_v44, %v3587_v63 }
 0x148   : > { %2741 = vmatpush.bf16.msra.mxu1 %v3726_v22  ;;  %v4749_v22 = vld [vmem:[%s5399_s23 + $0x1ec] sm:$0xf0] }
 0x149   : > { %v2431_v31 = vpop.f32.mrf.mxu2  ;;  %v2376_v32 = vpop.f32.mrf.mxu0  ;;  %6652 = vst [vmem:[#allocation45_spill] sm:$0xff] %v6058_v25 }
 0x14a   : > { %v2432_v0 = vadd.f32 %v2431_v31, %v2403_v41  ;;  %v2460_v5 = vpop.f32.mrf.mxu3  ;;  %v2377_v24 = vadd.f32 %v2376_v32, %v5907_v53  ;;  %v2405_v61 = vpop.f32.mrf.mxu1  ;;  %v4099_v41 = vld [vmem:[%s5406_s29 + $0x378] sm:$0xf0] }
 0x14b   : > { %v4102_v32 = vor.u32 %v4861_v56, %v4099_v41  ;;  %v3971_v53 = vld [vmem:[%s5406_s29 + $0x278] sm:$0xf0]  ;;  %v4741_v56 = vld [vmem:[%s5399_s23 + $0x1b4] sm:$0xf]  ;;  %v4859_v41 = vld [vmem:[%s5406_s29 + $0x364] sm:$0xf] }
 0x14c   : > { %v6060_v7 = vadd.f32 %v2460_v5, %v2432_v0  ;;  %v2406_v31 = vadd.f32 %v2405_v61, %v2377_v24  ;;  %2607 = vmatmul.bf16.gmra.mxu0 %v6049_v13  ;;  %v4163_v5 = vld [vmem:[%s5406_s29 + $0x3f8] sm:$0xf0]  ;;  %v3974_v42 = vor.u32 %v4829_v15, %v3971_v53  ;;  %v3641_v0 = vld [vmem:[%s5399_s23 + $0x1b0] sm:$0xf]  ;;  %v4845_v24 = vld [vmem:[%s5406_s29 + $0x2f4] sm:$0xf] }
 0x14d   : > { %2636 = vmatmul.bf16.gmra.mxu1 %v6053_v30  ;;  %v4166_v14 = vor.u32 %v4877_v8, %v4163_v5  ;;  %2879 = vmatpush.bf16.msrb.mxu2 %v4102_v32  ;;  %v4035_v61 = vld [vmem:[%s5406_s29 + $0x2f8] sm:$0xf0]  ;;  %v4091_v15 = vld [vmem:[%s5406_s29 + $0x368] sm:$0xf0]  ;;  %v4827_v32 = vld [vmem:[%s5406_s29 + $0x264] sm:$0xf] }
 0x14e   : > { %2665 = vmatmul.bf16.gmra.mxu2 %v6055_v23  ;;  %2821 = vmatpush.bf16.msrb.mxu0 %v3974_v42  ;;  %v4094_v53 = vor.u32 %v4859_v41, %v4091_v15  ;;  %v3963_v8 = vld [vmem:[%s5406_s29 + $0x268] sm:$0xf0]  ;;  %v4875_v5 = vld [vmem:[%s5406_s29 + $0x3e4] sm:$0xf]  ;;  %v3643_v42 = vld [vmem:[%s5399_s23 + $0x1f0] sm:$0xf0] }
 0x14f   : > { %2694 = vmatmul.bf16.gmra.mxu3 %v6058_v25  ;;  %v4742_v25 = vld [vmem:[%s5399_s23 + $0x1bc] sm:$0xf]  ;;  %v6093_v23 = vor.u32 %v4741_v56, %v3643_v42  ;;  %v4347_v30 = vld [vmem:[%s5406_s29 + $0x568] sm:$0xf0] }
 0x150   : > { %2908 = vmatpush.bf16.msrb.mxu3 %v4166_v14  ;;  %v3649_v14 = vld [vmem:[%s5399_s23 + $0x1b8] sm:$0xf] }
 0x151   : > { %v2434_v16 = vpop.f32.mrf.mxu2  ;;  %v2378_v44 = vpop.f32.mrf.mxu0  ;;  %2880 = vmatpush.bf16.msrb.mxu2 %v4094_v53  ;;  %6654 = vst [vmem:[#allocation47_spill] sm:$0xff] %v6093_v23 }
 0x152   : > { %v2435_v60 = vadd.f32 %v2434_v16, %v2406_v31  ;;  %v2463_v62 = vpop.f32.mrf.mxu3  ;;  %v2379_v63 = vadd.f32 %v2378_v44, %v5933_v6  ;;  %v2407_v10 = vpop.f32.mrf.mxu1  ;;  %v4038_v6 = vor.u32 %v4845_v24, %v4035_v61  ;;  %v4155_v16 = vld [vmem:[%s5406_s29 + $0x3e8] sm:$0xf0]  ;;  %v6091_v24 = vor.u32 %v4749_v22, %v3641_v0  ;;  %v4843_v22 = vld [vmem:[%s5406_s29 + $0x2e4] sm:$0xf] }
 0x153   : > { %v4158_v44 = vor.u32 %v4875_v5, %v4155_v16  ;;  %v4825_v16 = vld [vmem:[%s5406_s29 + $0x254] sm:$0xf] }
 0x154   : > { %v6073_v12 = vadd.f32 %v2463_v62, %v2435_v60  ;;  %v2408_v31 = vadd.f32 %v2407_v10, %v2379_v63  ;;  %v4750_v60 = vld [vmem:[%s5399_s23 + $0x1f4] sm:$0xf0]  ;;  %2850 = vmatpush.bf16.msrb.mxu1 %v4038_v6  ;;  %v3966_v62 = vor.u32 %v4827_v32, %v3963_v8  ;;  %v3651_v63 = vld [vmem:[%s5399_s23 + $0x1f8] sm:$0xf0]  ;;  %6653 = vst [vmem:[#allocation46_spill] sm:$0xff] %v6091_v24 }
 0x155   : > { %2909 = vmatpush.bf16.msrb.mxu3 %v4158_v44  ;;  %v6095_v6 = vor.u32 %v4750_v60, %v3649_v14  ;;  %v6098_v53 = vor.u32 %v4742_v25, %v3651_v63  ;;  %v4083_v25 = vld [vmem:[%s5406_s29 + $0x358] sm:$0xf0]  ;;  %v4873_v60 = vld [vmem:[%s5406_s29 + $0x3d4] sm:$0xf] }
 0x156   : > { %2822 = vmatpush.bf16.msrb.mxu0 %v3966_v62  ;;  %v3955_v14 = vld [vmem:[%s5406_s29 + $0x258] sm:$0xf0] }
 0x157   : > { %6655 = vst [vmem:[#allocation48_spill] sm:$0xff] %v6095_v6  ;;  %v4147_v62 = vld [vmem:[%s5406_s29 + $0x3d8] sm:$0xf0]  ;;  %v3958_v63 = vor.u32 %v4825_v16, %v3955_v14  ;;  %v4855_v16 = vld [vmem:[%s5406_s29 + $0x344] sm:$0xf] }
 0x158   : > { %6656 = vst [vmem:[#allocation49_spill] sm:$0xff] %v6098_v53  ;;  %v4075_v14 = vld [vmem:[%s5406_s29 + $0x348] sm:$0xf0] }
 0x159   : > { %v2436_v10 = vpop.f32.mrf.mxu2  ;;  %v2381_v15 = vpop.f32.mrf.mxu0 }
 0x15a   : > { %v2437_v61 = vadd.f32 %v2436_v10, %v2408_v31  ;;  %v2465_v41 = vpop.f32.mrf.mxu3  ;;  %v2382_v32 = vadd.f32 %v2381_v15, %v5947_v11  ;;  %v2410_v8 = vpop.f32.mrf.mxu1  ;;  %v4027_v31 = vld [vmem:[%s5406_s29 + $0x2e8] sm:$0xf0]  ;;  %v4857_v11 = vld [vmem:[%s5406_s29 + $0x354] sm:$0xf]  ;;  %v4150_v10 = vor.u32 %v4873_v60, %v4147_v62  ;;  %2823 = vmatpush.bf16.msrb.mxu0 %v3958_v63  ;;  %v4078_v60 = vor.u32 %v4855_v16, %v4075_v14  ;;  %v4067_v16 = vld [vmem:[%s5406_s29 + $0x338] sm:$0xf0] }
 0x15b   : > { %v4030_v56 = vor.u32 %v4843_v22, %v4027_v31  ;;  %v4086_v42 = vor.u32 %v4857_v11, %v4083_v25  ;;  %v4841_v31 = vld [vmem:[%s5406_s29 + $0x2d4] sm:$0xf]  ;;  %v3947_v62 = vld [vmem:[%s5406_s29 + $0x248] sm:$0xf0] }
 0x15c   : > { %v6100_v0 = vadd.f32 %v2465_v41, %v2437_v61  ;;  %v2411_v5 = vadd.f32 %v2410_v8, %v2382_v32  ;;  %2612 = vmatmul.bf16.gmra.mxu0 %v6091_v24  ;;  %2910 = vmatpush.bf16.msrb.mxu3 %v4150_v10  ;;  %v4821_v14 = vld [vmem:[%s5406_s29 + $0x234] sm:$0xf] }
 0x15d   : > { %2641 = vmatmul.bf16.gmra.mxu1 %v6093_v23  ;;  %2881 = vmatpush.bf16.msrb.mxu2 %v4086_v42  ;;  %v4871_v42 = vld [vmem:[%s5406_s29 + $0x3c4] sm:$0xf] }
 0x15e   : > { %2670 = vmatmul.bf16.gmra.mxu2 %v6095_v6  ;;  %2851 = vmatpush.bf16.msrb.mxu1 %v4030_v56  ;;  %v4019_v56 = vld [vmem:[%s5406_s29 + $0x2d8] sm:$0xf0] }
 0x15f   : > { %2699 = vmatmul.bf16.gmra.mxu3 %v6098_v53  ;;  %v4022_v25 = vor.u32 %v4841_v31, %v4019_v56  ;;  %v4839_v31 = vld [vmem:[%s5406_s29 + $0x2c4] sm:$0xf]  ;;  %v4011_v56 = vld [vmem:[%s5406_s29 + $0x2c8] sm:$0xf0] }
 0x160   : > { %v4107_v53 = vld [vmem:[%s5406_s29 + $0x388] sm:$0xf0] }
 0x161   : > { %v2439_v44 = vpop.f32.mrf.mxu2  ;;  %v2383_v15 = vpop.f32.mrf.mxu0  ;;  %2882 = vmatpush.bf16.msrb.mxu2 %v4078_v60  ;;  %v3939_v60 = vld [vmem:[%s5406_s29 + $0x238] sm:$0xf0] }
 0x162   : > { %v2440_v61 = vadd.f32 %v2439_v44, %v2411_v5  ;;  %v2468_v41 = vpop.f32.mrf.mxu3  ;;  %v2384_v32 = vadd.f32 %v2383_v15, %v5974_v59  ;;  %v2412_v8 = vpop.f32.mrf.mxu1  ;;  %v4823_v5 = vld [vmem:[%s5406_s29 + $0x244] sm:$0xf]  ;;  %v4139_v44 = vld [vmem:[%s5406_s29 + $0x3c8] sm:$0xf0]  ;;  %2852 = vmatpush.bf16.msrb.mxu1 %v4022_v25  ;;  %v4014_v25 = vor.u32 %v4839_v31, %v4011_v56 }
 0x163   : > { %v3950_v59 = vor.u32 %v4823_v5, %v3947_v62  ;;  %v4142_v15 = vor.u32 %v4871_v42, %v4139_v44  ;;  %v4869_v62 = vld [vmem:[%s5406_s29 + $0x3b4] sm:$0xf]  ;;  %v4059_v31 = vld [vmem:[%s5406_s29 + $0x328] sm:$0xf0]  ;;  %v4819_v56 = vld [vmem:[%s5406_s29 + $0x224] sm:$0xf] }
 0x164   : > { %v6115_v22 = vadd.f32 %v2468_v41, %v2440_v61  ;;  %v2413_v11 = vadd.f32 %v2412_v8, %v2384_v32 }
 0x165   : > { %2824 = vmatpush.bf16.msrb.mxu0 %v3950_v59  ;;  %2911 = vmatpush.bf16.msrb.mxu3 %v4142_v15  ;;  %v4837_v15 = vld [vmem:[%s5406_s29 + $0x2b4] sm:$0xf] }
 0x166   : > { %2853 = vmatpush.bf16.msrb.mxu1 %v4014_v25 }
 0x169   : > { %v2441_v63 = vpop.f32.mrf.mxu2  ;;  %v6125_v41 = vpop.f32.mrf.mxu0 }
 0x16a   : > { %v2442_v10 = vadd.f32 %v2441_v63, %v2413_v11  ;;  %v2470_v61 = vpop.f32.mrf.mxu3  ;;  %v6127_v32 = vpop.f32.mrf.mxu1  ;;  %v4853_v11 = vld [vmem:[%s5406_s29 + $0x334] sm:$0xf]  ;;  %v4003_v63 = vld [vmem:[%s5406_s29 + $0x2b8] sm:$0xf0] }
 0x16b   : > { %v4070_v5 = vor.u32 %v4853_v11, %v4067_v16  ;;  %v3931_v11 = vld [vmem:[%s5406_s29 + $0x228] sm:$0xf0]  ;;  %v4867_v16 = vld [vmem:[%s5406_s29 + $0x3a4] sm:$0xf] }
 0x16c   : > { %v6129_v8 = vadd.f32 %v2470_v61, %v2442_v10  ;;  %2713 = vmatmul.bf16.vlgmr.msra.gmra.mxu0 %v5496_v49  ;;  %v4131_v49 = vld [vmem:[%s5406_s29 + $0x3b8] sm:$0xf0]  ;;  %v4006_v10 = vor.u32 %v4837_v15, %v4003_v63  ;;  %v4851_v61 = vld [vmem:[%s5406_s29 + $0x324] sm:$0xf]  ;;  %v3995_v63 = vld [vmem:[%s5406_s29 + $0x2a8] sm:$0xf0] }
 0x16d   : > { %2742 = vmatmul.bf16.vlgmr.msra.gmra.mxu1 %v5501_v54  ;;  %v3942_v54 = vor.u32 %v4821_v14, %v3939_v60  ;;  %2883 = vmatpush.bf16.msrb.mxu2 %v4070_v5  ;;  %v4062_v25 = vor.u32 %v4851_v61, %v4059_v31  ;;  %v4123_v14 = vld [vmem:[%s5406_s29 + $0x3a8] sm:$0xf0]  ;;  %v3934_v60 = vor.u32 %v4819_v56, %v3931_v11  ;;  %v4835_v15 = vld [vmem:[%s5406_s29 + $0x2a4] sm:$0xf]  ;;  %v4849_v61 = vld [vmem:[%s5406_s29 + $0x314] sm:$0xf] }
 0x16e   : > { %2771 = vmatmul.bf16.vlgmr.msra.gmra.mxu2 %v5503_v55  ;;  %v4134_v55 = vor.u32 %v4869_v62, %v4131_v49  ;;  %2854 = vmatpush.bf16.msrb.mxu1 %v4006_v10  ;;  %v4126_v62 = vor.u32 %v4867_v16, %v4123_v14  ;;  %v3998_v10 = vor.u32 %v4835_v15, %v3995_v63  ;;  %v4051_v31 = vld [vmem:[%s5406_s29 + $0x318] sm:$0xf0]  ;;  %v4817_v56 = vld [vmem:[%s5406_s29 + $0x214] sm:$0xf] }
 0x16f   : > { %2800 = vmatmul.bf16.vlgmr.msra.gmra.mxu3 %v5507_v58  ;;  %2825 = vmatpush.bf16.msrb.mxu0 %v3942_v54  ;;  %v3923_v11 = vld [vmem:[%s5406_s29 + $0x218] sm:$0xf0]  ;;  %v4865_v16 = vld [vmem:[%s5406_s29 + $0x394] sm:$0xf] }
 0x170   : > { %2912 = vmatpush.bf16.msrb.mxu3 %v4134_v55  ;;  %v4833_v15 = vld [vmem:[%s5406_s29 + $0x294] sm:$0xf]  ;;  %v3987_v63 = vld [vmem:[%s5406_s29 + $0x298] sm:$0xf0] }
 0x171   : > { %v6143_v42 = vpop.f32.mrf.mxu2  ;;  %v6147_v44 = vpop.f32.mrf.mxu0  ;;  %2884 = vmatpush.bf16.msrb.mxu2 %v4062_v25  ;;  %v4054_v25 = vor.u32 %v4849_v61, %v4051_v31  ;;  %v4847_v61 = vld [vmem:[%s5406_s29 + $0x304] sm:$0xf]  ;;  %v4043_v31 = vld [vmem:[%s5406_s29 + $0x308] sm:$0xf0] }
 0x172   : > { %v6145_v58 = vpop.f32.mrf.mxu3  ;;  %v6149_v59 = vpop.f32.mrf.mxu1  ;;  %2855 = vmatpush.bf16.msrb.mxu1 %v3998_v10  ;;  %v3990_v10 = vor.u32 %v4833_v15, %v3987_v63 }
 0x173   : > { %2826 = vmatpush.bf16.msrb.mxu0 %v3934_v60 }
 0x174   : > { %2913 = vmatpush.bf16.msrb.mxu3 %v4126_v62 }
 0x175   : > { %2885 = vmatpush.bf16.msrb.mxu2 %v4054_v25 }
 0x176   : > { %2856 = vmatpush.bf16.msrb.mxu1 %v3990_v10 }
 0x179   : > { %v6159_v5 = vpop.f32.mrf.mxu2  ;;  %v6163_v54 = vpop.f32.mrf.mxu0 }
 0x17a   : > { %v6161_v49 = vpop.f32.mrf.mxu3  ;;  %v6165_v55 = vpop.f32.mrf.mxu1 }
 0x17c   : > { %2718 = vmatmul.bf16.gmra.mxu0 %v5548_v45  ;;  %v4115_v45 = vld [vmem:[%s5406_s29 + $0x398] sm:$0xf0] }
 0x17d   : > { %2747 = vmatmul.bf16.gmra.mxu1 %v5553_v51  ;;  %v3926_v51 = vor.u32 %v4817_v56, %v3923_v11  ;;  %v4815_v56 = vld [vmem:[%s5406_s29 + $0x204] sm:$0xf]  ;;  %v4046_v11 = vor.u32 %v4847_v61, %v4043_v31 }
 0x17e   : > { %2776 = vmatmul.bf16.gmra.mxu2 %v5555_v52  ;;  %v4118_v52 = vor.u32 %v4865_v16, %v4115_v45  ;;  %v3915_v16 = vld [vmem:[%s5406_s29 + $0x208] sm:$0xf0]  ;;  %v4863_v45 = vld [vmem:[%s5406_s29 + $0x384] sm:$0xf] }
 0x17f   : > { %2805 = vmatmul.bf16.gmra.mxu3 %v5559_v57  ;;  %2827 = vmatpush.bf16.msrb.mxu0 %v3926_v51  ;;  %v3918_v6 = vor.u32 %v4815_v56, %v3915_v16  ;;  %v4110_v23 = vor.u32 %v4863_v45, %v4107_v53  ;;  %v4831_v51 = vld [vmem:[%s5406_s29 + $0x284] sm:$0xf]  ;;  %v4893_v53 = vld [vmem:[%s5406_s29 + $0x474] sm:$0xf]  ;;  %v4227_v56 = vld [vmem:[%s5406_s29 + $0x478] sm:$0xf0] }
 0x180   : > { %2914 = vmatpush.bf16.msrb.mxu3 %v4118_v52  ;;  %2886 = vmatpush.bf16.msrb.mxu2 %v4046_v11  ;;  %v3979_v52 = vld [vmem:[%s5406_s29 + $0x288] sm:$0xf0]  ;;  %v4941_v11 = vld [vmem:[%s5406_s29 + $0x5f4] sm:$0xf]  ;;  %v4419_v16 = vld [vmem:[%s5406_s29 + $0x5f8] sm:$0xf0] }
 0x181   : > { %v6179_v14 = vpop.f32.mrf.mxu2  ;;  %v6183_v60 = vpop.f32.mrf.mxu0  ;;  %v3982_v10 = vor.u32 %v4831_v51, %v3979_v52  ;;  %v4909_v52 = vld [vmem:[%s5406_s29 + $0x4f4] sm:$0xf] }
 0x182   : > { %v6181_v57 = vpop.f32.mrf.mxu3  ;;  %v6185_v62 = vpop.f32.mrf.mxu1 }
 0x183   : > { %2828 = vmatpush.bf16.msrb.mxu0 %v3918_v6  ;;  %2857 = vmatpush.bf16.msrb.mxu1 %v3982_v10  ;;  %v4355_v6 = vld [vmem:[%s5406_s29 + $0x578] sm:$0xf0] }
 0x184   : > { %2915 = vmatpush.bf16.msrb.mxu3 %v4110_v23  ;;  %v4925_v23 = vld [vmem:[%s5406_s29 + $0x574] sm:$0xf]  ;;  %v4291_v10 = vld [vmem:[%s5406_s29 + $0x4f8] sm:$0xf0] }
 0x185   : > { %v4358_v31 = vor.u32 %v4925_v23, %v4355_v6  ;;  %v4923_v23 = vld [vmem:[%s5406_s29 + $0x564] sm:$0xf]  ;;  %v4294_v24 = vor.u32 %v4909_v52, %v4291_v10  ;;  %v4283_v10 = vld [vmem:[%s5406_s29 + $0x4e8] sm:$0xf0] }
 0x187   : > { %2995 = vmatpush.bf16.msra.mxu2 %v4358_v31  ;;  %v4350_v31 = vor.u32 %v4923_v23, %v4347_v30  ;;  %2966 = vmatpush.bf16.msra.mxu1 %v4294_v24  ;;  %v2483_v30 = vadd.f32 %v6125_v41, %v5989_v9  ;;  %v4907_v24 = vld [vmem:[%s5406_s29 + $0x4e4] sm:$0xf]  ;;  %v4921_v23 = vld [vmem:[%s5406_s29 + $0x554] sm:$0xf]  ;;  %v4403_v9 = vld [vmem:[%s5406_s29 + $0x5d8] sm:$0xf0] }
 0x189   : > { %v6195_v25 = vpop.f32.mrf.mxu2  ;;  %v6201_v63 = vpop.f32.mrf.mxu0 }
 0x18a   : > { %v6199_v15 = vpop.f32.mrf.mxu3  ;;  %v6203_v61 = vpop.f32.mrf.mxu1 }
 0x18b   : > { %2996 = vmatpush.bf16.msra.mxu2 %v4350_v31  ;;  %v4211_v31 = vld [vmem:[%s5406_s29 + $0x458] sm:$0xf0] }
 0x18c   : > { %2723 = vmatmul.bf16.gmra.mxu0 %v5593_v37  ;;  %v4230_v37 = vor.u32 %v4893_v53, %v4227_v56  ;;  %v4891_v53 = vld [vmem:[%s5406_s29 + $0x464] sm:$0xf]  ;;  %v4219_v56 = vld [vmem:[%s5406_s29 + $0x468] sm:$0xf0] }
 0x18d   : > { %2752 = vmatmul.bf16.gmra.mxu1 %v5595_v38  ;;  %v4422_v38 = vor.u32 %v4941_v11, %v4419_v16  ;;  %v4222_v13 = vor.u32 %v4891_v53, %v4219_v56  ;;  %v4339_v56 = vld [vmem:[%s5406_s29 + $0x558] sm:$0xf0] }
 0x18e   : > { %2781 = vmatmul.bf16.gmra.mxu2 %v5597_v39  ;;  %2937 = vmatpush.bf16.msra.mxu0 %v4230_v37  ;;  %v4939_v37 = vld [vmem:[%s5406_s29 + $0x5e4] sm:$0xf] }
 0x18f   : > { %2810 = vmatmul.bf16.gmra.mxu3 %v5599_v40 }
 0x190   : > { %3024 = vmatpush.bf16.msra.mxu3 %v4422_v38  ;;  %v4411_v38 = vld [vmem:[%s5406_s29 + $0x5e8] sm:$0xf0] }
 0x191   : > { %v6215_v45 = vpop.f32.mrf.mxu2  ;;  %v6219_v40 = vpop.f32.mrf.mxu0  ;;  %v4414_v52 = vor.u32 %v4939_v37, %v4411_v38  ;;  %v4937_v38 = vld [vmem:[%s5406_s29 + $0x5d4] sm:$0xf] }
 0x192   : > { %v6217_v39 = vpop.f32.mrf.mxu3  ;;  %v6221_v51 = vpop.f32.mrf.mxu1  ;;  %2938 = vmatpush.bf16.msra.mxu0 %v4222_v13  ;;  %v4286_v13 = vor.u32 %v4907_v24, %v4283_v10  ;;  %v2512_v24 = vadd.f32 %v6127_v32, %v2483_v30 }
 0x194   : > { %3025 = vmatpush.bf16.msra.mxu3 %v4414_v52  ;;  %2967 = vmatpush.bf16.msra.mxu1 %v4286_v13  ;;  %v4406_v52 = vor.u32 %v4937_v38, %v4403_v9  ;;  %v2541_v10 = vadd.f32 %v6143_v42, %v2512_v24  ;;  %v4331_v13 = vld [vmem:[%s5406_s29 + $0x548] sm:$0xf0]  ;;  %v4887_v38 = vld [vmem:[%s5406_s29 + $0x444] sm:$0xf] }
 0x195   : > { %v4203_v9 = vld [vmem:[%s5406_s29 + $0x448] sm:$0xf0] }
 0x196   : > { %v2570_v32 = vadd.f32 %v6145_v58, %v2541_v10  ;;  %v4206_v42 = vor.u32 %v4887_v38, %v4203_v9  ;;  %v4395_v24 = vld [vmem:[%s5406_s29 + $0x5c8] sm:$0xf0]  ;;  %v4903_v10 = vld [vmem:[%s5406_s29 + $0x4c4] sm:$0xf]  ;;  %v4323_v38 = vld [vmem:[%s5406_s29 + $0x538] sm:$0xf0] }
 0x197   : > { %v4885_v9 = vld [vmem:[%s5406_s29 + $0x434] sm:$0xf] }
 0x198   : > { %3026 = vmatpush.bf16.msra.mxu3 %v4406_v52  ;;  %v4935_v52 = vld [vmem:[%s5406_s29 + $0x5c4] sm:$0xf] }
 0x199   : > { %v6226_v6 = vpop.f32.mrf.mxu2  ;;  %v6233_v16 = vpop.f32.mrf.mxu0 }
 0x19a   : > { %v6231_v11 = vpop.f32.mrf.mxu3  ;;  %v6237_v29 = vpop.f32.mrf.mxu1 }
 0x19c   : > { %2728 = vmatmul.bf16.gmra.mxu0 %v5629_v17  ;;  %v4889_v17 = vld [vmem:[%s5406_s29 + $0x454] sm:$0xf] }
 0x19d   : > { %2757 = vmatmul.bf16.gmra.mxu1 %v5631_v18  ;;  %v4214_v37 = vor.u32 %v4889_v17, %v4211_v31  ;;  %v4275_v17 = vld [vmem:[%s5406_s29 + $0x4d8] sm:$0xf0]  ;;  %v4919_v31 = vld [vmem:[%s5406_s29 + $0x544] sm:$0xf] }
 0x19e   : > { %2786 = vmatmul.bf16.gmra.mxu2 %v5633_v19 }
 0x19f   : > { %2815 = vmatmul.bf16.gmra.mxu3 %v5635_v20  ;;  %v4342_v20 = vor.u32 %v4921_v23, %v4339_v56  ;;  %2939 = vmatpush.bf16.msra.mxu0 %v4214_v37  ;;  %v2485_v23 = vadd.f32 %v6147_v44, %v6016_v43  ;;  %v4905_v56 = vld [vmem:[%s5406_s29 + $0x4d4] sm:$0xf]  ;;  %v4334_v37 = vor.u32 %v4919_v31, %v4331_v13 }
 0x1a0   : > { %v4278_v27 = vor.u32 %v4905_v56, %v4275_v17  ;;  %v4398_v44 = vor.u32 %v4935_v52, %v4395_v24  ;;  %v4917_v31 = vld [vmem:[%s5406_s29 + $0x534] sm:$0xf] }
 0x1a1   : > { %v6248_v53 = vpop.f32.mrf.mxu2  ;;  %v6255_v19 = vpop.f32.mrf.mxu0  ;;  %2997 = vmatpush.bf16.msra.mxu2 %v4342_v20  ;;  %v2514_v56 = vadd.f32 %v6149_v59, %v2485_v23  ;;  %v4267_v23 = vld [vmem:[%s5406_s29 + $0x4c8] sm:$0xf0] }
 0x1a2   : > { %v6253_v18 = vpop.f32.mrf.mxu3  ;;  %v6259_v41 = vpop.f32.mrf.mxu1  ;;  %2968 = vmatpush.bf16.msra.mxu1 %v4278_v27  ;;  %3027 = vmatpush.bf16.msra.mxu3 %v4398_v44  ;;  %v2488_v27 = vadd.f32 %v6163_v54, %v6031_v21  ;;  %v4387_v21 = vld [vmem:[%s5406_s29 + $0x5b8] sm:$0xf0]  ;;  %v305_v54 = vld [vmem:[#allocation2 + $0x30] sm:$0xff] }
 0x1a3   : > { %2940 = vmatpush.bf16.msra.mxu0 %v4206_v42  ;;  %v2543_v58 = vadd.f32 %v6159_v5, %v2514_v56  ;;  %v4195_v5 = vld [vmem:[%s5406_s29 + $0x438] sm:$0xf0]  ;;  %v4933_v42 = vld [vmem:[%s5406_s29 + $0x5b4] sm:$0xf] }
 0x1a4   : > { %v4390_v24 = vor.u32 %v4933_v42, %v4387_v21 }
 0x1a5   : > { %2998 = vmatpush.bf16.msra.mxu2 %v4334_v37  ;;  %v4198_v37 = vor.u32 %v4885_v9, %v4195_v5 }
 0x1a6   : > { %3028 = vmatpush.bf16.msra.mxu3 %v4390_v24  ;;  %v4899_v24 = vld [vmem:[%s5406_s29 + $0x4a4] sm:$0xf] }
 0x1a7   : > { %2941 = vmatpush.bf16.msra.mxu0 %v4198_v37 }
 0x1a9   : > { %v6268_v28 = vpop.f32.mrf.mxu2  ;;  %v2598_v20 = vpop.f32.mrf.mxu0 }
 0x1aa   : > { %v6274_v30 = vpop.f32.mrf.mxu3  ;;  %v2627_v43 = vpop.f32.mrf.mxu1  ;;  %v2599_v17 = vadd.f32 %v2598_v20, %v2570_v32 }
 0x1ac   : > { %2829 = vmatmul.bf16.vlgmr.msrb.gmra.mxu0 %v5665_v1  ;;  %v2628_v59 = vadd.f32 %v2627_v43, %v2599_v17  ;;  %v4270_v1 = vor.u32 %v4903_v10, %v4267_v23  ;;  %v2517_v43 = vadd.f32 %v6165_v55, %v2488_v27  ;;  %v4901_v10 = vld [vmem:[%s5406_s29 + $0x4b4] sm:$0xf]  ;;  %v4259_v55 = vld [vmem:[%s5406_s29 + $0x4b8] sm:$0xf0] }
 0x1ad   : > { %2858 = vmatmul.bf16.vlgmr.msrb.gmra.mxu1 %v5667_v2  ;;  %v2572_v2 = vadd.f32 %v6161_v49, %v2543_v58  ;;  %v2490_v58 = vadd.f32 %v6183_v60, %v6060_v7  ;;  %v4262_v23 = vor.u32 %v4901_v10, %v4259_v55  ;;  %v4379_v7 = vld [vmem:[%s5406_s29 + $0x5a8] sm:$0xf0]  ;;  %v307_v60 = vld [vmem:[#allocation2 + $0x58] sm:$0xff]  ;;  %v309_v55 = vld [vmem:[#allocation2 + $0x50] sm:$0xff] }
 0x1ae   : > { %2887 = vmatmul.bf16.vlgmr.msrb.gmra.mxu2 %v5669_v3  ;;  %2969 = vmatpush.bf16.msra.mxu1 %v4270_v1  ;;  %v2546_v56 = vadd.f32 %v6179_v14, %v2517_v43  ;;  %v4883_v1 = vld [vmem:[%s5406_s29 + $0x424] sm:$0xf]  ;;  %v4251_v43 = vld [vmem:[%s5406_s29 + $0x4a8] sm:$0xf0]  ;;  %v4371_v10 = vld [vmem:[%s5406_s29 + $0x598] sm:$0xf0] }
 0x1af   : > { %2916 = vmatmul.bf16.vlgmr.msrb.gmra.mxu3 %v5671_v4  ;;  %v4326_v4 = vor.u32 %v4917_v31, %v4323_v38  ;;  %v4915_v31 = vld [vmem:[%s5406_s29 + $0x524] sm:$0xf]  ;;  %v2519_v42 = vadd.f32 %v6185_v62, %v2490_v58  ;;  %v2493_v62 = vadd.f32 %v6201_v63, %v6073_v12  ;;  %v4179_v12 = vld [vmem:[%s5406_s29 + $0x418] sm:$0xf0]  ;;  %v4929_v63 = vld [vmem:[%s5406_s29 + $0x594] sm:$0xf] }
 0x1b0   : > { %v2575_v38 = vadd.f32 %v6181_v57, %v2546_v56  ;;  %v4307_v56 = vld [vmem:[%s5406_s29 + $0x518] sm:$0xf0] }
 0x1b1   : > { %v2656_v13 = vpop.f32.mrf.mxu2  ;;  %v2600_v20 = vpop.f32.mrf.mxu0  ;;  %2999 = vmatpush.bf16.msra.mxu2 %v4326_v4  ;;  %v2548_v57 = vadd.f32 %v6195_v25, %v2519_v42  ;;  %v4254_v25 = vor.u32 %v4899_v24, %v4251_v43  ;;  %v4927_v42 = vld [vmem:[%s5406_s29 + $0x584] sm:$0xf]  ;;  %v4235_v43 = vld [vmem:[%s5406_s29 + $0x488] sm:$0xf0] }
 0x1b2   : > { %v2657_v32 = vadd.f32 %v2656_v13, %v2628_v59  ;;  %v2685_v3 = vpop.f32.mrf.mxu3  ;;  %v2629_v52 = vpop.f32.mrf.mxu1  ;;  %v2601_v49 = vadd.f32 %v2600_v20, %v2572_v2  ;;  %v4315_v13 = vld [vmem:[%s5406_s29 + $0x528] sm:$0xf0]  ;;  %2970 = vmatpush.bf16.msra.mxu1 %v4262_v23 }
 0x1b3   : > { %v4318_v2 = vor.u32 %v4915_v31, %v4315_v13  ;;  %v4374_v31 = vor.u32 %v4929_v63, %v4371_v10  ;;  %v2522_v13 = vadd.f32 %v6203_v61, %v2493_v62  ;;  %v311_v62 = vld [vmem:[#allocation2 + $0x8] sm:$0xff] }
 0x1b4   : > { %v2686_v44 = vadd.f32 %v2685_v3, %v2657_v32  ;;  %v2630_v59 = vadd.f32 %v2629_v52, %v2601_v49  ;;  %v4187_v32 = vld [vmem:[%s5406_s29 + $0x428] sm:$0xf0]  ;;  %v4931_v3 = vld [vmem:[%s5406_s29 + $0x5a4] sm:$0xf]  ;;  %v4913_v49 = vld [vmem:[%s5406_s29 + $0x514] sm:$0xf] }
 0x1b5   : > { %v4190_v4 = vor.u32 %v4883_v1, %v4187_v32  ;;  %v4382_v37 = vor.u32 %v4931_v3, %v4379_v7  ;;  %3000 = vmatpush.bf16.msra.mxu2 %v4318_v2  ;;  %v2495_v32 = vadd.f32 %v6219_v40, %v6100_v0  ;;  %v4911_v3 = vld [vmem:[%s5406_s29 + $0x504] sm:$0xf]  ;;  %v4299_v7 = vld [vmem:[%s5406_s29 + $0x508] sm:$0xf0] }
 0x1b6   : > { %v3169_v17 = vadd.f32 %v2686_v44, %v305_v54  ;;  %2971 = vmatpush.bf16.msra.mxu1 %v4254_v25  ;;  %v4363_v0 = vld [vmem:[%s5406_s29 + $0x588] sm:$0xf0]  ;;  %v4895_v40 = vld [vmem:[%s5406_s29 + $0x484] sm:$0xf] }
 0x1b7   : > { %3029 = vmatpush.bf16.msra.mxu3 %v4382_v37  ;;  %2942 = vmatpush.bf16.msra.mxu0 %v4190_v4  ;;  %v4879_v4 = vld [vmem:[%s5406_s29 + $0x404] sm:$0xf]  ;;  %v4171_v37 = vld [vmem:[%s5406_s29 + $0x408] sm:$0xf0]  ;;  %v4366_v24 = vor.u32 %v4927_v42, %v4363_v0 }
 0x1b8   : > { %3185 = vst [vmem:[#allocation2 + $0x30] sm:$0xff] %v3169_v17  ;;  %v4971_v0 = vld [vmem:[%s5406_s29 + $0x6e4] sm:$0xf] }
 0x1b9   : > { %v2658_v27 = vpop.f32.mrf.mxu2  ;;  %v2603_v5 = vpop.f32.mrf.mxu0 }
 0x1ba   : > { %v2659_v9 = vadd.f32 %v2658_v27, %v2630_v59  ;;  %v2687_v14 = vpop.f32.mrf.mxu3  ;;  %v2632_v20 = vpop.f32.mrf.mxu1  ;;  %v2604_v54 = vadd.f32 %v2603_v5, %v2575_v38  ;;  %v4310_v59 = vor.u32 %v4913_v49, %v4307_v56  ;;  %v4897_v38 = vld [vmem:[%s5406_s29 + $0x494] sm:$0xf]  ;;  %v4238_v56 = vor.u32 %v4895_v40, %v4235_v43  ;;  %v4539_v40 = vld [vmem:[%s5406_s29 + $0x6e8] sm:$0xf0] }
 0x1bb   : > { %3030 = vmatpush.bf16.msra.mxu3 %v4374_v31  ;;  %v6658_v43 = vld [vmem:[#allocation16_spill] sm:$0xff] }
 0x1bc   : > { %v2688_v21 = vadd.f32 %v2687_v14, %v2659_v9  ;;  %2834 = vmatmul.bf16.gmra.mxu0 %v5701_v46  ;;  %v2633_v46 = vadd.f32 %v2632_v20, %v2604_v54  ;;  %3001 = vmatpush.bf16.msra.mxu2 %v4310_v59  ;;  %v4243_v9 = vld [vmem:[%s5406_s29 + $0x498] sm:$0xf0]  ;;  %v2551_v14 = vadd.f32 %v6215_v45, %v2522_v13  ;;  %v4957_v59 = vld [vmem:[%s5406_s29 + $0x674] sm:$0xf] }
 0x1bd   : > { %2863 = vmatmul.bf16.gmra.mxu1 %v5703_v47  ;;  %v4881_v47 = vld [vmem:[%s5406_s29 + $0x414] sm:$0xf]  ;;  %v4246_v2 = vor.u32 %v4897_v38, %v4243_v9  ;;  %v4302_v20 = vor.u32 %v4911_v3, %v4299_v7  ;;  %v4603_v9 = vld [vmem:[%s5406_s29 + $0x768] sm:$0xf0]  ;;  %v5003_v7 = vld [vmem:[%s5406_s29 + $0x7e4] sm:$0xf] }
 0x1be   : > { %v3171_v52 = vadd.f32 %v2688_v21, %v307_v60  ;;  %2892 = vmatmul.bf16.gmra.mxu2 %v5705_v48  ;;  %v2577_v48 = vadd.f32 %v6199_v15, %v2548_v57  ;;  %v4182_v23 = vor.u32 %v4881_v47, %v4179_v12  ;;  %v2580_v45 = vadd.f32 %v6217_v39, %v2551_v14  ;;  %v5005_v12 = vld [vmem:[%s5406_s29 + $0x7f4] sm:$0xf]  ;;  %v4955_v14 = vld [vmem:[%s5406_s29 + $0x664] sm:$0xf] }
 0x1bf   : > { %2921 = vmatmul.bf16.gmra.mxu3 %v5707_v50  ;;  %2972 = vmatpush.bf16.msra.mxu1 %v4246_v2 }
 0x1c0   : > { %3187 = vst [vmem:[#allocation2 + $0x58] sm:$0xff] %v3171_v52  ;;  %2943 = vmatpush.bf16.msra.mxu0 %v4182_v23  ;;  %v4174_v52 = vor.u32 %v4879_v4, %v4171_v37  ;;  %3002 = vmatpush.bf16.msra.mxu2 %v4302_v20  ;;  %v2500_v20 = vadd.f32 %v6255_v19, %v6129_v8 }
 0x1c1   : > { %v2661_v44 = vpop.f32.mrf.mxu2  ;;  %v2605_v58 = vpop.f32.mrf.mxu0  ;;  %3031 = vmatpush.bf16.msra.mxu3 %v4366_v24  ;;  %v6657_v24 = vld [vmem:[#allocation15_spill] sm:$0xff] }
 0x1c2   : > { %v2662_v17 = vadd.f32 %v2661_v44, %v2633_v46  ;;  %v2690_v50 = vpop.f32.mrf.mxu3  ;;  %v2634_v27 = vpop.f32.mrf.mxu1  ;;  %v2606_v15 = vadd.f32 %v2605_v58, %v2577_v48  ;;  %v2524_v44 = vadd.f32 %v6221_v51, %v2495_v32  ;;  %v2498_v51 = vadd.f32 %v6233_v16, %v6115_v22  ;;  %v4675_v22 = vld [vmem:[%s5406_s29 + $0x7f8] sm:$0xf0]  ;;  %v313_v16 = vld [vmem:[#allocation2 + $0x40] sm:$0xff] }
 0x1c3   : > { %2973 = vmatpush.bf16.msra.mxu1 %v4238_v56  ;;  %v2529_v8 = vadd.f32 %v6259_v41, %v2500_v20  ;;  %v4985_v41 = vld [vmem:[%s5406_s29 + $0x754] sm:$0xf] }
 0x1c4   : > { %v2691_v1 = vadd.f32 %v2690_v50, %v2662_v17  ;;  %v2635_v61 = vadd.f32 %v2634_v27, %v2606_v15  ;;  %2944 = vmatpush.bf16.msra.mxu0 %v4174_v52  ;;  %v2553_v39 = vadd.f32 %v6226_v6, %v2524_v44  ;;  %v4611_v17 = vld [vmem:[%s5406_s29 + $0x778] sm:$0xf0]  ;;  %v4678_v27 = vor.u32 %v5005_v12, %v4675_v22  ;;  %v4987_v15 = vld [vmem:[%s5406_s29 + $0x764] sm:$0xf]  ;;  %v6659_v44 = vld [vmem:[#allocation17_spill] sm:$0xff] }
 0x1c5   : > { %v4483_v6 = vld [vmem:[%s5406_s29 + $0x678] sm:$0xf0]  ;;  %v2527_v23 = vadd.f32 %v6237_v29, %v2498_v51  ;;  %v4667_v29 = vld [vmem:[%s5406_s29 + $0x7e8] sm:$0xf0] }
 0x1c6   : > { %v3173_v5 = vadd.f32 %v2691_v1, %v309_v55  ;;  %v4486_v10 = vor.u32 %v4957_v59, %v4483_v6  ;;  %v4547_v1 = vld [vmem:[%s5406_s29 + $0x6f8] sm:$0xf0]  ;;  %3140 = vmatpush.bf16.msrb.mxu3 %v4678_v27  ;;  %v317_v6 = vld [vmem:[#allocation2 + $0x60] sm:$0xff]  ;;  %v4587_v22 = vld [vmem:[%s5406_s29 + $0x748] sm:$0xf0] }
 0x1c7   : > { %v2556_v2 = vadd.f32 %v6248_v53, %v2527_v23 }
 0x1c8   : > { %3189 = vst [vmem:[#allocation2 + $0x50] sm:$0xff] %v3173_v5  ;;  %3053 = vmatpush.bf16.msrb.mxu0 %v4486_v10  ;;  %v4475_v5 = vld [vmem:[%s5406_s29 + $0x668] sm:$0xf0]  ;;  %v4983_v10 = vld [vmem:[%s5406_s29 + $0x744] sm:$0xf] }
 0x1c9   : > { %v2663_v60 = vpop.f32.mrf.mxu2  ;;  %v2608_v57 = vpop.f32.mrf.mxu0  ;;  %v4478_v3 = vor.u32 %v4955_v14, %v4475_v5  ;;  %v2585_v53 = vadd.f32 %v6253_v18, %v2556_v2  ;;  %v2558_v18 = vadd.f32 %v6268_v28, %v2529_v8  ;;  %v4590_v23 = vor.u32 %v4983_v10, %v4587_v22  ;;  %v319_v2 = vld [vmem:[#allocation2 + $0x78] sm:$0xff]  ;;  %v4507_v10 = vld [vmem:[%s5406_s29 + $0x6a8] sm:$0xf0] }
 0x1ca   : > { %v2664_v21 = vadd.f32 %v2663_v60, %v2635_v61  ;;  %v2692_v54 = vpop.f32.mrf.mxu3  ;;  %v2637_v46 = vpop.f32.mrf.mxu1  ;;  %v2609_v49 = vadd.f32 %v2608_v57, %v2580_v45  ;;  %v4606_v61 = vor.u32 %v4987_v15, %v4603_v9  ;;  %v4670_v60 = vor.u32 %v5003_v7, %v4667_v29  ;;  %v4967_v7 = vld [vmem:[%s5406_s29 + $0x6c4] sm:$0xf]  ;;  %v4523_v29 = vld [vmem:[%s5406_s29 + $0x6c8] sm:$0xf0]  ;;  %v4451_v8 = vld [vmem:[%s5406_s29 + $0x638] sm:$0xf0] }
 0x1cb   : > { %v4526_v20 = vor.u32 %v4967_v7, %v4523_v29 }
 0x1cc   : > { %v2693_v25 = vadd.f32 %v2692_v54, %v2664_v21  ;;  %2839 = vmatmul.bf16.gmra.mxu0 %v5737_v33  ;;  %v2638_v48 = vadd.f32 %v2637_v46, %v2609_v49  ;;  %v4989_v33 = vld [vmem:[%s5406_s29 + $0x774] sm:$0xf]  ;;  %3141 = vmatpush.bf16.msrb.mxu3 %v4670_v60  ;;  %v6660_v60 = vld [vmem:[#allocation18_spill] sm:$0xff] }
 0x1cd   : > { %2868 = vmatmul.bf16.gmra.mxu1 %v5739_v34  ;;  %v4614_v58 = vor.u32 %v4989_v33, %v4611_v17  ;;  %v2582_v34 = vadd.f32 %v6231_v11, %v2553_v39  ;;  %v4973_v11 = vld [vmem:[%s5406_s29 + $0x6f4] sm:$0xf]  ;;  %3054 = vmatpush.bf16.msrb.mxu0 %v4478_v3  ;;  %v2587_v33 = vadd.f32 %v6274_v30, %v2558_v18 }
 0x1ce   : > { %v3175_v47 = vadd.f32 %v2693_v25, %v311_v62  ;;  %2897 = vmatmul.bf16.gmra.mxu2 %v5741_v35  ;;  %v4550_v38 = vor.u32 %v4973_v11, %v4547_v1  ;;  %v315_v54 = vld [vmem:[#allocation2 + $0x10] sm:$0xff]  ;;  %v4542_v62 = vor.u32 %v4971_v0, %v4539_v40  ;;  %v4595_v25 = vld [vmem:[%s5406_s29 + $0x758] sm:$0xf0]  ;;  %v4651_v11 = vld [vmem:[%s5406_s29 + $0x7c8] sm:$0xf0] }
 0x1cf   : > { %2926 = vmatmul.bf16.gmra.mxu3 %v5743_v36  ;;  %3111 = vmatpush.bf16.msrb.mxu2 %v4614_v58  ;;  %v4953_v49 = vld [vmem:[%s5406_s29 + $0x654] sm:$0xf]  ;;  %v4598_v39 = vor.u32 %v4985_v41, %v4595_v25  ;;  %v4643_v40 = vld [vmem:[%s5406_s29 + $0x7b8] sm:$0xf0] }
 0x1d0   : > { %3191 = vst [vmem:[#allocation2 + $0x8] sm:$0xff] %v3175_v47  ;;  %3082 = vmatpush.bf16.msrb.mxu1 %v4550_v38  ;;  %v4467_v47 = vld [vmem:[%s5406_s29 + $0x658] sm:$0xf0]  ;;  %v4965_v25 = vld [vmem:[%s5406_s29 + $0x6b4] sm:$0xf] }
 0x1d1   : > { %v2666_v50 = vpop.f32.mrf.mxu2  ;;  %v2610_v63 = vpop.f32.mrf.mxu0  ;;  %v4470_v28 = vor.u32 %v4953_v49, %v4467_v47  ;;  %v4515_v49 = vld [vmem:[%s5406_s29 + $0x6b8] sm:$0xf0]  ;;  %v4571_v47 = vld [vmem:[%s5406_s29 + $0x728] sm:$0xf0] }
 0x1d2   : > { %v2667_v35 = vadd.f32 %v2666_v50, %v2638_v48  ;;  %v2695_v36 = vpop.f32.mrf.mxu3  ;;  %v2639_v55 = vpop.f32.mrf.mxu1  ;;  %v2611_v13 = vadd.f32 %v2610_v63, %v2582_v34  ;;  %v4659_v48 = vld [vmem:[%s5406_s29 + $0x7d8] sm:$0xf0] }
 0x1d3   : > { %3112 = vmatpush.bf16.msrb.mxu2 %v4606_v61  ;;  %3055 = vmatpush.bf16.msrb.mxu0 %v4470_v28  ;;  %v4531_v63 = vld [vmem:[%s5406_s29 + $0x6d8] sm:$0xf0] }
 0x1d4   : > { %v2696_v31 = vadd.f32 %v2695_v36, %v2667_v35  ;;  %v2640_v4 = vadd.f32 %v2639_v55, %v2611_v13  ;;  %3083 = vmatpush.bf16.msrb.mxu1 %v4542_v62  ;;  %v4969_v36 = vld [vmem:[%s5406_s29 + $0x6d4] sm:$0xf]  ;;  %v4459_v55 = vld [vmem:[%s5406_s29 + $0x648] sm:$0xf0]  ;;  %v4999_v13 = vld [vmem:[%s5406_s29 + $0x7c4] sm:$0xf] }
 0x1d5   : > { %v4534_v30 = vor.u32 %v4969_v36, %v4531_v63  ;;  %v4654_v1 = vor.u32 %v4999_v13, %v4651_v11  ;;  %v4963_v63 = vld [vmem:[%s5406_s29 + $0x6a4] sm:$0xf]  ;;  %v4945_v13 = vld [vmem:[%s5406_s29 + $0x614] sm:$0xf] }
 0x1d6   : > { %v3177_v32 = vadd.f32 %v2696_v31, %v313_v16  ;;  %v4951_v16 = vld [vmem:[%s5406_s29 + $0x644] sm:$0xf]  ;;  %v4510_v22 = vor.u32 %v4963_v63, %v4507_v10  ;;  %v6672_v10 = vld [vmem:[#allocation30_spill] sm:$0xff] }
 0x1d7   : > { %3113 = vmatpush.bf16.msrb.mxu2 %v4598_v39  ;;  %v4462_v31 = vor.u32 %v4951_v16, %v4459_v55  ;;  %v4518_v39 = vor.u32 %v4965_v25, %v4515_v49  ;;  %v6665_v16 = vld [vmem:[#allocation23_spill] sm:$0xff]  ;;  %v6666_v55 = vld [vmem:[#allocation24_spill] sm:$0xff]  ;;  %v6668_v49 = vld [vmem:[#allocation26_spill] sm:$0xff] }
 0x1d8   : > { %3193 = vst [vmem:[#allocation2 + $0x40] sm:$0xff] %v3177_v32  ;;  %3084 = vmatpush.bf16.msrb.mxu1 %v4534_v30  ;;  %v6664_v30 = vld [vmem:[#allocation22_spill] sm:$0xff] }
 0x1d9   : > { %v2668_v37 = vpop.f32.mrf.mxu2  ;;  %v2613_v21 = vpop.f32.mrf.mxu0  ;;  %3056 = vmatpush.bf16.msrb.mxu0 %v4462_v31  ;;  %v4563_v31 = vld [vmem:[%s5406_s29 + $0x718] sm:$0xf0] }
 0x1da   : > { %v2669_v42 = vadd.f32 %v2668_v37, %v2640_v4  ;;  %v2697_v45 = vpop.f32.mrf.mxu3  ;;  %v2642_v57 = vpop.f32.mrf.mxu1  ;;  %v2614_v52 = vadd.f32 %v2613_v21, %v2585_v53  ;;  %v6661_v37 = vld [vmem:[#allocation19_spill] sm:$0xff]  ;;  %v6662_v53 = vld [vmem:[#allocation20_spill] sm:$0xff]  ;;  %v4579_v21 = vld [vmem:[%s5406_s29 + $0x738] sm:$0xf0] }
 0x1db   : > { %3114 = vmatpush.bf16.msrb.mxu2 %v4590_v23  ;;  %v4977_v23 = vld [vmem:[%s5406_s29 + $0x714] sm:$0xf] }
 0x1dc   : > { %v2698_v19 = vadd.f32 %v2697_v45, %v2669_v42  ;;  %2844 = vmatmul.bf16.gmra.mxu0 %v5771_v26  ;;  %v2643_v56 = vadd.f32 %v2642_v57, %v2614_v52  ;;  %v5001_v26 = vld [vmem:[%s5406_s29 + $0x7d4] sm:$0xf]  ;;  %3085 = vmatpush.bf16.msrb.mxu1 %v4526_v20  ;;  %v4566_v11 = vor.u32 %v4977_v23, %v4563_v31  ;;  %v4499_v20 = vld [vmem:[%s5406_s29 + $0x698] sm:$0xf0] }
 0x1dd   : > { %2873 = vmatmul.bf16.gmra.mxu1 %v6657_v24  ;;  %v4662_v59 = vor.u32 %v5001_v26, %v4659_v48  ;;  %v6663_v42 = vld [vmem:[#allocation21_spill] sm:$0xff]  ;;  %v4947_v26 = vld [vmem:[%s5406_s29 + $0x624] sm:$0xf] }
 0x1de   : > { %v3179_v46 = vadd.f32 %v2698_v19, %v315_v54  ;;  %2902 = vmatmul.bf16.gmra.mxu2 %v6658_v43  ;;  %v4981_v45 = vld [vmem:[%s5406_s29 + $0x734] sm:$0xf] }
 0x1df   : > { %2931 = vmatmul.bf16.gmra.mxu3 %v6659_v44  ;;  %v4949_v54 = vld [vmem:[%s5406_s29 + $0x634] sm:$0xf]  ;;  %v4582_v57 = vor.u32 %v4981_v45, %v4579_v21  ;;  %v4427_v45 = vld [vmem:[%s5406_s29 + $0x608] sm:$0xf0] }
 0x1e0   : > { %3195 = vst [vmem:[#allocation2 + $0x10] sm:$0xff] %v3179_v46  ;;  %3142 = vmatpush.bf16.msrb.mxu3 %v4662_v59  ;;  %v4997_v19 = vld [vmem:[%s5406_s29 + $0x7b4] sm:$0xf]  ;;  %v4454_v0 = vor.u32 %v4949_v54, %v4451_v8  ;;  %3086 = vmatpush.bf16.msrb.mxu1 %v4518_v39  ;;  %v4619_v8 = vld [vmem:[%s5406_s29 + $0x788] sm:$0xf0] }
 0x1e1   : > { %v2671_v51 = vpop.f32.mrf.mxu2  ;;  %v2615_v58 = vpop.f32.mrf.mxu0  ;;  %3115 = vmatpush.bf16.msrb.mxu2 %v4582_v57  ;;  %v4646_v24 = vor.u32 %v4997_v19, %v4643_v40  ;;  %v4991_v57 = vld [vmem:[%s5406_s29 + $0x784] sm:$0xf]  ;;  %v4491_v40 = vld [vmem:[%s5406_s29 + $0x688] sm:$0xf0] }
 0x1e2   : > { %v2672_v17 = vadd.f32 %v2671_v51, %v2643_v56  ;;  %v2700_v50 = vpop.f32.mrf.mxu3  ;;  %v2644_v12 = vpop.f32.mrf.mxu1  ;;  %v2616_v35 = vadd.f32 %v2615_v58, %v2587_v33  ;;  %3057 = vmatpush.bf16.msrb.mxu0 %v4454_v0  ;;  %v4979_v56 = vld [vmem:[%s5406_s29 + $0x724] sm:$0xf]  ;;  %v4443_v51 = vld [vmem:[%s5406_s29 + $0x628] sm:$0xf0]  ;;  %v4622_v19 = vor.u32 %v4991_v57, %v4619_v8 }
 0x1e3   : > { %v4574_v28 = vor.u32 %v4979_v56, %v4571_v47  ;;  %v4446_v48 = vor.u32 %v4947_v26, %v4443_v51  ;;  %v4995_v33 = vld [vmem:[%s5406_s29 + $0x7a4] sm:$0xf]  ;;  %v6670_v39 = vld [vmem:[#allocation28_spill] sm:$0xff]  ;;  %v6671_v47 = vld [vmem:[#allocation29_spill] sm:$0xff] }
 0x1e4   : > { %v2701_v34 = vadd.f32 %v2700_v50, %v2672_v17  ;;  %v2645_v15 = vadd.f32 %v2644_v12, %v2616_v35  ;;  %3143 = vmatpush.bf16.msrb.mxu3 %v4654_v1  ;;  %v4635_v17 = vld [vmem:[%s5406_s29 + $0x7a8] sm:$0xf0]  ;;  %3087 = vmatpush.bf16.msrb.mxu1 %v4510_v22  ;;  %v4435_v1 = vld [vmem:[%s5406_s29 + $0x618] sm:$0xf0]  ;;  %v4959_v0 = vld [vmem:[%s5406_s29 + $0x684] sm:$0xf] }
 0x1e5   : > { %v4638_v50 = vor.u32 %v4995_v33, %v4635_v17  ;;  %3116 = vmatpush.bf16.msrb.mxu2 %v4574_v28  ;;  %v6669_v56 = vld [vmem:[#allocation27_spill] sm:$0xff]  ;;  %v6674_v22 = vld [vmem:[#allocation32_spill] sm:$0xff] }
 0x1e6   : > { %v3181_v27 = vadd.f32 %v2701_v34, %v317_v6  ;;  %3058 = vmatpush.bf16.msrb.mxu0 %v4446_v48 }
 0x1e8   : > { %3197 = vst [vmem:[#allocation2 + $0x60] sm:$0xff] %v3181_v27  ;;  %3144 = vmatpush.bf16.msrb.mxu3 %v4646_v24  ;;  %v6667_v27 = vld [vmem:[#allocation25_spill] sm:$0xff]  ;;  %v4494_v24 = vor.u32 %v4959_v0, %v4491_v40 }
 0x1e9   : > { %v2673_v38 = vpop.f32.mrf.mxu2  ;;  %v2714_v5 = vpop.f32.mrf.mxu0  ;;  %3117 = vmatpush.bf16.msrb.mxu2 %v4566_v11 }
 0x1ea   : > { %v2674_v9 = vadd.f32 %v2673_v38, %v2645_v15  ;;  %v2702_v14 = vpop.f32.mrf.mxu3  ;;  %v2743_v32 = vpop.f32.mrf.mxu1  ;;  %v4993_v15 = vld [vmem:[%s5406_s29 + $0x794] sm:$0xf]  ;;  %v4627_v38 = vld [vmem:[%s5406_s29 + $0x798] sm:$0xf0] }
 0x1eb   : > { %v2744_v3 = vadd.f32 %v2743_v32, %v2714_v5  ;;  %v4630_v5 = vor.u32 %v4993_v15, %v4627_v38 }
 0x1ec   : > { %v2703_v61 = vadd.f32 %v2702_v14, %v2674_v9  ;;  %2945 = vmatmul.bf16.vlgmr.msra.gmra.mxu0 %v6660_v60  ;;  %3145 = vmatpush.bf16.msrb.mxu3 %v4638_v50  ;;  %v4438_v14 = vor.u32 %v4945_v13, %v4435_v1  ;;  %v4961_v60 = vld [vmem:[%s5406_s29 + $0x694] sm:$0xf] }
 0x1ed   : > { %2974 = vmatmul.bf16.vlgmr.msra.gmra.mxu1 %v6661_v37  ;;  %v4502_v37 = vor.u32 %v4961_v60, %v4499_v20  ;;  %v6678_v60 = vld [vmem:[#allocation36_spill] sm:$0xff]  ;;  %v6679_v20 = vld [vmem:[#allocation37_spill] sm:$0xff] }
 0x1ee   : > { %v3183_v4 = vadd.f32 %v2703_v61, %v319_v2  ;;  %3003 = vmatmul.bf16.vlgmr.msra.gmra.mxu2 %v6662_v53  ;;  %3059 = vmatpush.bf16.msrb.mxu0 %v4438_v14  ;;  %v4555_v53 = vld [vmem:[%s5406_s29 + $0x708] sm:$0xf0] }
 0x1ef   : > { %3032 = vmatmul.bf16.vlgmr.msra.gmra.mxu3 %v6663_v42  ;;  %v4943_v42 = vld [vmem:[%s5406_s29 + $0x604] sm:$0xf]  ;;  %3088 = vmatpush.bf16.msrb.mxu1 %v4502_v37 }
 0x1f0   : > { %3199 = vst [vmem:[#allocation2 + $0x78] sm:$0xff] %v3183_v4  ;;  %3146 = vmatpush.bf16.msrb.mxu3 %v4630_v5  ;;  %v4975_v4 = vld [vmem:[%s5406_s29 + $0x704] sm:$0xf]  ;;  %v4430_v54 = vor.u32 %v4943_v42, %v4427_v45 }
 0x1f1   : > { %v2772_v52 = vpop.f32.mrf.mxu2  ;;  %v2716_v46 = vpop.f32.mrf.mxu0  ;;  %v4558_v21 = vor.u32 %v4975_v4, %v4555_v53 }
 0x1f2   : > { %v2773_v62 = vadd.f32 %v2772_v52, %v2744_v3  ;;  %v2801_v18 = vpop.f32.mrf.mxu3  ;;  %v2745_v43 = vpop.f32.mrf.mxu1  ;;  %3060 = vmatpush.bf16.msrb.mxu0 %v4430_v54 }
 0x1f3   : > { %v2746_v41 = vadd.f32 %v2745_v43, %v2716_v46  ;;  %3118 = vmatpush.bf16.msrb.mxu2 %v4558_v21  ;;  %3089 = vmatpush.bf16.msrb.mxu1 %v4494_v24  ;;  %v6681_v24 = vld [vmem:[#allocation39_spill] sm:$0xff] }
 0x1f4   : > { %v6403_v44 = vadd.f32 %v2801_v18, %v2773_v62  ;;  %3147 = vmatpush.bf16.msrb.mxu3 %v4622_v19 }
 0x1f9   : > { %v2774_v58 = vpop.f32.mrf.mxu2  ;;  %v2719_v12 = vpop.f32.mrf.mxu0 }
 0x1fa   : > { %v2775_v59 = vadd.f32 %v2774_v58, %v2746_v41  ;;  %v2803_v6 = vpop.f32.mrf.mxu3  ;;  %v2748_v34 = vpop.f32.mrf.mxu1 }
 0x1fb   : > { %v2749_v36 = vadd.f32 %v2748_v34, %v2719_v12 }
 0x1fc   : > { %v6413_v35 = vadd.f32 %v2803_v6, %v2775_v59  ;;  %2950 = vmatmul.bf16.gmra.mxu0 %v6664_v30  ;;  %v6673_v30 = vld [vmem:[#allocation31_spill] sm:$0xff] }
 0x1fd   : > { %2979 = vmatmul.bf16.gmra.mxu1 %v6665_v16  ;;  %v6675_v16 = vld [vmem:[#allocation33_spill] sm:$0xff] }
 0x1fe   : > { %3008 = vmatmul.bf16.gmra.mxu2 %v6666_v55 }
 0x1ff   : > { %3037 = vmatmul.bf16.gmra.mxu3 %v6667_v27 }
 0x201   : > { %v2777_v9 = vpop.f32.mrf.mxu2  ;;  %v2721_v61 = vpop.f32.mrf.mxu0 }
 0x202   : > { %v2778_v2 = vadd.f32 %v2777_v9, %v2749_v36  ;;  %v2806_v32 = vpop.f32.mrf.mxu3  ;;  %v2750_v3 = vpop.f32.mrf.mxu1 }
 0x203   : > { %v2751_v29 = vadd.f32 %v2750_v3, %v2721_v61  ;;  %v6676_v3 = vld [vmem:[#allocation34_spill] sm:$0xff] }
 0x204   : > { %v6427_v7 = vadd.f32 %v2806_v32, %v2778_v2 }
 0x209   : > { %v2779_v52 = vpop.f32.mrf.mxu2  ;;  %v2724_v46 = vpop.f32.mrf.mxu0 }
 0x20a   : > { %v2780_v62 = vadd.f32 %v2779_v52, %v2751_v29  ;;  %v2808_v18 = vpop.f32.mrf.mxu3  ;;  %v2753_v43 = vpop.f32.mrf.mxu1  ;;  %v6677_v29 = vld [vmem:[#allocation35_spill] sm:$0xff] }
 0x20b   : > { %v2754_v25 = vadd.f32 %v2753_v43, %v2724_v46  ;;  %v6680_v46 = vld [vmem:[#allocation38_spill] sm:$0xff]  ;;  %v6682_v43 = vld [vmem:[#allocation40_spill] sm:$0xff] }
 0x20c   : > { %v6439_v41 = vadd.f32 %v2808_v18, %v2780_v62  ;;  %2955 = vmatmul.bf16.gmra.mxu0 %v6668_v49 }
 0x20d   : > { %2984 = vmatmul.bf16.gmra.mxu1 %v6669_v56 }
 0x20e   : > { %3013 = vmatmul.bf16.gmra.mxu2 %v6670_v39 }
 0x20f   : > { %3042 = vmatmul.bf16.gmra.mxu3 %v6671_v47 }
 0x211   : > { %v2782_v26 = vpop.f32.mrf.mxu2  ;;  %v2726_v48 = vpop.f32.mrf.mxu0 }
 0x212   : > { %v2783_v51 = vadd.f32 %v2782_v26, %v2754_v25  ;;  %v2811_v28 = vpop.f32.mrf.mxu3  ;;  %v2755_v33 = vpop.f32.mrf.mxu1 }
 0x213   : > { %v2756_v50 = vadd.f32 %v2755_v33, %v2726_v48 }
 0x214   : > { %v6445_v17 = vadd.f32 %v2811_v28, %v2783_v51 }
 0x219   : > { %v2784_v58 = vpop.f32.mrf.mxu2  ;;  %v2729_v12 = vpop.f32.mrf.mxu0 }
 0x21a   : > { %v2785_v59 = vadd.f32 %v2784_v58, %v2756_v50  ;;  %v2813_v6 = vpop.f32.mrf.mxu3  ;;  %v2758_v34 = vpop.f32.mrf.mxu1 }
 0x21b   : > { %v2759_v63 = vadd.f32 %v2758_v34, %v2729_v12  ;;  %v6684_v34 = vld [vmem:[#allocation42_spill] sm:$0xff] }
 0x21c   : > { %v6447_v36 = vadd.f32 %v2813_v6, %v2785_v59  ;;  %2960 = vmatmul.bf16.gmra.mxu0 %v6672_v10  ;;  %v6686_v10 = vld [vmem:[#allocation44_spill] sm:$0xff] }
 0x21d   : > { %2989 = vmatmul.bf16.gmra.mxu1 %v6673_v30 }
 0x21e   : > { %3018 = vmatmul.bf16.gmra.mxu2 %v6674_v22 }
 0x21f   : > { %3047 = vmatmul.bf16.gmra.mxu3 %v6675_v16 }
 0x221   : > { %v2787_v55 = vpop.f32.mrf.mxu2  ;;  %v2731_v31 = vpop.f32.mrf.mxu0 }
 0x222   : > { %v2788_v27 = vadd.f32 %v2787_v55, %v2759_v63  ;;  %v2816_v23 = vpop.f32.mrf.mxu3  ;;  %v2760_v13 = vpop.f32.mrf.mxu1  ;;  %v6685_v63 = vld [vmem:[#allocation43_spill] sm:$0xff] }
 0x223   : > { %v2761_v1 = vadd.f32 %v2760_v13, %v2731_v31 }
 0x224   : > { %v6453_v11 = vadd.f32 %v2816_v23, %v2788_v27 }
 0x229   : > { %v2789_v15 = vpop.f32.mrf.mxu2  ;;  %v2830_v14 = vpop.f32.mrf.mxu0 }
 0x22a   : > { %v2790_v38 = vadd.f32 %v2789_v15, %v2761_v1  ;;  %v2818_v9 = vpop.f32.mrf.mxu3  ;;  %v2831_v5 = vadd.f32 %v2830_v14, %v6403_v44  ;;  %v2859_v2 = vpop.f32.mrf.mxu1 }
 0x22c   : > { %v6456_v32 = vadd.f32 %v2818_v9, %v2790_v38  ;;  %v2860_v61 = vadd.f32 %v2859_v2, %v2831_v5  ;;  %3061 = vmatmul.bf16.vlgmr.msrb.gmra.mxu0 %v6676_v3  ;;  %v6689_v3 = vld [vmem:[#allocation47_spill] sm:$0xff] }
 0x22d   : > { %3090 = vmatmul.bf16.vlgmr.msrb.gmra.mxu1 %v6677_v29  ;;  %v6690_v29 = vld [vmem:[#allocation48_spill] sm:$0xff] }
 0x22e   : > { %3119 = vmatmul.bf16.vlgmr.msrb.gmra.mxu2 %v6678_v60 }
 0x22f   : > { %3148 = vmatmul.bf16.vlgmr.msrb.gmra.mxu3 %v6679_v20 }
 0x231   : > { %v2888_v4 = vpop.f32.mrf.mxu2  ;;  %v2832_v42 = vpop.f32.mrf.mxu0 }
 0x232   : > { %v2889_v37 = vadd.f32 %v2888_v4, %v2860_v61  ;;  %v2917_v53 = vpop.f32.mrf.mxu3  ;;  %v2833_v45 = vadd.f32 %v2832_v42, %v6413_v35  ;;  %v2861_v21 = vpop.f32.mrf.mxu1  ;;  %v6683_v35 = vld [vmem:[#allocation41_spill] sm:$0xff]  ;;  %v6688_v61 = vld [vmem:[#allocation46_spill] sm:$0xff] }
 0x234   : > { %v6463_v44 = vadd.f32 %v2917_v53, %v2889_v37  ;;  %v2862_v54 = vadd.f32 %v2861_v21, %v2833_v45 }
 0x239   : > { %v2890_v57 = vpop.f32.mrf.mxu2  ;;  %v2835_v52 = vpop.f32.mrf.mxu0 }
 0x23a   : > { %v2891_v8 = vadd.f32 %v2890_v57, %v2862_v54  ;;  %v2919_v19 = vpop.f32.mrf.mxu3  ;;  %v2836_v0 = vadd.f32 %v2835_v52, %v6427_v7  ;;  %v2864_v40 = vpop.f32.mrf.mxu1 }
 0x23c   : > { %v6466_v62 = vadd.f32 %v2919_v19, %v2891_v8  ;;  %v2865_v18 = vadd.f32 %v2864_v40, %v2836_v0  ;;  %3066 = vmatmul.bf16.gmra.mxu0 %v6680_v46 }
 0x23d   : > { %3095 = vmatmul.bf16.gmra.mxu1 %v6681_v24 }
 0x23e   : > { %3124 = vmatmul.bf16.gmra.mxu2 %v6682_v43 }
 0x23f   : > { %3153 = vmatmul.bf16.gmra.mxu3 %v6683_v35 }
 0x241   : > { %v2893_v25 = vpop.f32.mrf.mxu2  ;;  %v2837_v39 = vpop.f32.mrf.mxu0 }
 0x242   : > { %v2894_v49 = vadd.f32 %v2893_v25, %v2865_v18  ;;  %v2922_v56 = vpop.f32.mrf.mxu3  ;;  %v2838_v47 = vadd.f32 %v2837_v39, %v6439_v41  ;;  %v2866_v26 = vpop.f32.mrf.mxu1  ;;  %v6687_v41 = vld [vmem:[#allocation45_spill] sm:$0xff] }
 0x244   : > { %v6473_v7 = vadd.f32 %v2922_v56, %v2894_v49  ;;  %v2867_v51 = vadd.f32 %v2866_v26, %v2838_v47 }
 0x249   : > { %v2895_v28 = vpop.f32.mrf.mxu2  ;;  %v2840_v50 = vpop.f32.mrf.mxu0 }
 0x24a   : > { %v2896_v48 = vadd.f32 %v2895_v28, %v2867_v51  ;;  %v2924_v33 = vpop.f32.mrf.mxu3  ;;  %v2841_v58 = vadd.f32 %v2840_v50, %v6445_v17  ;;  %v2869_v59 = vpop.f32.mrf.mxu1 }
 0x24c   : > { %v6476_v6 = vadd.f32 %v2924_v33, %v2896_v48  ;;  %v2870_v12 = vadd.f32 %v2869_v59, %v2841_v58  ;;  %3071 = vmatmul.bf16.gmra.mxu0 %v6684_v34 }
 0x24d   : > { %3100 = vmatmul.bf16.gmra.mxu1 %v6685_v63 }
 0x24e   : > { %3129 = vmatmul.bf16.gmra.mxu2 %v6686_v10 }
 0x24f   : > { %3158 = vmatmul.bf16.gmra.mxu3 %v6687_v41 }
 0x251   : > { %v2898_v30 = vpop.f32.mrf.mxu2  ;;  %v2842_v55 = vpop.f32.mrf.mxu0 }
 0x252   : > { %v2899_v22 = vadd.f32 %v2898_v30, %v2870_v12  ;;  %v2927_v16 = vpop.f32.mrf.mxu3  ;;  %v2843_v27 = vadd.f32 %v2842_v55, %v6447_v36  ;;  %v2871_v23 = vpop.f32.mrf.mxu1  ;;  %v6691_v36 = vld [vmem:[#allocation49_spill] sm:$0xff] }
 0x254   : > { %v6483_v17 = vadd.f32 %v2927_v16, %v2899_v22  ;;  %v2872_v31 = vadd.f32 %v2871_v23, %v2843_v27 }
 0x259   : > { %v2900_v13 = vpop.f32.mrf.mxu2  ;;  %v2845_v38 = vpop.f32.mrf.mxu0 }
 0x25a   : > { %v2901_v1 = vadd.f32 %v2900_v13, %v2872_v31  ;;  %v2929_v15 = vpop.f32.mrf.mxu3  ;;  %v2846_v9 = vadd.f32 %v2845_v38, %v6453_v11  ;;  %v2874_v14 = vpop.f32.mrf.mxu1 }
 0x25c   : > { %v6486_v5 = vadd.f32 %v2929_v15, %v2901_v1  ;;  %v2875_v2 = vadd.f32 %v2874_v14, %v2846_v9  ;;  %3076 = vmatmul.bf16.gmra.mxu0 %v6688_v61 }
 0x25d   : > { %3105 = vmatmul.bf16.gmra.mxu1 %v6689_v3 }
 0x25e   : > { %3134 = vmatmul.bf16.gmra.mxu2 %v6690_v29 }
 0x25f   : > { %3163 = vmatmul.bf16.gmra.mxu3 %v6691_v36 }
 0x261   : > { %v2903_v60 = vpop.f32.mrf.mxu2  ;;  %v2847_v37 = vpop.f32.mrf.mxu0 }
 0x262   : > { %v2904_v20 = vadd.f32 %v2903_v60, %v2875_v2  ;;  %v2932_v4 = vpop.f32.mrf.mxu3  ;;  %v2848_v53 = vadd.f32 %v2847_v37, %v6456_v32  ;;  %v2876_v42 = vpop.f32.mrf.mxu1 }
 0x264   : > { %v6493_v11 = vadd.f32 %v2932_v4, %v2904_v20  ;;  %v2877_v45 = vadd.f32 %v2876_v42, %v2848_v53  ;;  %v306_v4 = vld [vmem:[#allocation2] sm:$0xff] }
 0x269   : > { %v2905_v21 = vpop.f32.mrf.mxu2  ;;  %v2946_v8 = vpop.f32.mrf.mxu0 }
 0x26a   : > { %v2906_v54 = vadd.f32 %v2905_v21, %v2877_v45  ;;  %v2934_v57 = vpop.f32.mrf.mxu3  ;;  %v2975_v19 = vpop.f32.mrf.mxu1  ;;  %v2947_v10 = vadd.f32 %v2946_v8, %v6463_v44 }
 0x26c   : > { %v6495_v52 = vadd.f32 %v2934_v57, %v2906_v54  ;;  %v2976_v55 = vadd.f32 %v2975_v19, %v2947_v10 }
 0x271   : > { %v3004_v0 = vpop.f32.mrf.mxu2  ;;  %v2948_v18 = vpop.f32.mrf.mxu0 }
 0x272   : > { %v3033_v40 = vpop.f32.mrf.mxu3  ;;  %v2977_v46 = vpop.f32.mrf.mxu1  ;;  %v3005_v27 = vadd.f32 %v3004_v0, %v2976_v55  ;;  %v2949_v23 = vadd.f32 %v2948_v18, %v6466_v62  ;;  %v308_v18 = vld [vmem:[#allocation2 + $0x18] sm:$0xff] }
 0x274   : > { %v3034_v13 = vadd.f32 %v3033_v40, %v3005_v27  ;;  %v2978_v44 = vadd.f32 %v2977_v46, %v2949_v23 }
 0x279   : > { %v3006_v24 = vpop.f32.mrf.mxu2  ;;  %v2951_v35 = vpop.f32.mrf.mxu0 }
 0x27a   : > { %v3035_v43 = vpop.f32.mrf.mxu3  ;;  %v2980_v25 = vpop.f32.mrf.mxu1  ;;  %v3007_v14 = vadd.f32 %v3006_v24, %v2978_v44  ;;  %v2952_v2 = vadd.f32 %v2951_v35, %v6473_v7 }
 0x27c   : > { %v3036_v29 = vadd.f32 %v3035_v43, %v3007_v14  ;;  %v2981_v37 = vadd.f32 %v2980_v25, %v2952_v2 }
 0x281   : > { %v3009_v32 = vpop.f32.mrf.mxu2  ;;  %v2953_v56 = vpop.f32.mrf.mxu0 }
 0x282   : > { %v3038_v49 = vpop.f32.mrf.mxu3  ;;  %v2982_v39 = vpop.f32.mrf.mxu1  ;;  %v3010_v45 = vadd.f32 %v3009_v32, %v2981_v37  ;;  %v2954_v54 = vadd.f32 %v2953_v56, %v6476_v6 }
 0x284   : > { %v3039_v19 = vadd.f32 %v3038_v49, %v3010_v45  ;;  %v2983_v24 = vadd.f32 %v2982_v39, %v2954_v54  ;;  %v310_v49 = vld [vmem:[#allocation2 + $0x68] sm:$0xff]  ;;  %v314_v45 = vld [vmem:[#allocation2 + $0x20] sm:$0xff] }
 0x289   : > { %v3011_v47 = vpop.f32.mrf.mxu2  ;;  %v2956_v51 = vpop.f32.mrf.mxu0 }
 0x28a   : > { %v3040_v26 = vpop.f32.mrf.mxu3  ;;  %v6497_v28 = vpop.f32.mrf.mxu1  ;;  %v3012_v10 = vadd.f32 %v3011_v47, %v2983_v24  ;;  %v2957_v55 = vadd.f32 %v2956_v51, %v6483_v17 }
 0x28c   : > { %v3041_v6 = vadd.f32 %v3040_v26, %v3012_v10 }
 0x291   : > { %v6499_v48 = vpop.f32.mrf.mxu2  ;;  %v6503_v50 = vpop.f32.mrf.mxu0 }
 0x292   : > { %v6501_v33 = vpop.f32.mrf.mxu3  ;;  %v6505_v58 = vpop.f32.mrf.mxu1  ;;  %v2959_v47 = vadd.f32 %v6503_v50, %v6486_v5 }
 0x299   : > { %v6507_v59 = vpop.f32.mrf.mxu2  ;;  %v6511_v34 = vpop.f32.mrf.mxu0 }
 0x29a   : > { %v6509_v12 = vpop.f32.mrf.mxu3  ;;  %v6513_v63 = vpop.f32.mrf.mxu1  ;;  %v2962_v5 = vadd.f32 %v6511_v34, %v6493_v11 }
 0x2a1   : > { %v6516_v41 = vpop.f32.mrf.mxu2  ;;  %v6520_v22 = vpop.f32.mrf.mxu0 }
 0x2a2   : > { %v6518_v30 = vpop.f32.mrf.mxu3  ;;  %v6522_v16 = vpop.f32.mrf.mxu1  ;;  %v2964_v11 = vadd.f32 %v6520_v22, %v6495_v52 }
 0x2a9   : > { %v6525_v31 = vpop.f32.mrf.mxu2  ;;  %v3062_v15 = vpop.f32.mrf.mxu0 }
 0x2aa   : > { %v6527_v1 = vpop.f32.mrf.mxu3  ;;  %v3091_v38 = vpop.f32.mrf.mxu1  ;;  %v3063_v9 = vadd.f32 %v3062_v15, %v3034_v13 }
 0x2ac   : > { %v3092_v61 = vadd.f32 %v3091_v38, %v3063_v9  ;;  %v2986_v38 = vadd.f32 %v6497_v28, %v2957_v55  ;;  %v2988_v28 = vadd.f32 %v6505_v58, %v2959_v47  ;;  %v2991_v58 = vadd.f32 %v6513_v63, %v2962_v5 }
 0x2ae   : > { %v3015_v39 = vadd.f32 %v6499_v48, %v2986_v38  ;;  %v3017_v48 = vadd.f32 %v6507_v59, %v2988_v28  ;;  %v3020_v59 = vadd.f32 %v6516_v41, %v2991_v58 }
 0x2b0   : > { %v3044_v26 = vadd.f32 %v6501_v33, %v3015_v39  ;;  %v3046_v33 = vadd.f32 %v6509_v12, %v3017_v48  ;;  %v3049_v12 = vadd.f32 %v6518_v30, %v3020_v59 }
 0x2b1   : > { %v3120_v3 = vpop.f32.mrf.mxu2  ;;  %v3064_v20 = vpop.f32.mrf.mxu0 }
 0x2b2   : > { %v3121_v36 = vadd.f32 %v3120_v3, %v3092_v61  ;;  %v3149_v60 = vpop.f32.mrf.mxu3  ;;  %v3093_v62 = vpop.f32.mrf.mxu1  ;;  %v3065_v42 = vadd.f32 %v3064_v20, %v3036_v29  ;;  %v312_v29 = vld [vmem:[#allocation2 + $0x48] sm:$0xff] }
 0x2b4   : > { %v3150_v53 = vadd.f32 %v3149_v60, %v3121_v36  ;;  %v3094_v57 = vadd.f32 %v3093_v62, %v3065_v42 }
 0x2b6   : > { %v3170_v21 = vadd.f32 %v3150_v53, %v306_v4 }
 0x2b8   : > { %3186 = vst [vmem:[#allocation2] sm:$0xff] %v3170_v21 }
 0x2b9   : > { %v3122_v8 = vpop.f32.mrf.mxu2  ;;  %v3067_v40 = vpop.f32.mrf.mxu0 }
 0x2ba   : > { %v3123_v7 = vadd.f32 %v3122_v8, %v3094_v57  ;;  %v3151_v0 = vpop.f32.mrf.mxu3  ;;  %v3096_v46 = vpop.f32.mrf.mxu1  ;;  %v3068_v35 = vadd.f32 %v3067_v40, %v3039_v19 }
 0x2bc   : > { %v3152_v43 = vadd.f32 %v3151_v0, %v3123_v7  ;;  %v3097_v32 = vadd.f32 %v3096_v46, %v3068_v35  ;;  %v2993_v46 = vadd.f32 %v6522_v16, %v2964_v11 }
 0x2be   : > { %v3172_v25 = vadd.f32 %v3152_v43, %v308_v18  ;;  %v316_v18 = vld [vmem:[#allocation2 + $0x38] sm:$0xff]  ;;  %v3022_v41 = vadd.f32 %v6525_v31, %v2993_v46 }
 0x2c0   : > { %3188 = vst [vmem:[#allocation2 + $0x18] sm:$0xff] %v3172_v25  ;;  %v3051_v22 = vadd.f32 %v6527_v1, %v3022_v41 }
 0x2c1   : > { %v3125_v27 = vpop.f32.mrf.mxu2  ;;  %v3069_v13 = vpop.f32.mrf.mxu0 }
 0x2c2   : > { %v3126_v56 = vadd.f32 %v3125_v27, %v3097_v32  ;;  %v3154_v23 = vpop.f32.mrf.mxu3  ;;  %v3098_v15 = vpop.f32.mrf.mxu1  ;;  %v3070_v9 = vadd.f32 %v3069_v13, %v3041_v6  ;;  %v318_v32 = vld [vmem:[#allocation2 + $0x70] sm:$0xff] }
 0x2c4   : > { %v3155_v44 = vadd.f32 %v3154_v23, %v3126_v56  ;;  %v3099_v17 = vadd.f32 %v3098_v15, %v3070_v9  ;;  %v320_v15 = vld [vmem:[#allocation2 + $0x28] sm:$0xff] }
 0x2c6   : > { %v3174_v14 = vadd.f32 %v3155_v44, %v310_v49 }
 0x2c8   : > { %3190 = vst [vmem:[#allocation2 + $0x68] sm:$0xff] %v3174_v14 }
 0x2c9   : > { %v3127_v51 = vpop.f32.mrf.mxu2  ;;  %v3072_v3 = vpop.f32.mrf.mxu0 }
 0x2ca   : > { %v3128_v2 = vadd.f32 %v3127_v51, %v3099_v17  ;;  %v3156_v61 = vpop.f32.mrf.mxu3  ;;  %v3101_v36 = vpop.f32.mrf.mxu1  ;;  %v3073_v20 = vadd.f32 %v3072_v3, %v3044_v26 }
 0x2cc   : > { %v3157_v60 = vadd.f32 %v3156_v61, %v3128_v2  ;;  %v3102_v50 = vadd.f32 %v3101_v36, %v3073_v20 }
 0x2ce   : > { %v3176_v4 = vadd.f32 %v3157_v60, %v312_v29 }
 0x2d0   : > { %3192 = vst [vmem:[#allocation2 + $0x48] sm:$0xff] %v3176_v4 }
 0x2d1   : > { %v3130_v62 = vpop.f32.mrf.mxu2  ;;  %v3074_v42 = vpop.f32.mrf.mxu0 }
 0x2d2   : > { %v3131_v37 = vadd.f32 %v3130_v62, %v3102_v50  ;;  %v3159_v53 = vpop.f32.mrf.mxu3  ;;  %v3103_v21 = vpop.f32.mrf.mxu1  ;;  %v3075_v57 = vadd.f32 %v3074_v42, %v3046_v33 }
 0x2d4   : > { %v3160_v54 = vadd.f32 %v3159_v53, %v3131_v37  ;;  %v3104_v34 = vadd.f32 %v3103_v21, %v3075_v57 }
 0x2d6   : > { %v3178_v8 = vadd.f32 %v3160_v54, %v314_v45 }
 0x2d8   : > { %3194 = vst [vmem:[#allocation2 + $0x20] sm:$0xff] %v3178_v8 }
 0x2d9   : > { %v3132_v19 = vpop.f32.mrf.mxu2  ;;  %v3077_v40 = vpop.f32.mrf.mxu0 }
 0x2da   : > { %v3133_v7 = vadd.f32 %v3132_v19, %v3104_v34  ;;  %v3161_v0 = vpop.f32.mrf.mxu3  ;;  %v3078_v24 = vadd.f32 %v3077_v40, %v3049_v12  ;;  %v3106_v43 = vpop.f32.mrf.mxu1 }
 0x2dc   : > { %v3162_v63 = vadd.f32 %v3161_v0, %v3133_v7  ;;  %v3107_v10 = vadd.f32 %v3106_v43, %v3078_v24 }
 0x2de   : > { %v3180_v35 = vadd.f32 %v3162_v63, %v316_v18 }
 0x2e0   : > { %3196 = vst [vmem:[#allocation2 + $0x38] sm:$0xff] %v3180_v35 }
 0x2e1   : > { %v3135_v52 = vpop.f32.mrf.mxu2  ;;  %v3079_v30 = vpop.f32.mrf.mxu0 }
 0x2e2   : > { %v3136_v25 = vadd.f32 %v3135_v52, %v3107_v10  ;;  %v3164_v55 = vpop.f32.mrf.mxu3  ;;  %v3080_v6 = vadd.f32 %v3079_v30, %v3051_v22  ;;  %v3108_v23 = vpop.f32.mrf.mxu1 }
 0x2e4   : > { %v3165_v27 = vadd.f32 %v3164_v55, %v3136_v25  ;;  %v3109_v16 = vadd.f32 %v3108_v23, %v3080_v6 }
 0x2e6   : > { %v3182_v56 = vadd.f32 %v3165_v27, %v318_v32 }
 0x2e8   : > { %3198 = vst [vmem:[#allocation2 + $0x70] sm:$0xff] %v3182_v56 }
 0x2e9   : > { %v3137_v13 = vpop.f32.mrf.mxu2 }
 0x2ea   : > { %v3138_v49 = vadd.f32 %v3137_v13, %v3109_v16  ;;  %v3166_v31 = vpop.f32.mrf.mxu3 }
 0x2ec   : > { %v3167_v38 = vadd.f32 %v3166_v31, %v3138_v49  ;;  %3204 = sbr.rel (%p4679_p2) target bundleno = 774 (0x306), region = 52 }
 0x2ee   : > { %v3184_v44 = vadd.f32 %v3167_v38, %v320_v15 }
 0x2f0   : > { %3200 = vst [vmem:[#allocation2 + $0x28] sm:$0xff] %v3184_v44 }
 0x2f1   : > { %v3205_v1 = vld [vmem:[#allocation2 + $0x30] sm:$0xff]  ;;  %v3221_v9 = vld [vmem:[#allocation8] sm:$0x3]  ;;  %v3207_v17 = vld [vmem:[#allocation2 + $0x58] sm:$0xff] }
 0x2f2   : > { %v3206_v39 = vld [vmem:[#allocation2] sm:$0xff]  ;;  %v3223_v14 = vperm.slane %v3221_v9, 0  ;;  %v3224_v47 = vperm.slane %v3221_v9, 1  ;;  %v3208_v51 = vld [vmem:[#allocation2 + $0x18] sm:$0xff]  ;;  %v3209_v26 = vld [vmem:[#allocation2 + $0x50] sm:$0xff] }
 0x2f3   : > { %v3210_v29 = vld [vmem:[#allocation2 + $0x68] sm:$0xff]  ;;  %v3213_v4 = vld [vmem:[#allocation2 + $0x40] sm:$0xff]  ;;  %v3215_v33 = vld [vmem:[#allocation2 + $0x10] sm:$0xff] }
 0x2f4   : > { %v3227_v2 = vadd.f32 %v3223_v14, %v3205_v1  ;;  %v3228_v61 = vadd.f32 %v3224_v47, %v3206_v39  ;;  %v3229_v3 = vadd.f32 %v3223_v14, %v3207_v17  ;;  %v3230_v36 = vadd.f32 %v3224_v47, %v3208_v51  ;;  %v3211_v28 = vld [vmem:[#allocation2 + $0x8] sm:$0xff]  ;;  %v3214_v50 = vld [vmem:[#allocation2 + $0x20] sm:$0xff]  ;;  %v3216_v53 = vld [vmem:[#allocation2 + $0x38] sm:$0xff] }
 0x2f5   : > { %v3231_v60 = vadd.f32 %v3223_v14, %v3209_v26  ;;  %v3212_v20 = vld [vmem:[#allocation2 + $0x48] sm:$0xff]  ;;  %v3232_v48 = vadd.f32 %v3224_v47, %v3210_v29  ;;  %v3233_v5 = vadd.f32 %v3223_v14, %v3211_v28  ;;  %v3235_v37 = vadd.f32 %v3223_v14, %v3213_v4  ;;  %v3217_v45 = vld [vmem:[#allocation2 + $0x60] sm:$0xff]  ;;  %v3218_v58 = vld [vmem:[#allocation2 + $0x70] sm:$0xff] }
 0x2f6   : > { %3243 = vst [vmem:[#allocation9] sm:$0xff] %v3227_v2  ;;  %v3234_v62 = vadd.f32 %v3224_v47, %v3212_v20  ;;  %v3236_v42 = vadd.f32 %v3224_v47, %v3214_v50  ;;  %v3237_v21 = vadd.f32 %v3223_v14, %v3215_v33  ;;  %v3238_v54 = vadd.f32 %v3224_v47, %v3216_v53  ;;  %v3219_v57 = vld [vmem:[#allocation2 + $0x78] sm:$0xff] }
 0x2f7   : > { %3244 = vst [vmem:[#allocation9 + $0x8] sm:$0xff] %v3228_v61  ;;  %v3239_v59 = vadd.f32 %v3223_v14, %v3217_v45  ;;  %v3220_v8 = vld [vmem:[#allocation2 + $0x28] sm:$0xff]  ;;  %v3240_v11 = vadd.f32 %v3224_v47, %v3218_v58  ;;  %v3241_v34 = vadd.f32 %v3223_v14, %v3219_v57 }
 0x2f8   : > { %3245 = vst [vmem:[#allocation9 + $0x10] sm:$0xff] %v3229_v3  ;;  %v3242_v19 = vadd.f32 %v3224_v47, %v3220_v8 }
 0x2f9   : > { %3246 = vst [vmem:[#allocation9 + $0x18] sm:$0xff] %v3230_v36 }
 0x2fa   : > { %3247 = vst [vmem:[#allocation9 + $0x20] sm:$0xff] %v3231_v60 }
 0x2fb   : > { %3248 = vst [vmem:[#allocation9 + $0x28] sm:$0xff] %v3232_v48 }
 0x2fc   : > { %3249 = vst [vmem:[#allocation9 + $0x30] sm:$0xff] %v3233_v5 }
 0x2fd   : > { %3250 = vst [vmem:[#allocation9 + $0x38] sm:$0xff] %v3234_v62 }
 0x2fe   : > { %3251 = vst [vmem:[#allocation9 + $0x40] sm:$0xff] %v3235_v37 }
 0x2ff   : > { %3252 = vst [vmem:[#allocation9 + $0x48] sm:$0xff] %v3236_v42 }
 0x300   : > { %3253 = vst [vmem:[#allocation9 + $0x50] sm:$0xff] %v3237_v21 }
 0x301   : > { %3254 = vst [vmem:[#allocation9 + $0x58] sm:$0xff] %v3238_v54 }
 0x302   : > { %3255 = vst [vmem:[#allocation9 + $0x60] sm:$0xff] %v3239_v59 }
 0x303   : > { %3256 = vst [vmem:[#allocation9 + $0x68] sm:$0xff] %v3240_v11 }
 0x304   : > { %3257 = vst [vmem:[#allocation9 + $0x70] sm:$0xff] %v3241_v34 }
 0x305   : > { %3258 = vst [vmem:[#allocation9 + $0x78] sm:$0xff] %v3242_v19 }
 0x306 PF: > { %p5033_p3 = scmp.eq.s32.totalorder %s5334_s18, 1  ;;  %s3272_s25 = sshll.u32 %s6576_s3, 4  ;;  %s3273_s25 = int_to_ptr.hbm [resolvable:$true] %s3272_s25 }
 0x307   : > { %s5282_s22 = smov [#allocation9]   ;;  %s5283_s26 = smov 256  }
 0x308   : > { %s3270_s24 = sshll.u32 %s5282_s22, 4  ;;  %s5284_s27 = smov 16   ;;  %s3271_s24 = int_to_ptr.vmem [resolvable:$true] %s3270_s24 }
 0x309   : > { %5016 = dma.vmem_to_hbm [thread:$0]  (%p5033_p3), %s3271_s24, 2048, %s3273_s25, [#allocation5], %s5283_s26, %s5283_s26, %s5284_s27  }
 0x30a   : > { %5248 = dma.done.wait (%p5033_p3), [#allocation5], 2048  }
 0x30b   : > { %5250 = vsyncadd (%p5033_p3), [#allocation5], 4294965248 }
 0x30c PF: > { %s20_s17 = sadd.s32 1, %s5273_s17   ;;  %s6692_s18 = sld [smem:[#allocation14_spill]] }
 0x30d   : > { %p17_p4 = scmp.ge.s32.totalorder %s20_s17, 4   ;;  %s6693_s12 = smov %s5257_s13 }
 0x30e   : > { %s6694_s13 = smov %s5261_s14  ;;  %s6695_s14 = smov %s5385_s20 }
 0x30f   : > { %s6696_s15 = smov %s5269_s16  ;;  %19 = sbr.rel (!%p17_p4) target bundleno = 10 (0xa), region = 96 }
 0x312   : > { %s6697_s16 = smov %s6692_s18 }
 0x314   :  { %3289 = vsyncpa [#allocation4], 1 }
 0x315   :  { %3291 = vsyncpa [#allocation4 + $0x1], 1 }
 0x316   :  { %3292 = vsyncpa [#allocation7], 1 }
 0x317   :  { %3294 = vsyncpa [#allocation7 + $0x1], 1 }
 0x318   :  { %3295 = vsyncpa [#allocation5], 1 }
 0x319   :  { %3297 = vsyncpa [#allocation5 + $0x1], 1 }

</bundles_post_ra>
